<compile_context>
chip_gen: v7x
topology: tpu7x:2x2x1
jax: 0.10.0
libtpu: 0.0.40
codegen_flags: <defaults>
</compile_context>

<pallas_src>
import functools
import math

import jax
import jax.numpy as jnp
from jax import lax
from jax.experimental import pallas as pl
from jax.experimental.pallas import tpu as pltpu

LANE = 128
NEG_SLOPE = 0.01        # F.leaky_relu default negative_slope
LN_EPS = 1e-5           # nn.LayerNorm default eps


def _round_up(v, m):
    return ((v + m - 1) // m) * m


def _tarep_kernel(*refs, num_layers, k_hops, feat_dims, mxu_dtype):
    """Fully fused TArep forward: [rep -> TAGraph] * num_layers.

    refs layout:
      adj (mxu_dtype), x (f32), inv_colsum (N,1), sqrt_att (N,1), att_row (1,N),
      then 9 param refs per layer
        (mask, w1t, b1, gamma, beta, w2t, b2, wt_stack, bt),
      then out_x, out_kk.
    Feature axes are zero-padded to multiples of 128 lanes by the wrapper;
    feat_dims[i] is the REAL (unpadded) feature width entering layer i.
    """
    adj_ref, x_ref, invc_ref, sqatt_ref, attrow_ref = refs[:5]
    p_refs = refs[5:5 + 9 * num_layers]
    out_x_ref = refs[5 + 9 * num_layers]
    out_kk_ref = refs[6 + 9 * num_layers]

    adj_mx = adj_ref[...]                 # (N, N), already in MXU dtype, loaded ONCE
    x = x_ref[...]                        # (N, Fp0) f32, zero-padded lanes
    inv_colsum = invc_ref[...]            # (N, 1)  1 / column-sums (guarded)
    sqrt_att = sqatt_ref[...]             # (N, 1)  sqrt(colsum / allsum)
    att_row = attrow_ref[...]             # (1, N)  colsum / allsum as a row vector
    n = adj_mx.shape[0]
    # Hoisted once: row of ones used as an MXU "sum over rows" operand.
    ones_row = jnp.ones((1, n), jnp.float32)

    kk = jnp.zeros((1, 1), jnp.float32)

    for li in range(num_layers):
        (m_ref, w1t_ref, b1_ref, g_ref, be_ref,
         w2t_ref, b2_ref, wt_ref, bt_ref) = p_refs[9 * li:9 * li + 9]
        f_real = feat_dims[li]
        mask = m_ref[...]                 # (1, Fp): 1.0 on real lanes, 0.0 on pads

        # ===================== rep(num_features[li]) =====================
        normx = x * inv_colsum                                 # (N, Fp)
        # avg = att^T @ normx: axis-0 reduction on the (otherwise idle) MXU.
        avg = jnp.dot(att_row, normx,
                      preferred_element_type=jnp.float32)      # (1, Fp)

        y = jnp.dot(avg, w1t_ref[...],
                    preferred_element_type=jnp.float32) + b1_ref[...]
        y = jnp.maximum(y, 0.0)                                # relu
        # LayerNorm over the f_real real lanes, two-pass variance (padded lanes of
        # y are zero, mask keeps the centered value zero on pads).
        mu = jnp.sum(y, axis=-1, keepdims=True) / f_real
        d = (y - mu) * mask
        var = jnp.sum(d * d, axis=-1, keepdims=True) / f_real
        y = d * lax.rsqrt(var + LN_EPS) * g_ref[...] + be_ref[...]
        y = jnp.dot(y, w2t_ref[...],
                    preferred_element_type=jnp.float32) + b2_ref[...]
        # 0.25 + 2*sigmoid; force padded lanes to exactly 0 so every downstream
        # consumer (qq, x*y, sumdiag, z) is safe without extra masking.
        y = (0.25 + 2.0 / (1.0 + jnp.exp(-y))) * mask

        # Scalar "k" without materializing cov / ls (cov = dimmin^T dimmin):
        #   diag(cov)_i = sum_rows dimmin[:, i]^2        -> MXU row-matvec
        #   sum(cov)    = sum_rows (rowsum(dimmin))^2    -> O(N) reduce
        #   sum(ls)     = q^T cov q = sum_rows (dimmin.q)^2
        #   diag-sum(ls)= sum_i diag(cov)_i q_i^2
        dimmin = sqrt_att * (normx - avg)                      # (N, Fp)
        d2 = dimmin * dimmin
        diagcov = jnp.dot(ones_row, d2,
                          preferred_element_type=jnp.float32)  # (1, Fp) on MXU
        sumdiagcov = jnp.sum(diagcov, axis=1, keepdims=True)   # (1, 1)
        rowsum = jnp.sum(dimmin, axis=1, keepdims=True)        # (N, 1) lane reduce
        z = jnp.sum(dimmin * y, axis=1, keepdims=True)         # (N, 1) lane reduce
        sumcov = jnp.sum(rowsum * rowsum, axis=0, keepdims=True)   # O(N) only
        sumls = jnp.sum(z * z, axis=0, keepdims=True)              # O(N) only
        sumdiag = jnp.sum(diagcov * y * y, axis=1, keepdims=True)
        qq = jnp.sum(y * y, axis=1, keepdims=True)             # padded lanes are 0

        loss = sumdiag - (sumls - sumdiag) / f_real
        lscov = sumdiagcov - (sumcov - sumdiagcov) / f_real
        kk = kk + (loss / lscov) * (f_real / qq)

        x = x * y                                              # per-feature gating

        # ============ TAGraph(num_features[li] -> num_features[li+1]) ============
        # Per-hop accumulation: acc += hop_j @ W^T[j].  No hops list, no concat —
        # smallest live set; wt_ref is already padded per hop and in MXU dtype.
        h_mx = x.astype(mxu_dtype)
        acc = jnp.dot(h_mx, wt_ref[0], preferred_element_type=jnp.float32)
        for j in range(1, k_hops + 1):
            h_mx = jnp.dot(adj_mx, h_mx,
                           preferred_element_type=jnp.float32).astype(mxu_dtype)
            acc = acc + jnp.dot(h_mx, wt_ref[j],
                                preferred_element_type=jnp.float32)
        acc = acc + bt_ref[...]
        if li != num_layers - 1:
            # F.leaky_relu; F.dropout(x, 0) is identity and not emitted.
            acc = jnp.where(acc > 0, acc, NEG_SLOPE * acc)
        x = acc

    out_x_ref[...] = x.astype(out_x_ref.dtype)
    out_kk_ref[...] = jnp.broadcast_to(kk, out_kk_ref.shape)


# ----------------------------- host-side wrapper -----------------------------

def _pad2(a, rows, cols):
    r, c = a.shape
    return jnp.pad(a, ((0, rows - r), (0, cols - c)))


def _pad_row(v, cols):
    return jnp.pad(v.reshape(1, -1), ((0, 0), (0, cols - v.shape[0])))


def _pad_tag_weight_stack(wt, f_in, f_out, fp_in, fp_out, k):
    """(k+1, fp_in, fp_out) stack; slab j holds hop-j block of W^T, zero padded."""
    out = jnp.zeros((k + 1, fp_in, fp_out), jnp.float32)
    for j in range(k + 1):
        out = out.at[j, :f_in, :f_out].set(wt[j * f_in:(j + 1) * f_in, :])
    return out


@functools.partial(jax.jit, static_argnames=("k", "mxu_dtype"))
def tarep_forward(x, adj, params, *, k=2, mxu_dtype=jnp.bfloat16):
    """Fused TArep forward. Returns (x_out, kk)."""
    n, f0 = x.shape
    num_layers = len(params)
    feat = [f0] + [p["wt"].shape[1] for p in params]
    fp = [_round_up(f, LANE) for f in feat]

    # Adjacency column statistics in the wrapper (tiny XLA reduce): the kernel
    # never needs the f32 adjacency or an (N,N) transpose.
    colsum = jnp.sum(adj, axis=0)                          # torch.sparse.sum(adj,[0])
    colsum_safe = jnp.maximum(colsum, 1e-12)               # guard isolated columns
    allsum = jnp.sum(colsum)
    att = colsum / allsum
    inv_colsum = (1.0 / colsum_safe).reshape(n, 1)
    sqrt_att = jnp.sqrt(att).reshape(n, 1)
    att_row = att.reshape(1, n)

    inputs = [adj.astype(mxu_dtype),                       # single MXU-dtype copy
              _pad2(x, n, fp[0]),
              inv_colsum, sqrt_att, att_row]
    for li, p in enumerate(params):
        fi, fo = feat[li], feat[li + 1]
        fpi, fpo = fp[li], fp[li + 1]
        mask = (jnp.arange(fpi) < fi).astype(jnp.float32).reshape(1, fpi)
        inputs.extend([
            mask,
            _pad2(p["w1t"], fpi, fpi),                     # rep matmuls stay f32
            _pad_row(p["b1"], fpi),
            _pad_row(p["gamma"], fpi),   # zero-padded gamma kills padded lanes
            _pad_row(p["beta"], fpi),
            _pad2(p["w2t"], fpi, fpi),
            _pad_row(p["b2"], fpi),
            _pad_tag_weight_stack(p["wt"], fi, fo, fpi, fpo, k).astype(mxu_dtype),
            _pad_row(p["bt"], fpo),
        ])

    kernel = functools.partial(
        _tarep_kernel, num_layers=num_layers, k_hops=k,
        feat_dims=tuple(feat[:-1]), mxu_dtype=mxu_dtype)

    # Explicit VMEM budget: inputs + outputs + f32/mxu working set, ~25% headroom,
    # clamped to [32 MiB, 64 MiB] so it is valid on v5e/v6e/v7x alike.
    mxu_bytes = jnp.dtype(mxu_dtype).itemsize
    max_fp = max(fp)
    est = sum(int(a.size) * a.dtype.itemsize for a in inputs)
    est += n * fp[-1] * 4 + LANE * 4                       # outputs
    est += 4 * n * max_fp * 4                              # x / normx / dimmin / acc
    est += 2 * n * max_fp * mxu_bytes                      # hop operands in MXU dtype
    vmem_limit = int(min(max(est * 5 // 4, 32 * 1024 * 1024), 64 * 1024 * 1024))

    # No grid: one whole-array invocation -> adj and every weight are
    # single-buffered in VMEM (no pipeline double-buffering of invariant inputs).
    out_x, out_kk = pl.pallas_call(
        kernel,
        out_shape=(jax.ShapeDtypeStruct((n, fp[-1]), jnp.float32),
                   jax.ShapeDtypeStruct((1, LANE), jnp.float32)),
        in_specs=[pl.BlockSpec(memory_space=pltpu.MemorySpace.VMEM)] * len(inputs),
        out_specs=(pl.BlockSpec(memory_space=pltpu.MemorySpace.VMEM),
                   pl.BlockSpec(memory_space=pltpu.MemorySpace.VMEM)),
        compiler_params=pltpu.CompilerParams(vmem_limit_bytes=vmem_limit),
    )(*inputs)
    return out_x[:, :feat[-1]], out_kk[0, 0]


# ------------------------------- parameters -----------------------------------

def init_tarep_params(key, num_features, k):
    """Matches TArep.__init__: per layer a rep(F_i) (lin1, ln, lin2) and a
    TAGraph(F_i, F_{i+1}, k) (xavier_normal_ weight with relu gain)."""
    num_layers = len(num_features) - 1
    gain = math.sqrt(2.0)            # nn.init.calculate_gain('relu')
    params = []
    for i in range(num_layers):
        f_in, f_out = num_features[i], num_features[i + 1]
        key, k1, k2, k3, k4, k5, k6 = jax.random.split(key, 7)
        bnd = 1.0 / math.sqrt(f_in)  # PyTorch default Linear init bound
        w1t = jax.random.uniform(k1, (f_in, f_in), jnp.float32, -bnd, bnd)
        b1 = jax.random.uniform(k2, (f_in,), jnp.float32, -bnd, bnd)
        w2t = jax.random.uniform(k3, (f_in, f_in), jnp.float32, -bnd, bnd)
        b2 = jax.random.uniform(k4, (f_in,), jnp.float32, -bnd, bnd)
        gamma = jnp.ones((f_in,), jnp.float32)
        beta = jnp.zeros((f_in,), jnp.float32)
        fan_in = f_in * (k + 1)
        std = gain * math.sqrt(2.0 / (fan_in + f_out))
        wt = std * jax.random.normal(k5, (fan_in, f_out), dtype=jnp.float32)
        bbnd = 1.0 / math.sqrt(fan_in)
        bt = jax.random.uniform(k6, (f_out,), jnp.float32, -bbnd, bbnd)
        params.append(dict(w1t=w1t, b1=b1, gamma=gamma, beta=beta,
                           w2t=w2t, b2=b2, wt=wt, bt=bt))
    return params


# ------------------------------ pure-JAX reference ----------------------------

def _rep_ref(x, adj, p):
    f = x.shape[1]
    sumlines = jnp.sum(adj, axis=0)
    allsum = jnp.sum(sumlines)
    att = (sumlines / allsum)[:, None]
    normx = x / sumlines[:, None]
    avg = att.T @ normx
    y = avg @ p["w1t"] + p["b1"]
    y = jnp.maximum(y, 0.0)
    mu = jnp.mean(y, axis=-1, keepdims=True)
    var = jnp.mean((y - mu) ** 2, axis=-1, keepdims=True)
    y = (y - mu) / jnp.sqrt(var + LN_EPS) * p["gamma"] + p["beta"]
    y = y @ p["w2t"] + p["b2"]
    y = 0.25 + 2.0 / (1.0 + jnp.exp(-y))
    dimmin = jnp.sqrt(att) * (normx - avg)
    cov = dimmin.T @ dimmin
    q = y.reshape(-1)
    qq = jnp.sum(q * q)
    ls = (cov * q).T * q
    sumdiag = jnp.sum(jnp.diag(ls))
    loss = sumdiag - (jnp.sum(ls) - sumdiag) / f
    sumdiagcov = jnp.sum(jnp.diag(cov))
    lscov = sumdiagcov - (jnp.sum(cov) - sumdiagcov) / f
    kcoef = loss / lscov * f / qq
    return x * y, kcoef


def _tagraph_ref(x, adj, wt, bt, k, leaky):
    hops = [x]
    for _ in range(k):
        hops.append(adj @ hops[-1])
    out = jnp.concatenate(hops, axis=-1) @ wt + bt
    if leaky:
        out = jnp.where(out > 0, out, NEG_SLOPE * out)
    return out


def tarep_reference(x, adj, params, *, k=2):
    num_layers = len(params)
    kk = jnp.float32(0.0)
    for i, p in enumerate(params):
        x, kc = _rep_ref(x, adj, p)
        kk = kk + kc
        x = _tagraph_ref(x, adj, p["wt"], p["bt"], k,
                         leaky=(i != num_layers - 1))
    return x, kk


if __name__ == "__main__":
    key = jax.random.PRNGKey(0)
    N = 128
    num_features = [16, 32, 8]       # num_layers = 2: [rep, TAGraph] x 2
    K_HOPS = 2

    k_x, k_adj, k_par = jax.random.split(key, 3)
    x = jax.random.normal(k_x, (N, num_features[0]), dtype=jnp.float32)

    # dense "adjacency": sparse-ish random graph with self-loops, row-normalized
    raw = jax.random.uniform(k_adj, (N, N), dtype=jnp.float32)
    adj = jnp.where(raw > 0.9, raw, 0.0)
    adj = adj + jnp.eye(N, dtype=jnp.float32)
    adj = adj / jnp.sum(adj, axis=1, keepdims=True)

    params = init_tarep_params(k_par, num_features, K_HOPS)

    with jax.default_matmul_precision("highest"):
        ref_x, ref_kk = tarep_reference(x, adj, params, k=K_HOPS)

    # f32 MXU path: strict correctness check
    out_x, out_kk = tarep_forward(x, adj, params, k=K_HOPS,
                                  mxu_dtype=jnp.float32)
    out_x, out_kk = jax.block_until_ready((out_x, out_kk))
    assert out_x.shape == (N, num_features[-1])
    assert jnp.allclose(out_x, ref_x, atol=1e-3, rtol=1e-3), "x mismatch (f32)"
    assert jnp.allclose(out_kk, ref_kk, atol=1e-3, rtol=1e-3), "kk mismatch (f32)"

    # bf16 MXU path (default; also the v5e-native fast path): f32 accumulate and
    # f32 VPU epilogue; looser tolerance since MXU inputs are rounded to bf16.
    bx, bkk = tarep_forward(x, adj, params, k=K_HOPS, mxu_dtype=jnp.bfloat16)
    bx, bkk = jax.block_until_ready((bx, bkk))
    assert jnp.allclose(bx, ref_x, atol=1e-1, rtol=1e-1), "x mismatch (bf16)"
    assert jnp.allclose(bkk, ref_kk, atol=1e-1, rtol=1e-1), "kk mismatch (bf16)"

    print("KERNEL_OK")
</pallas_src>

<mosaic_0001>
module attributes {stable_mosaic.version = 11 : i64} {
  func.func @_tarep_kernel(%arg0: memref<128x128xf32, #tpu.memory_space<vmem>>, %arg1: memref<128x128xf32, #tpu.memory_space<vmem>>, %arg2: memref<128x1xf32, #tpu.memory_space<vmem>>, %arg3: memref<128x1xf32, #tpu.memory_space<vmem>>, %arg4: memref<1x128xf32, #tpu.memory_space<vmem>>, %arg5: memref<1x128xf32, #tpu.memory_space<vmem>>, %arg6: memref<128x128xf32, #tpu.memory_space<vmem>>, %arg7: memref<1x128xf32, #tpu.memory_space<vmem>>, %arg8: memref<1x128xf32, #tpu.memory_space<vmem>>, %arg9: memref<1x128xf32, #tpu.memory_space<vmem>>, %arg10: memref<128x128xf32, #tpu.memory_space<vmem>>, %arg11: memref<1x128xf32, #tpu.memory_space<vmem>>, %arg12: memref<3x128x128xf32, #tpu.memory_space<vmem>>, %arg13: memref<1x128xf32, #tpu.memory_space<vmem>>, %arg14: memref<1x128xf32, #tpu.memory_space<vmem>>, %arg15: memref<128x128xf32, #tpu.memory_space<vmem>>, %arg16: memref<1x128xf32, #tpu.memory_space<vmem>>, %arg17: memref<1x128xf32, #tpu.memory_space<vmem>>, %arg18: memref<1x128xf32, #tpu.memory_space<vmem>>, %arg19: memref<128x128xf32, #tpu.memory_space<vmem>>, %arg20: memref<1x128xf32, #tpu.memory_space<vmem>>, %arg21: memref<3x128x128xf32, #tpu.memory_space<vmem>>, %arg22: memref<1x128xf32, #tpu.memory_space<vmem>>, %arg23: memref<128x128xf32, #tpu.memory_space<vmem>>, %arg24: memref<1x128xf32, #tpu.memory_space<vmem>>) attributes {dimension_semantics = [], scalar_prefetch = 0 : i64, scratch_operands = 0 : i64, tpu.core_type = #tpu.core_type<tc>} {
    %c0 = arith.constant 0 : index
    %c0_0 = arith.constant 0 : index
    %0 = vector.load %arg0[%c0, %c0_0] : memref<128x128xf32, #tpu.memory_space<vmem>>, vector<128x128xf32>
    %c0_1 = arith.constant 0 : index
    %c0_2 = arith.constant 0 : index
    %1 = vector.load %arg1[%c0_1, %c0_2] : memref<128x128xf32, #tpu.memory_space<vmem>>, vector<128x128xf32>
    %c0_3 = arith.constant 0 : index
    %c0_4 = arith.constant 0 : index
    %2 = vector.load %arg2[%c0_3, %c0_4] : memref<128x1xf32, #tpu.memory_space<vmem>>, vector<128x1xf32>
    %c0_5 = arith.constant 0 : index
    %c0_6 = arith.constant 0 : index
    %3 = vector.load %arg3[%c0_5, %c0_6] : memref<128x1xf32, #tpu.memory_space<vmem>>, vector<128x1xf32>
    %c0_7 = arith.constant 0 : index
    %c0_8 = arith.constant 0 : index
    %4 = vector.load %arg4[%c0_7, %c0_8] : memref<1x128xf32, #tpu.memory_space<vmem>>, vector<1x128xf32>
    %cst = arith.constant 1.000000e+00 : f32
    %5 = vector.broadcast %cst : f32 to vector<1x128xf32>
    %cst_9 = arith.constant 0.000000e+00 : f32
    %6 = vector.broadcast %cst_9 : f32 to vector<1x1xf32>
    %c0_10 = arith.constant 0 : index
    %c0_11 = arith.constant 0 : index
    %7 = vector.load %arg5[%c0_10, %c0_11] : memref<1x128xf32, #tpu.memory_space<vmem>>, vector<1x128xf32>
    %8 = vector.broadcast %2 : vector<128x1xf32> to vector<128x128xf32>
    %9 = arith.mulf %1, %8 : vector<128x128xf32>
    %cst_12 = arith.constant dense<0.000000e+00> : vector<1x128xf32>
    %10 = tpu.matmul %4, %9, %cst_12 {dimension_numbers = #tpu.dot_dimension_numbers<[1], [0], [0], [1], [0, 0, 1, 1], [], []>} : vector<1x128xf32>, vector<128x128xf32>, vector<1x128xf32> -> vector<1x128xf32>
    %c0_13 = arith.constant 0 : index
    %c0_14 = arith.constant 0 : index
    %11 = vector.load %arg6[%c0_13, %c0_14] : memref<128x128xf32, #tpu.memory_space<vmem>>, vector<128x128xf32>
    %cst_15 = arith.constant dense<0.000000e+00> : vector<1x128xf32>
    %12 = tpu.matmul %10, %11, %cst_15 {dimension_numbers = #tpu.dot_dimension_numbers<[1], [0], [0], [1], [0, 0, 1, 1], [], []>} : vector<1x128xf32>, vector<128x128xf32>, vector<1x128xf32> -> vector<1x128xf32>
    %c0_16 = arith.constant 0 : index
    %c0_17 = arith.constant 0 : index
    %13 = vector.load %arg7[%c0_16, %c0_17] : memref<1x128xf32, #tpu.memory_space<vmem>>, vector<1x128xf32>
    %14 = arith.addf %12, %13 : vector<1x128xf32>
    %cst_18 = arith.constant 0.000000e+00 : f32
    %15 = vector.broadcast %cst_18 : f32 to vector<1x128xf32>
    %16 = arith.maximumf %14, %15 : vector<1x128xf32>
    %cst_19 = arith.constant dense<0.000000e+00> : vector<1xf32>
    %17 = vector.multi_reduction <add>, %16, %cst_19 [1] : vector<1x128xf32> to vector<1xf32>
    %18 = vector.shape_cast %17 : vector<1xf32> to vector<1x1xf32>
    %cst_20 = arith.constant 1.600000e+01 : f32
    %19 = vector.broadcast %cst_20 : f32 to vector<1x1xf32>
    %20 = arith.divf %18, %19 : vector<1x1xf32>
    %21 = vector.broadcast %20 : vector<1x1xf32> to vector<1x128xf32>
    %22 = arith.subf %16, %21 : vector<1x128xf32>
    %23 = arith.mulf %22, %7 : vector<1x128xf32>
    %24 = arith.mulf %23, %23 : vector<1x128xf32>
    %cst_21 = arith.constant dense<0.000000e+00> : vector<1xf32>
    %25 = vector.multi_reduction <add>, %24, %cst_21 [1] : vector<1x128xf32> to vector<1xf32>
    %26 = vector.shape_cast %25 : vector<1xf32> to vector<1x1xf32>
    %cst_22 = arith.constant 1.600000e+01 : f32
    %27 = vector.broadcast %cst_22 : f32 to vector<1x1xf32>
    %28 = arith.divf %26, %27 : vector<1x1xf32>
    %cst_23 = arith.constant 9.99999974E-6 : f32
    %29 = vector.broadcast %cst_23 : f32 to vector<1x1xf32>
    %30 = arith.addf %28, %29 : vector<1x1xf32>
    %31 = math.rsqrt %30 : vector<1x1xf32>
    %32 = vector.broadcast %31 : vector<1x1xf32> to vector<1x128xf32>
    %33 = arith.mulf %23, %32 : vector<1x128xf32>
    %c0_24 = arith.constant 0 : index
    %c0_25 = arith.constant 0 : index
    %34 = vector.load %arg8[%c0_24, %c0_25] : memref<1x128xf32, #tpu.memory_space<vmem>>, vector<1x128xf32>
    %35 = arith.mulf %33, %34 : vector<1x128xf32>
    %c0_26 = arith.constant 0 : index
    %c0_27 = arith.constant 0 : index
    %36 = vector.load %arg9[%c0_26, %c0_27] : memref<1x128xf32, #tpu.memory_space<vmem>>, vector<1x128xf32>
    %37 = arith.addf %35, %36 : vector<1x128xf32>
    %c0_28 = arith.constant 0 : index
    %c0_29 = arith.constant 0 : index
    %38 = vector.load %arg10[%c0_28, %c0_29] : memref<128x128xf32, #tpu.memory_space<vmem>>, vector<128x128xf32>
    %cst_30 = arith.constant dense<0.000000e+00> : vector<1x128xf32>
    %39 = tpu.matmul %37, %38, %cst_30 {dimension_numbers = #tpu.dot_dimension_numbers<[1], [0], [0], [1], [0, 0, 1, 1], [], []>} : vector<1x128xf32>, vector<128x128xf32>, vector<1x128xf32> -> vector<1x128xf32>
    %c0_31 = arith.constant 0 : index
    %c0_32 = arith.constant 0 : index
    %40 = vector.load %arg11[%c0_31, %c0_32] : memref<1x128xf32, #tpu.memory_space<vmem>>, vector<1x128xf32>
    %41 = arith.addf %39, %40 : vector<1x128xf32>
    %cst_33 = arith.constant 0.000000e+00 : f32
    %42 = vector.broadcast %cst_33 : f32 to vector<1x128xf32>
    %43 = arith.subf %42, %41 : vector<1x128xf32>
    %44 = math.exp %43 : vector<1x128xf32>
    %cst_34 = arith.constant 1.000000e+00 : f32
    %45 = vector.broadcast %cst_34 : f32 to vector<1x128xf32>
    %46 = arith.addf %45, %44 : vector<1x128xf32>
    %cst_35 = arith.constant 2.000000e+00 : f32
    %47 = vector.broadcast %cst_35 : f32 to vector<1x128xf32>
    %48 = arith.divf %47, %46 : vector<1x128xf32>
    %cst_36 = arith.constant 2.500000e-01 : f32
    %49 = vector.broadcast %cst_36 : f32 to vector<1x128xf32>
    %50 = arith.addf %49, %48 : vector<1x128xf32>
    %51 = arith.mulf %50, %7 : vector<1x128xf32>
    %52 = vector.broadcast %10 : vector<1x128xf32> to vector<128x128xf32>
    %53 = arith.subf %9, %52 : vector<128x128xf32>
    %54 = vector.broadcast %3 : vector<128x1xf32> to vector<128x128xf32>
    %55 = arith.mulf %54, %53 : vector<128x128xf32>
    %56 = arith.mulf %55, %55 : vector<128x128xf32>
    %cst_37 = arith.constant dense<0.000000e+00> : vector<1x128xf32>
    %57 = tpu.matmul %5, %56, %cst_37 {dimension_numbers = #tpu.dot_dimension_numbers<[1], [0], [0], [1], [0, 0, 1, 1], [], []>} : vector<1x128xf32>, vector<128x128xf32>, vector<1x128xf32> -> vector<1x128xf32>
    %cst_38 = arith.constant dense<0.000000e+00> : vector<1xf32>
    %58 = vector.multi_reduction <add>, %57, %cst_38 [1] : vector<1x128xf32> to vector<1xf32>
    %59 = vector.shape_cast %58 : vector<1xf32> to vector<1x1xf32>
    %cst_39 = arith.constant dense<0.000000e+00> : vector<128xf32>
    %60 = vector.multi_reduction <add>, %55, %cst_39 [1] : vector<128x128xf32> to vector<128xf32>
    %61 = vector.shape_cast %60 : vector<128xf32> to vector<128x1xf32>
    %62 = vector.broadcast %51 : vector<1x128xf32> to vector<128x128xf32>
    %63 = arith.mulf %55, %62 : vector<128x128xf32>
    %cst_40 = arith.constant dense<0.000000e+00> : vector<128xf32>
    %64 = vector.multi_reduction <add>, %63, %cst_40 [1] : vector<128x128xf32> to vector<128xf32>
    %65 = vector.shape_cast %64 : vector<128xf32> to vector<128x1xf32>
    %66 = arith.mulf %61, %61 : vector<128x1xf32>
    %cst_41 = arith.constant dense<0.000000e+00> : vector<1xf32>
    %67 = vector.multi_reduction <add>, %66, %cst_41 [0] : vector<128x1xf32> to vector<1xf32>
    %68 = vector.shape_cast %67 : vector<1xf32> to vector<1x1xf32>
    %69 = arith.mulf %65, %65 : vector<128x1xf32>
    %cst_42 = arith.constant dense<0.000000e+00> : vector<1xf32>
    %70 = vector.multi_reduction <add>, %69, %cst_42 [0] : vector<128x1xf32> to vector<1xf32>
    %71 = vector.shape_cast %70 : vector<1xf32> to vector<1x1xf32>
    %72 = arith.mulf %57, %51 : vector<1x128xf32>
    %73 = arith.mulf %72, %51 : vector<1x128xf32>
    %cst_43 = arith.constant dense<0.000000e+00> : vector<1xf32>
    %74 = vector.multi_reduction <add>, %73, %cst_43 [1] : vector<1x128xf32> to vector<1xf32>
    %75 = vector.shape_cast %74 : vector<1xf32> to vector<1x1xf32>
    %76 = arith.mulf %51, %51 : vector<1x128xf32>
    %cst_44 = arith.constant dense<0.000000e+00> : vector<1xf32>
    %77 = vector.multi_reduction <add>, %76, %cst_44 [1] : vector<1x128xf32> to vector<1xf32>
    %78 = vector.shape_cast %77 : vector<1xf32> to vector<1x1xf32>
    %79 = arith.subf %71, %75 : vector<1x1xf32>
    %cst_45 = arith.constant 1.600000e+01 : f32
    %80 = vector.broadcast %cst_45 : f32 to vector<1x1xf32>
    %81 = arith.divf %79, %80 : vector<1x1xf32>
    %82 = arith.subf %75, %81 : vector<1x1xf32>
    %83 = arith.subf %68, %59 : vector<1x1xf32>
    %cst_46 = arith.constant 1.600000e+01 : f32
    %84 = vector.broadcast %cst_46 : f32 to vector<1x1xf32>
    %85 = arith.divf %83, %84 : vector<1x1xf32>
    %86 = arith.subf %59, %85 : vector<1x1xf32>
    %87 = arith.divf %82, %86 : vector<1x1xf32>
    %cst_47 = arith.constant 1.600000e+01 : f32
    %88 = vector.broadcast %cst_47 : f32 to vector<1x1xf32>
    %89 = arith.divf %88, %78 : vector<1x1xf32>
    %90 = arith.mulf %87, %89 : vector<1x1xf32>
    %91 = arith.addf %6, %90 : vector<1x1xf32>
    %92 = vector.broadcast %51 : vector<1x128xf32> to vector<128x128xf32>
    %93 = arith.mulf %1, %92 : vector<128x128xf32>
    %c0_48 = arith.constant 0 : index
    %c0_49 = arith.constant 0 : index
    %c0_50 = arith.constant 0 : index
    %94 = vector.load %arg12[%c0_48, %c0_49, %c0_50] : memref<3x128x128xf32, #tpu.memory_space<vmem>>, vector<1x128x128xf32>
    %95 = vector.shape_cast %94 : vector<1x128x128xf32> to vector<128x128xf32>
    %cst_51 = arith.constant dense<0.000000e+00> : vector<128x128xf32>
    %96 = tpu.matmul %93, %95, %cst_51 {dimension_numbers = #tpu.dot_dimension_numbers<[1], [0], [0], [1], [0, 0, 1, 1], [], []>} : vector<128x128xf32>, vector<128x128xf32>, vector<128x128xf32> -> vector<128x128xf32>
    %cst_52 = arith.constant dense<0.000000e+00> : vector<128x128xf32>
    %97 = tpu.matmul %0, %93, %cst_52 {dimension_numbers = #tpu.dot_dimension_numbers<[1], [0], [0], [1], [0, 0, 1, 1], [], []>} : vector<128x128xf32>, vector<128x128xf32>, vector<128x128xf32> -> vector<128x128xf32>
    %c1 = arith.constant 1 : index
    %c0_53 = arith.constant 0 : index
    %c0_54 = arith.constant 0 : index
    %98 = vector.load %arg12[%c1, %c0_53, %c0_54] : memref<3x128x128xf32, #tpu.memory_space<vmem>>, vector<1x128x128xf32>
    %99 = vector.shape_cast %98 : vector<1x128x128xf32> to vector<128x128xf32>
    %cst_55 = arith.constant dense<0.000000e+00> : vector<128x128xf32>
    %100 = tpu.matmul %97, %99, %cst_55 {dimension_numbers = #tpu.dot_dimension_numbers<[1], [0], [0], [1], [0, 0, 1, 1], [], []>} : vector<128x128xf32>, vector<128x128xf32>, vector<128x128xf32> -> vector<128x128xf32>
    %101 = arith.addf %96, %100 : vector<128x128xf32>
    %cst_56 = arith.constant dense<0.000000e+00> : vector<128x128xf32>
    %102 = tpu.matmul %0, %97, %cst_56 {dimension_numbers = #tpu.dot_dimension_numbers<[1], [0], [0], [1], [0, 0, 1, 1], [], []>} : vector<128x128xf32>, vector<128x128xf32>, vector<128x128xf32> -> vector<128x128xf32>
    %c2 = arith.constant 2 : index
    %c0_57 = arith.constant 0 : index
    %c0_58 = arith.constant 0 : index
    %103 = vector.load %arg12[%c2, %c0_57, %c0_58] : memref<3x128x128xf32, #tpu.memory_space<vmem>>, vector<1x128x128xf32>
    %104 = vector.shape_cast %103 : vector<1x128x128xf32> to vector<128x128xf32>
    %cst_59 = arith.constant dense<0.000000e+00> : vector<128x128xf32>
    %105 = tpu.matmul %102, %104, %cst_59 {dimension_numbers = #tpu.dot_dimension_numbers<[1], [0], [0], [1], [0, 0, 1, 1], [], []>} : vector<128x128xf32>, vector<128x128xf32>, vector<128x128xf32> -> vector<128x128xf32>
    %106 = arith.addf %101, %105 : vector<128x128xf32>
    %c0_60 = arith.constant 0 : index
    %c0_61 = arith.constant 0 : index
    %107 = vector.load %arg13[%c0_60, %c0_61] : memref<1x128xf32, #tpu.memory_space<vmem>>, vector<1x128xf32>
    %108 = vector.broadcast %107 : vector<1x128xf32> to vector<128x128xf32>
    %109 = arith.addf %106, %108 : vector<128x128xf32>
    %cst_62 = arith.constant 0.000000e+00 : f32
    %110 = vector.broadcast %cst_62 : f32 to vector<128x128xf32>
    %111 = arith.cmpf ogt, %109, %110 : vector<128x128xf32>
    %cst_63 = arith.constant 0.00999999977 : f32
    %112 = vector.broadcast %cst_63 : f32 to vector<128x128xf32>
    %113 = arith.mulf %112, %109 : vector<128x128xf32>
    %114 = arith.select %111, %109, %113 : vector<128x128xi1>, vector<128x128xf32>
    %c0_64 = arith.constant 0 : index
    %c0_65 = arith.constant 0 : index
    %115 = vector.load %arg14[%c0_64, %c0_65] : memref<1x128xf32, #tpu.memory_space<vmem>>, vector<1x128xf32>
    %116 = vector.broadcast %2 : vector<128x1xf32> to vector<128x128xf32>
    %117 = arith.mulf %114, %116 : vector<128x128xf32>
    %cst_66 = arith.constant dense<0.000000e+00> : vector<1x128xf32>
    %118 = tpu.matmul %4, %117, %cst_66 {dimension_numbers = #tpu.dot_dimension_numbers<[1], [0], [0], [1], [0, 0, 1, 1], [], []>} : vector<1x128xf32>, vector<128x128xf32>, vector<1x128xf32> -> vector<1x128xf32>
    %c0_67 = arith.constant 0 : index
    %c0_68 = arith.constant 0 : index
    %119 = vector.load %arg15[%c0_67, %c0_68] : memref<128x128xf32, #tpu.memory_space<vmem>>, vector<128x128xf32>
    %cst_69 = arith.constant dense<0.000000e+00> : vector<1x128xf32>
    %120 = tpu.matmul %118, %119, %cst_69 {dimension_numbers = #tpu.dot_dimension_numbers<[1], [0], [0], [1], [0, 0, 1, 1], [], []>} : vector<1x128xf32>, vector<128x128xf32>, vector<1x128xf32> -> vector<1x128xf32>
    %c0_70 = arith.constant 0 : index
    %c0_71 = arith.constant 0 : index
    %121 = vector.load %arg16[%c0_70, %c0_71] : memref<1x128xf32, #tpu.memory_space<vmem>>, vector<1x128xf32>
    %122 = arith.addf %120, %121 : vector<1x128xf32>
    %cst_72 = arith.constant 0.000000e+00 : f32
    %123 = vector.broadcast %cst_72 : f32 to vector<1x128xf32>
    %124 = arith.maximumf %122, %123 : vector<1x128xf32>
    %cst_73 = arith.constant dense<0.000000e+00> : vector<1xf32>
    %125 = vector.multi_reduction <add>, %124, %cst_73 [1] : vector<1x128xf32> to vector<1xf32>
    %126 = vector.shape_cast %125 : vector<1xf32> to vector<1x1xf32>
    %cst_74 = arith.constant 3.200000e+01 : f32
    %127 = vector.broadcast %cst_74 : f32 to vector<1x1xf32>
    %128 = arith.divf %126, %127 : vector<1x1xf32>
    %129 = vector.broadcast %128 : vector<1x1xf32> to vector<1x128xf32>
    %130 = arith.subf %124, %129 : vector<1x128xf32>
    %131 = arith.mulf %130, %115 : vector<1x128xf32>
    %132 = arith.mulf %131, %131 : vector<1x128xf32>
    %cst_75 = arith.constant dense<0.000000e+00> : vector<1xf32>
    %133 = vector.multi_reduction <add>, %132, %cst_75 [1] : vector<1x128xf32> to vector<1xf32>
    %134 = vector.shape_cast %133 : vector<1xf32> to vector<1x1xf32>
    %cst_76 = arith.constant 3.200000e+01 : f32
    %135 = vector.broadcast %cst_76 : f32 to vector<1x1xf32>
    %136 = arith.divf %134, %135 : vector<1x1xf32>
    %cst_77 = arith.constant 9.99999974E-6 : f32
    %137 = vector.broadcast %cst_77 : f32 to vector<1x1xf32>
    %138 = arith.addf %136, %137 : vector<1x1xf32>
    %139 = math.rsqrt %138 : vector<1x1xf32>
    %140 = vector.broadcast %139 : vector<1x1xf32> to vector<1x128xf32>
    %141 = arith.mulf %131, %140 : vector<1x128xf32>
    %c0_78 = arith.constant 0 : index
    %c0_79 = arith.constant 0 : index
    %142 = vector.load %arg17[%c0_78, %c0_79] : memref<1x128xf32, #tpu.memory_space<vmem>>, vector<1x128xf32>
    %143 = arith.mulf %141, %142 : vector<1x128xf32>
    %c0_80 = arith.constant 0 : index
    %c0_81 = arith.constant 0 : index
    %144 = vector.load %arg18[%c0_80, %c0_81] : memref<1x128xf32, #tpu.memory_space<vmem>>, vector<1x128xf32>
    %145 = arith.addf %143, %144 : vector<1x128xf32>
    %c0_82 = arith.constant 0 : index
    %c0_83 = arith.constant 0 : index
    %146 = vector.load %arg19[%c0_82, %c0_83] : memref<128x128xf32, #tpu.memory_space<vmem>>, vector<128x128xf32>
    %cst_84 = arith.constant dense<0.000000e+00> : vector<1x128xf32>
    %147 = tpu.matmul %145, %146, %cst_84 {dimension_numbers = #tpu.dot_dimension_numbers<[1], [0], [0], [1], [0, 0, 1, 1], [], []>} : vector<1x128xf32>, vector<128x128xf32>, vector<1x128xf32> -> vector<1x128xf32>
    %c0_85 = arith.constant 0 : index
    %c0_86 = arith.constant 0 : index
    %148 = vector.load %arg20[%c0_85, %c0_86] : memref<1x128xf32, #tpu.memory_space<vmem>>, vector<1x128xf32>
    %149 = arith.addf %147, %148 : vector<1x128xf32>
    %cst_87 = arith.constant 0.000000e+00 : f32
    %150 = vector.broadcast %cst_87 : f32 to vector<1x128xf32>
    %151 = arith.subf %150, %149 : vector<1x128xf32>
    %152 = math.exp %151 : vector<1x128xf32>
    %cst_88 = arith.constant 1.000000e+00 : f32
    %153 = vector.broadcast %cst_88 : f32 to vector<1x128xf32>
    %154 = arith.addf %153, %152 : vector<1x128xf32>
    %cst_89 = arith.constant 2.000000e+00 : f32
    %155 = vector.broadcast %cst_89 : f32 to vector<1x128xf32>
    %156 = arith.divf %155, %154 : vector<1x128xf32>
    %cst_90 = arith.constant 2.500000e-01 : f32
    %157 = vector.broadcast %cst_90 : f32 to vector<1x128xf32>
    %158 = arith.addf %157, %156 : vector<1x128xf32>
    %159 = arith.mulf %158, %115 : vector<1x128xf32>
    %160 = vector.broadcast %118 : vector<1x128xf32> to vector<128x128xf32>
    %161 = arith.subf %117, %160 : vector<128x128xf32>
    %162 = vector.broadcast %3 : vector<128x1xf32> to vector<128x128xf32>
    %163 = arith.mulf %162, %161 : vector<128x128xf32>
    %164 = arith.mulf %163, %163 : vector<128x128xf32>
    %cst_91 = arith.constant dense<0.000000e+00> : vector<1x128xf32>
    %165 = tpu.matmul %5, %164, %cst_91 {dimension_numbers = #tpu.dot_dimension_numbers<[1], [0], [0], [1], [0, 0, 1, 1], [], []>} : vector<1x128xf32>, vector<128x128xf32>, vector<1x128xf32> -> vector<1x128xf32>
    %cst_92 = arith.constant dense<0.000000e+00> : vector<1xf32>
    %166 = vector.multi_reduction <add>, %165, %cst_92 [1] : vector<1x128xf32> to vector<1xf32>
    %167 = vector.shape_cast %166 : vector<1xf32> to vector<1x1xf32>
    %cst_93 = arith.constant dense<0.000000e+00> : vector<128xf32>
    %168 = vector.multi_reduction <add>, %163, %cst_93 [1] : vector<128x128xf32> to vector<128xf32>
    %169 = vector.shape_cast %168 : vector<128xf32> to vector<128x1xf32>
    %170 = vector.broadcast %159 : vector<1x128xf32> to vector<128x128xf32>
    %171 = arith.mulf %163, %170 : vector<128x128xf32>
    %cst_94 = arith.constant dense<0.000000e+00> : vector<128xf32>
    %172 = vector.multi_reduction <add>, %171, %cst_94 [1] : vector<128x128xf32> to vector<128xf32>
    %173 = vector.shape_cast %172 : vector<128xf32> to vector<128x1xf32>
    %174 = arith.mulf %169, %169 : vector<128x1xf32>
    %cst_95 = arith.constant dense<0.000000e+00> : vector<1xf32>
    %175 = vector.multi_reduction <add>, %174, %cst_95 [0] : vector<128x1xf32> to vector<1xf32>
    %176 = vector.shape_cast %175 : vector<1xf32> to vector<1x1xf32>
    %177 = arith.mulf %173, %173 : vector<128x1xf32>
    %cst_96 = arith.constant dense<0.000000e+00> : vector<1xf32>
    %178 = vector.multi_reduction <add>, %177, %cst_96 [0] : vector<128x1xf32> to vector<1xf32>
    %179 = vector.shape_cast %178 : vector<1xf32> to vector<1x1xf32>
    %180 = arith.mulf %165, %159 : vector<1x128xf32>
    %181 = arith.mulf %180, %159 : vector<1x128xf32>
    %cst_97 = arith.constant dense<0.000000e+00> : vector<1xf32>
    %182 = vector.multi_reduction <add>, %181, %cst_97 [1] : vector<1x128xf32> to vector<1xf32>
    %183 = vector.shape_cast %182 : vector<1xf32> to vector<1x1xf32>
    %184 = arith.mulf %159, %159 : vector<1x128xf32>
    %cst_98 = arith.constant dense<0.000000e+00> : vector<1xf32>
    %185 = vector.multi_reduction <add>, %184, %cst_98 [1] : vector<1x128xf32> to vector<1xf32>
    %186 = vector.shape_cast %185 : vector<1xf32> to vector<1x1xf32>
    %187 = arith.subf %179, %183 : vector<1x1xf32>
    %cst_99 = arith.constant 3.200000e+01 : f32
    %188 = vector.broadcast %cst_99 : f32 to vector<1x1xf32>
    %189 = arith.divf %187, %188 : vector<1x1xf32>
    %190 = arith.subf %183, %189 : vector<1x1xf32>
    %191 = arith.subf %176, %167 : vector<1x1xf32>
    %cst_100 = arith.constant 3.200000e+01 : f32
    %192 = vector.broadcast %cst_100 : f32 to vector<1x1xf32>
    %193 = arith.divf %191, %192 : vector<1x1xf32>
    %194 = arith.subf %167, %193 : vector<1x1xf32>
    %195 = arith.divf %190, %194 : vector<1x1xf32>
    %cst_101 = arith.constant 3.200000e+01 : f32
    %196 = vector.broadcast %cst_101 : f32 to vector<1x1xf32>
    %197 = arith.divf %196, %186 : vector<1x1xf32>
    %198 = arith.mulf %195, %197 : vector<1x1xf32>
    %199 = arith.addf %91, %198 : vector<1x1xf32>
    %200 = vector.broadcast %159 : vector<1x128xf32> to vector<128x128xf32>
    %201 = arith.mulf %114, %200 : vector<128x128xf32>
    %c0_102 = arith.constant 0 : index
    %c0_103 = arith.constant 0 : index
    %c0_104 = arith.constant 0 : index
    %202 = vector.load %arg21[%c0_102, %c0_103, %c0_104] : memref<3x128x128xf32, #tpu.memory_space<vmem>>, vector<1x128x128xf32>
    %203 = vector.shape_cast %202 : vector<1x128x128xf32> to vector<128x128xf32>
    %cst_105 = arith.constant dense<0.000000e+00> : vector<128x128xf32>
    %204 = tpu.matmul %201, %203, %cst_105 {dimension_numbers = #tpu.dot_dimension_numbers<[1], [0], [0], [1], [0, 0, 1, 1], [], []>} : vector<128x128xf32>, vector<128x128xf32>, vector<128x128xf32> -> vector<128x128xf32>
    %cst_106 = arith.constant dense<0.000000e+00> : vector<128x128xf32>
    %205 = tpu.matmul %0, %201, %cst_106 {dimension_numbers = #tpu.dot_dimension_numbers<[1], [0], [0], [1], [0, 0, 1, 1], [], []>} : vector<128x128xf32>, vector<128x128xf32>, vector<128x128xf32> -> vector<128x128xf32>
    %c1_107 = arith.constant 1 : index
    %c0_108 = arith.constant 0 : index
    %c0_109 = arith.constant 0 : index
    %206 = vector.load %arg21[%c1_107, %c0_108, %c0_109] : memref<3x128x128xf32, #tpu.memory_space<vmem>>, vector<1x128x128xf32>
    %207 = vector.shape_cast %206 : vector<1x128x128xf32> to vector<128x128xf32>
    %cst_110 = arith.constant dense<0.000000e+00> : vector<128x128xf32>
    %208 = tpu.matmul %205, %207, %cst_110 {dimension_numbers = #tpu.dot_dimension_numbers<[1], [0], [0], [1], [0, 0, 1, 1], [], []>} : vector<128x128xf32>, vector<128x128xf32>, vector<128x128xf32> -> vector<128x128xf32>
    %209 = arith.addf %204, %208 : vector<128x128xf32>
    %cst_111 = arith.constant dense<0.000000e+00> : vector<128x128xf32>
    %210 = tpu.matmul %0, %205, %cst_111 {dimension_numbers = #tpu.dot_dimension_numbers<[1], [0], [0], [1], [0, 0, 1, 1], [], []>} : vector<128x128xf32>, vector<128x128xf32>, vector<128x128xf32> -> vector<128x128xf32>
    %c2_112 = arith.constant 2 : index
    %c0_113 = arith.constant 0 : index
    %c0_114 = arith.constant 0 : index
    %211 = vector.load %arg21[%c2_112, %c0_113, %c0_114] : memref<3x128x128xf32, #tpu.memory_space<vmem>>, vector<1x128x128xf32>
    %212 = vector.shape_cast %211 : vector<1x128x128xf32> to vector<128x128xf32>
    %cst_115 = arith.constant dense<0.000000e+00> : vector<128x128xf32>
    %213 = tpu.matmul %210, %212, %cst_115 {dimension_numbers = #tpu.dot_dimension_numbers<[1], [0], [0], [1], [0, 0, 1, 1], [], []>} : vector<128x128xf32>, vector<128x128xf32>, vector<128x128xf32> -> vector<128x128xf32>
    %214 = arith.addf %209, %213 : vector<128x128xf32>
    %c0_116 = arith.constant 0 : index
    %c0_117 = arith.constant 0 : index
    %215 = vector.load %arg22[%c0_116, %c0_117] : memref<1x128xf32, #tpu.memory_space<vmem>>, vector<1x128xf32>
    %216 = vector.broadcast %215 : vector<1x128xf32> to vector<128x128xf32>
    %217 = arith.addf %214, %216 : vector<128x128xf32>
    %c0_118 = arith.constant 0 : index
    %c0_119 = arith.constant 0 : index
    %218 = vector.load %arg23[%c0_118, %c0_119] : memref<128x128xf32, #tpu.memory_space<vmem>>, vector<128x128xf32>
    tpu.vector_store %arg23[%c0_118, %c0_119], %217 {strides = array<i32>} : memref<128x128xf32, #tpu.memory_space<vmem>>, vector<128x128xf32>,
    %219 = vector.shape_cast %199 : vector<1x1xf32> to vector<1x1xf32>
    %220 = vector.broadcast %219 : vector<1x1xf32> to vector<1x128xf32>
    %c0_120 = arith.constant 0 : index
    %c0_121 = arith.constant 0 : index
    %221 = vector.load %arg24[%c0_120, %c0_121] : memref<1x128xf32, #tpu.memory_space<vmem>>, vector<1x128xf32>
    tpu.vector_store %arg24[%c0_120, %c0_121], %220 {strides = array<i32>} : memref<1x128xf32, #tpu.memory_space<vmem>>, vector<1x128xf32>,
    return
  }
}

</mosaic_0001>

<bundles_post_ra>
// kernel: tarep_forward.1
= control target key start
LH: loop header
LB: loop body
LE: loop exit
PB: predicated region body
PF: predicated region fallthrough
CT: control target
= control target key end

     0   :  { %s7370_s0 = inlined_call_operand.vmem [shape: f32[128,128], index: 0, kind: input, shape index: {}]   ;;  %s7371_s1 = inlined_call_operand.vmem [shape: f32[128,128], index: 1, kind: input, shape index: {}]   ;;  %s7372_s2 = inlined_call_operand.vmem [shape: f32[128,1], index: 2, kind: input, shape index: {}]   ;;  %s7373_s3 = inlined_call_operand.vmem [shape: f32[128,1], index: 3, kind: input, shape index: {}]   ;;  %s7374_s4 = inlined_call_operand.vmem [shape: f32[1,128], index: 4, kind: input, shape index: {}]   ;;  %s7375_s5 = inlined_call_operand.vmem [shape: f32[1,128], index: 5, kind: input, shape index: {}]   ;;  %s7376_s6 = inlined_call_operand.vmem [shape: f32[128,128], index: 6, kind: input, shape index: {}]   ;;  %s7377_s7 = inlined_call_operand.vmem [shape: f32[1,128], index: 7, kind: input, shape index: {}]   ;;  %s7378_s8 = inlined_call_operand.vmem [shape: f32[1,128], index: 8, kind: input, shape index: {}]   ;;  %s7379_s9 = inlined_call_operand.vmem [shape: f32[1,128], index: 9, kind: input, shape index: {}]   ;;  %s7380_s10 = inlined_call_operand.vmem [shape: f32[128,128], index: 10, kind: input, shape index: {}]   ;;  %s7381_s11 = inlined_call_operand.vmem [shape: f32[1,128], index: 11, kind: input, shape index: {}]   ;;  %s7382_s12 = inlined_call_operand.vmem [shape: f32[3,128,128], index: 12, kind: input, shape index: {}]   ;;  %s7383_s13 = inlined_call_operand.vmem [shape: f32[1,128], index: 13, kind: input, shape index: {}]   ;;  %s7384_s14 = inlined_call_operand.vmem [shape: f32[1,128], index: 14, kind: input, shape index: {}]   ;;  %s7385_s15 = inlined_call_operand.vmem [shape: f32[128,128], index: 15, kind: input, shape index: {}]   ;;  %s7386_s16 = inlined_call_operand.vmem [shape: f32[1,128], index: 16, kind: input, shape index: {}]   ;;  %s7387_s17 = inlined_call_operand.vmem [shape: f32[1,128], index: 17, kind: input, shape index: {}]   ;;  %s7388_s18 = inlined_call_operand.vmem [shape: f32[1,128], index: 18, kind: input, shape index: {}]   ;;  %s7389_s19 = inlined_call_operand.vmem [shape: f32[128,128], index: 19, kind: input, shape index: {}]   ;;  %s7390_s20 = inlined_call_operand.vmem [shape: f32[1,128], index: 20, kind: input, shape index: {}]   ;;  %s7391_s21 = inlined_call_operand.vmem [shape: f32[3,128,128], index: 21, kind: input, shape index: {}]   ;;  %s7392_s22 = inlined_call_operand.vmem [shape: f32[1,128], index: 22, kind: input, shape index: {}]   ;;  %s7393_s23 = inlined_call_operand.vmem [shape: f32[128,128], index: 23, kind: output, shape index: {0}]   ;;  %s7394_s24 = inlined_call_operand.hbm [shape: f32[1,128], index: 24, kind: output, shape index: {1}]  }
   0x1   :  { %7467 = sst [smem:[#allocation39_spill]] %s7370_s0 }
   0x2   :  { %7468 = sst [smem:[#allocation40_spill]] %s7371_s1 }
   0x3   :  { %7469 = sst [smem:[#allocation41_spill]] %s7372_s2 }
   0x4   :  { %7470 = sst [smem:[#allocation42_spill]] %s7373_s3 }
   0x5   :  { %7471 = sst [smem:[#allocation43_spill]] %s7374_s4 }
   0x6   :  { %7472 = sst [smem:[#allocation44_spill]] %s7375_s5 }
   0x7   :  { %7473 = sst [smem:[#allocation45_spill]] %s7376_s6 }
   0x8   :  { %7474 = sst [smem:[#allocation46_spill]] %s7377_s7 }
   0x9   :  { %7475 = sst [smem:[#allocation47_spill]] %s7378_s8 }
   0xa   :  { %s7476_s27 = sld [smem:[#allocation41_spill]]  ;;  %v5239_v2 = vmov 0  }
   0xb   :  { %5177 = vset.pattern.permute.xlu1 %v5239_v2  ;;  %5176 = vset.pattern.permute.xlu0 %v5239_v2 }
  0x10   :  { %v111_v0 = vld [vmem:[%s7476_s27 + $0x10] sm:$0xff]  ;;  %v109_v1 = vld [vmem:[%s7476_s27] sm:$0xff]  ;;  %v112_v3 = vld [vmem:[%s7476_s27 + $0x18] sm:$0xff] }
  0x11   :  { %155 = vperm.xlu1 %5177, %v111_v0   ;;  %145 = vperm.xlu0 %5176, %v109_v1   ;;  %v110_v4 = vld [vmem:[%s7476_s27 + $0x8] sm:$0xff] }
  0x15   :  { %160 = vperm.xlu1 %5177, %v112_v3   ;;  %150 = vperm.xlu0 %5176, %v110_v4  }
  0x16   :  { %30 = vsyncpa [#allocation3], 0  ;;  %v114_v5 = vld [vmem:[%s7476_s27 + $0x28] sm:$0xff]  ;;  %v113_v6 = vld [vmem:[%s7476_s27 + $0x20] sm:$0xff]  ;;  %v7403_v7 = vmov 0.0|0.0   ;;  %vm5241_vm0 = vmmov 0  }
  0x17   :  { %4594 = vmatprep.subr.bf16.mxu1 %v7403_v7  ;;  %4642 = vmatprep.subr.bf16.mxu0 %v7403_v7  ;;  %v116_v8 = vld [vmem:[%s7476_s27 + $0x38] sm:$0xff]  ;;  %v115_v9 = vld [vmem:[%s7476_s27 + $0x30] sm:$0xff]  ;;  %v118_v10 = vld [vmem:[%s7476_s27 + $0x48] sm:$0xff]  ;;  %v7401_v18 = vmov 0.0   ;;  %s7477_s0 = sld [smem:[#allocation40_spill]]  ;;  %s7479_s3 = sld [smem:[#allocation45_spill]] }
  0x18   :  { %v117_v11 = vld [vmem:[%s7476_s27 + $0x40] sm:$0xff]  ;;  %v120_v12 = vld [vmem:[%s7476_s27 + $0x58] sm:$0xff]  ;;  %v119_v13 = vld [vmem:[%s7476_s27 + $0x50] sm:$0xff]  ;;  %3786 = vmatprep.mubr.msk.f32.mxu1 %vm5241_vm0, %v7401_v18  ;;  %3856 = vmatprep.mubr.msk.f32.mxu0 %vm5241_vm0, %v7401_v18  ;;  %s7480_s5 = sld [smem:[#allocation43_spill]]  ;;  %s7481_s29 = sld [smem:[#allocation46_spill]]  ;;  %vm397_vm1 = vcmask 1040384  }
  0x19   :  { %170 = vperm.xlu1 %5177, %v114_v5   ;;  %165 = vperm.xlu0 %5176, %v113_v6   ;;  %v122_v14 = vld [vmem:[%s7476_s27 + $0x68] sm:$0xff]  ;;  %v121_v15 = vld [vmem:[%s7476_s27 + $0x60] sm:$0xff]  ;;  %v124_v16 = vld [vmem:[%s7476_s27 + $0x78] sm:$0xff]  ;;  %s7482_s7 = sld [smem:[#allocation42_spill]]  ;;  %s7483_s25 = sld [smem:[#allocation44_spill]] }
  0x1a   :  { %v123_v17 = vld [vmem:[%s7476_s27 + $0x70] sm:$0xff]  ;;  %s7497_s30 = sld [smem:[#allocation47_spill]] }
  0x1b   :  { %s7515_s4 = sld [smem:[#allocation39_spill]] }
  0x1d   :  { %180 = vperm.xlu1 %5177, %v116_v8   ;;  %175 = vperm.xlu0 %5176, %v115_v9   ;;  %v5431_v21 = vld [vmem:[%s7477_s0] sm:$0xff]  ;;  %v5436_v22 = vld [vmem:[%s7477_s0 + $0x8] sm:$0xff]  ;;  %v5441_v23 = vld [vmem:[%s7477_s0 + $0x10] sm:$0xff] }
  0x1e   :  { %v5448_v25 = vld [vmem:[%s7477_s0 + $0x18] sm:$0xff]  ;;  %v5475_v33 = vld [vmem:[%s7477_s0 + $0x28] sm:$0xff]  ;;  %v5482_v35 = vld [vmem:[%s7477_s0 + $0x20] sm:$0xff] }
  0x1f   :  { %v5500_v40 = vld [vmem:[%s7477_s0 + $0x38] sm:$0xff]  ;;  %v5507_v42 = vld [vmem:[%s7477_s0 + $0x30] sm:$0xff]  ;;  %v5525_v47 = vld [vmem:[%s7477_s0 + $0x48] sm:$0xff] }
  0x20   :  { %v5532_v49 = vld [vmem:[%s7477_s0 + $0x40] sm:$0xff]  ;;  %v5550_v54 = vld [vmem:[%s7477_s0 + $0x58] sm:$0xff]  ;;  %v5557_v56 = vld [vmem:[%s7477_s0 + $0x50] sm:$0xff] }
  0x21   :  { %190 = vperm.xlu1 %5177, %v118_v10   ;;  %185 = vperm.xlu0 %5176, %v117_v11   ;;  %v5575_v61 = vld [vmem:[%s7477_s0 + $0x68] sm:$0xff]  ;;  %v5582_v63 = vld [vmem:[%s7477_s0 + $0x60] sm:$0xff]  ;;  %v5600_v4 = vld [vmem:[%s7477_s0 + $0x78] sm:$0xff] }
  0x22   :  { %v5607_v6 = vld [vmem:[%s7477_s0 + $0x70] sm:$0xff]  ;;  %v309_v11 = vld [vmem:[%s7479_s3] sm:$0xff] }
  0x25   :  { %200 = vperm.xlu1 %5177, %v120_v12   ;;  %195 = vperm.xlu0 %5176, %v119_v13   ;;  %v310_v12 = vld [vmem:[%s7479_s3 + $0x8] sm:$0xff] }
  0x29   :  { %210 = vperm.xlu1 %5177, %v122_v14   ;;  %205 = vperm.xlu0 %5176, %v121_v15   ;;  %v141_v14 = vld [vmem:[%s7480_s5] sm:$0x1]  ;;  %v4619_v15 = vpack.c.bf16 %v310_v12, %v309_v11  ;;  %v318_v12 = vld [vmem:[%s7479_s3 + $0x48] sm:$0xff] }
  0x2a   :  { %v317_v11 = vld [vmem:[%s7479_s3 + $0x40] sm:$0xff] }
  0x2d   :  { %220 = vperm.xlu1 %5177, %v124_v16   ;;  %215 = vperm.xlu0 %5176, %v123_v17   ;;  %v311_v16 = vld [vmem:[%s7479_s3 + $0x10] sm:$0xff]  ;;  %v312_v17 = vld [vmem:[%s7479_s3 + $0x18] sm:$0xff] }
  0x90   :  { %v5424_v19 = vpop.permute.xlu1 %155  ;;  %v5426_v20 = vpop.permute.xlu0 %145 }
  0x91   :  { %v5454_v27 = vmul.f32 %v5426_v20, %v5431_v21  ;;  %v5462_v29 = vmul.f32 %v5424_v19, %v5441_v23 }
  0x94   :  { %v5443_v24 = vpop.permute.xlu1 %160  ;;  %v5450_v26 = vpop.permute.xlu0 %150 }
  0x95   :  { %v5458_v28 = vmul.f32 %v5450_v26, %v5436_v22  ;;  %v5466_v30 = vmul.f32 %v5443_v24, %v5448_v25 }
  0x97   :  { %v4595_v31 = vpack.c.bf16 %v5458_v28, %v5454_v27  ;;  %v4598_v38 = vpack.c.bf16 %v5466_v30, %v5462_v29 }
  0x98   :  { %v5470_v32 = vpop.permute.xlu1 %170  ;;  %v5477_v34 = vpop.permute.xlu0 %165 }
  0x99   :  { %4596 = vmatpush3.bf16.msra.mxu1 %v4595_v31  ;;  %v5487_v36 = vmul.f32 %v5470_v32, %v5475_v33  ;;  %v5491_v37 = vmul.f32 %v5477_v34, %v5482_v35  ;;  %v4622_v31 = vpack.c.bf16 %v312_v17, %v311_v16  ;;  %v321_v17 = vld [vmem:[%s7479_s3 + $0x60] sm:$0xff] }
  0x9a   :  { %4597 = vmatprep.subr.bf16.mxu1 %v7403_v7 }
  0x9b   :  { %v4601_v45 = vpack.c.bf16 %v5487_v36, %v5491_v37 }
  0x9c   :  { %v5495_v39 = vpop.permute.xlu1 %180  ;;  %v5502_v41 = vpop.permute.xlu0 %175 }
  0x9d   :  { %4599 = vmatpush3.bf16.msra.mxu1 %v4598_v38  ;;  %v5512_v43 = vmul.f32 %v5495_v39, %v5500_v40  ;;  %v5516_v44 = vmul.f32 %v5502_v41, %v5507_v42  ;;  %v313_v38 = vld [vmem:[%s7479_s3 + $0x20] sm:$0xff] }
  0x9e   :  { %4600 = vmatprep.subr.bf16.mxu1 %v7403_v7 }
  0x9f   :  { %v4604_v52 = vpack.c.bf16 %v5512_v43, %v5516_v44 }
  0xa0   :  { %v5520_v46 = vpop.permute.xlu1 %190  ;;  %v5527_v48 = vpop.permute.xlu0 %185 }
  0xa1   :  { %4602 = vmatpush3.bf16.msra.mxu1 %v4601_v45  ;;  %v5537_v50 = vmul.f32 %v5520_v46, %v5525_v47  ;;  %v5541_v51 = vmul.f32 %v5527_v48, %v5532_v49  ;;  %v314_v45 = vld [vmem:[%s7479_s3 + $0x28] sm:$0xff] }
  0xa2   :  { %4603 = vmatprep.subr.bf16.mxu1 %v7403_v7 }
  0xa3   :  { %v4607_v59 = vpack.c.bf16 %v5537_v50, %v5541_v51 }
  0xa4   :  { %v5545_v53 = vpop.permute.xlu1 %200  ;;  %v5552_v55 = vpop.permute.xlu0 %195 }
  0xa5   :  { %4605 = vmatpush3.bf16.msra.mxu1 %v4604_v52  ;;  %v5562_v57 = vmul.f32 %v5545_v53, %v5550_v54  ;;  %v5566_v58 = vmul.f32 %v5552_v55, %v5557_v56  ;;  %v4625_v52 = vpack.c.bf16 %v314_v45, %v313_v38  ;;  %v323_v45 = vld [vmem:[%s7479_s3 + $0x70] sm:$0xff] }
  0xa6   :  { %4606 = vmatprep.subr.bf16.mxu1 %v7403_v7 }
  0xa7   :  { %v4610_v0 = vpack.c.bf16 %v5562_v57, %v5566_v58 }
  0xa8   :  { %v5570_v60 = vpop.permute.xlu1 %210  ;;  %v5577_v62 = vpop.permute.xlu0 %205 }
  0xa9   :  { %4608 = vmatpush3.bf16.msra.mxu1 %v4607_v59  ;;  %v5589_v1 = vmul.f32 %v5570_v60, %v5575_v61  ;;  %v5593_v2 = vmul.f32 %v5577_v62, %v5582_v63  ;;  %v315_v59 = vld [vmem:[%s7479_s3 + $0x30] sm:$0xff] }
  0xaa   :  { %4609 = vmatprep.subr.bf16.mxu1 %v7403_v7 }
  0xab   :  { %v4613_v8 = vpack.c.bf16 %v5589_v1, %v5593_v2 }
  0xac   :  { %v5595_v3 = vpop.permute.xlu1 %220  ;;  %v5602_v5 = vpop.permute.xlu0 %215 }
  0xad   :  { %7478 = vst [vmem:[#allocation5_spill] sm:$0xff] %v5602_v5  ;;  %4611 = vmatpush3.bf16.msra.mxu1 %v4610_v0  ;;  %v5614_v9 = vmul.f32 %v5595_v3, %v5600_v4  ;;  %v5618_v10 = vmul.f32 %v5602_v5, %v5607_v6  ;;  %v316_v0 = vld [vmem:[%s7479_s3 + $0x38] sm:$0xff] }
  0xae   :  { %4612 = vmatprep.subr.bf16.mxu1 %v7403_v7 }
  0xaf   :  { %v4616_v13 = vpack.c.bf16 %v5614_v9, %v5618_v10 }
  0xb1   :  { %4614 = vmatpush3.bf16.msra.mxu1 %v4613_v8  ;;  %v4628_v8 = vpack.c.bf16 %v316_v0, %v315_v59 }
  0xb2   :  { %4615 = vmatprep.subr.bf16.mxu1 %v7403_v7 }
  0xb5   :  { %4617 = vmatpush3.bf16.msra.mxu1 %v4616_v13  ;;  %v4631_v13 = vpack.c.bf16 %v318_v12, %v317_v11  ;;  %v325_v11 = vld [vmem:[%s7481_s29] sm:$0x1] }
  0xb6   :  { %4618 = vmatprep.subr.bf16.mxu1 %v7403_v7 }
  0xb8   :  { %3787 = vmatmul.mubr.f32.vlgmr.msra.gmra.mrb[0].mxu1 %v141_v14  ;;  %v319_v14 = vld [vmem:[%s7479_s3 + $0x50] sm:$0xff] }
  0xb9   :  { %4620 = vmatpush3.bf16.msra.mxu1 %v4619_v15  ;;  %3821 = vmatprep.mubr.msk.f32.mxu1 %vm5241_vm0, %v7401_v18  ;;  %v320_v15 = vld [vmem:[%s7479_s3 + $0x58] sm:$0xff] }
  0xba   :  { %4621 = vmatprep.subr.bf16.mxu1 %v7403_v7  ;;  %v4634_v16 = vpack.c.bf16 %v320_v15, %v319_v14 }
  0xbd   :  { %4623 = vmatpush3.bf16.msra.mxu1 %v4622_v31  ;;  %v322_v31 = vld [vmem:[%s7479_s3 + $0x68] sm:$0xff] }
  0xbe   :  { %4624 = vmatprep.subr.bf16.mxu1 %v7403_v7  ;;  %v4637_v38 = vpack.c.bf16 %v322_v31, %v321_v17  ;;  %v125_v17 = vld [vmem:[%s7482_s7] sm:$0xff]  ;;  %v127_v31 = vld [vmem:[%s7482_s7 + $0x10] sm:$0xff] }
  0xc1   :  { %4626 = vmatpush3.bf16.msra.mxu1 %v4625_v52  ;;  %v324_v52 = vld [vmem:[%s7479_s3 + $0x78] sm:$0xff] }
  0xc2   :  { %4627 = vmatprep.subr.bf16.mxu1 %v7403_v7  ;;  %v4640_v59 = vpack.c.bf16 %v324_v52, %v323_v45  ;;  %v131_v45 = vld [vmem:[%s7482_s7 + $0x30] sm:$0xff]  ;;  %v133_v52 = vld [vmem:[%s7482_s7 + $0x40] sm:$0xff] }
  0xc5   :  { %4629 = vmatpush3.bf16.msra.mxu1 %v4628_v8 }
  0xc6   :  { %4630 = vmatprep.subr.bf16.mxu1 %v7403_v7 }
  0xc9   :  { %4632 = vmatpush3.bf16.msra.mxu1 %v4631_v13 }
  0xca   :  { %4633 = vmatprep.subr.bf16.mxu1 %v7403_v7 }
  0xcd   :  { %4635 = vmatpush3.bf16.msra.mxu1 %v4634_v16 }
  0xce   :  { %4636 = vmatprep.subr.bf16.mxu1 %v7403_v7 }
  0xd1   :  { %4638 = vmatpush3.bf16.msra.mxu1 %v4637_v38  ;;  %v129_v38 = vld [vmem:[%s7482_s7 + $0x20] sm:$0xff] }
  0xd2   :  { %4639 = vmatprep.subr.bf16.mxu1 %v7403_v7 }
  0xd5   :  { %4641 = vmatpush3.bf16.msra.mxu1 %v4640_v59  ;;  %v135_v59 = vld [vmem:[%s7482_s7 + $0x50] sm:$0xff] }
  0xd6   :  { %4666 = vmatprep.subr.bf16.mxu1 %v7403_v7 }
 0x18b   :  { %v5685_v0 = vpop.f32.mrb[0].mxu1 }
 0x18c   :  { %v3788_v8 = vpop.f32.mrb[1].mxu1  ;;  %3822 = vmatmul.mubr.f32.vlgmr.msra.gmra.mrb[2].mxu1 %v5685_v0 }
 0x18d   :  { %3891 = vmatprep.mubr.msk.f32.mxu1 %vm5241_vm0, %v7401_v18  ;;  %v137_v8 = vld [vmem:[%s7482_s7 + $0x60] sm:$0xff] }
 0x25f   :  { %v392_v12 = vpop.f32.mrb[2].mxu1 }
 0x260   :  { %v393_v13 = vadd.f32 %v392_v12, %v325_v11  ;;  %v3823_v14 = vpop.f32.mrb[3].mxu1  ;;  %v139_v11 = vld [vmem:[%s7482_s7 + $0x70] sm:$0xff]  ;;  %v417_v12 = vld [vmem:[%s7380_s10] sm:$0xff] }
 0x261   :  { %v419_v14 = vld [vmem:[%s7380_s10 + $0x10] sm:$0xff] }
 0x262   :  { %v396_v15 = vmax.f32 %v393_v13, 0.0  ;;  %v418_v13 = vld [vmem:[%s7380_s10 + $0x8] sm:$0xff] }
 0x264   :  { %v398_v16 = vsel %vm397_vm1, %v396_v15, 0.0 }
 0x265   :  { %399 = vadd.xlane.f32.xlu0 %v398_v16  ;;  %v4643_v16 = vpack.c.bf16 %v418_v13, %v417_v12 }
 0x267   :  { %4644 = vmatpush3.bf16.msra.mxu0 %v4643_v16 }
 0x268   :  { %4645 = vmatprep.subr.bf16.mxu0 %v7403_v7 }
 0x27b   :  { %534 = vperm.xlu0 %5176, %v125_v17   ;;  %v420_v17 = vld [vmem:[%s7380_s10 + $0x18] sm:$0xff] }
 0x27f   :  { %544 = vperm.xlu0 %5176, %v127_v31   ;;  %v4646_v31 = vpack.c.bf16 %v420_v17, %v419_v14  ;;  %v126_v17 = vld [vmem:[%s7482_s7 + $0x8] sm:$0xff] }
 0x281   :  { %4647 = vmatpush3.bf16.msra.mxu0 %v4646_v31  ;;  %v423_v31 = vld [vmem:[%s7380_s10 + $0x30] sm:$0xff] }
 0x282   :  { %4648 = vmatprep.subr.bf16.mxu0 %v7403_v7 }
 0x283   :  { %554 = vperm.xlu0 %5176, %v129_v38   ;;  %v421_v38 = vld [vmem:[%s7380_s10 + $0x20] sm:$0xff] }
 0x287   :  { %564 = vperm.xlu0 %5176, %v131_v45   ;;  %v422_v45 = vld [vmem:[%s7380_s10 + $0x28] sm:$0xff] }
 0x28b   :  { %574 = vperm.xlu0 %5176, %v133_v52   ;;  %v4649_v52 = vpack.c.bf16 %v422_v45, %v421_v38  ;;  %v128_v45 = vld [vmem:[%s7482_s7 + $0x18] sm:$0xff] }
 0x28d   :  { %4650 = vmatpush3.bf16.msra.mxu0 %v4649_v52  ;;  %v425_v52 = vld [vmem:[%s7380_s10 + $0x40] sm:$0xff] }
 0x28e   :  { %4651 = vmatprep.subr.bf16.mxu0 %v7403_v7 }
 0x28f   :  { %584 = vperm.xlu0 %5176, %v135_v59  }
 0x293   :  { %594 = vperm.xlu0 %5176, %v137_v8  }
 0x297   :  { %604 = vperm.xlu0 %5176, %v139_v11   ;;  %v5742_v11 = vld [vmem:[%s7483_s25] sm:$0x1] }
 0x2f2   :  { %v400_v59 = vpop.xlane.xlu0 %399 }
 0x2f3   :  { %v402_v8 = vmul.f32 0.0625, %v400_v59  ;;  %v426_v59 = vld [vmem:[%s7380_s10 + $0x48] sm:$0xff] }
 0x2f5   :  { %v403_v12 = vsub.f32 %v396_v15, %v402_v8  ;;  %v424_v15 = vld [vmem:[%s7380_s10 + $0x38] sm:$0xff]  ;;  %v4655_v8 = vpack.c.bf16 %v426_v59, %v425_v52  ;;  %v134_v52 = vld [vmem:[%s7482_s7 + $0x48] sm:$0xff]  ;;  %v431_v59 = vld [vmem:[%s7380_s10 + $0x70] sm:$0xff] }
 0x2f6   :  { %v4652_v38 = vpack.c.bf16 %v424_v15, %v423_v31  ;;  %v132_v31 = vld [vmem:[%s7482_s7 + $0x38] sm:$0xff]  ;;  %v429_v15 = vld [vmem:[%s7380_s10 + $0x60] sm:$0xff] }
 0x2f7   :  { %v5745_v13 = vmul.f32 %v403_v12, %v5742_v11  ;;  %v130_v12 = vld [vmem:[%s7482_s7 + $0x28] sm:$0xff] }
 0x2f8   :  { %4653 = vmatpush3.bf16.msra.mxu0 %v4652_v38  ;;  %v430_v38 = vld [vmem:[%s7380_s10 + $0x68] sm:$0xff] }
 0x2f9   :  { %v405_v14 = vmul.f32 %v5745_v13, %v5745_v13  ;;  %4654 = vmatprep.subr.bf16.mxu0 %v7403_v7 }
 0x2fb   :  { %v406_v16 = vsel %vm397_vm1, %v405_v14, 0.0  ;;  %v427_v14 = vld [vmem:[%s7380_s10 + $0x50] sm:$0xff] }
 0x2fc   :  { %407 = vadd.xlane.f32.xlu1 %v406_v16  ;;  %4656 = vmatpush3.bf16.msra.mxu0 %v4655_v8  ;;  %v428_v16 = vld [vmem:[%s7380_s10 + $0x58] sm:$0xff] }
 0x2fd   :  { %4657 = vmatprep.subr.bf16.mxu0 %v7403_v7  ;;  %v432_v8 = vld [vmem:[%s7380_s10 + $0x78] sm:$0xff] }
 0x30d   :  { %539 = vperm.xlu1 %5177, %v126_v17   ;;  %v4658_v17 = vpack.c.bf16 %v428_v16, %v427_v14  ;;  %v136_v14 = vld [vmem:[%s7482_s7 + $0x58] sm:$0xff]  ;;  %v138_v16 = vld [vmem:[%s7482_s7 + $0x68] sm:$0xff] }
 0x30f   :  { %4659 = vmatpush3.bf16.msra.mxu0 %v4658_v17  ;;  %v140_v17 = vld [vmem:[%s7482_s7 + $0x78] sm:$0xff] }
 0x310   :  { %4660 = vmatprep.subr.bf16.mxu0 %v7403_v7 }
 0x311   :  { %549 = vperm.xlu1 %5177, %v128_v45   ;;  %v4661_v45 = vpack.c.bf16 %v430_v38, %v429_v15  ;;  %v5808_v15 = vpop.permute.xlu0 %534 }
 0x313   :  { %4662 = vmatpush3.bf16.msra.mxu0 %v4661_v45 }
 0x314   :  { %4663 = vmatprep.subr.bf16.mxu0 %v7403_v7 }
 0x315   :  { %559 = vperm.xlu1 %5177, %v130_v12   ;;  %v4664_v12 = vpack.c.bf16 %v432_v8, %v431_v59  ;;  %v5810_v45 = vpop.permute.xlu0 %544 }
 0x317   :  { %4665 = vmatpush3.bf16.msra.mxu0 %v4664_v12 }
 0x319   :  { %569 = vperm.xlu1 %5177, %v132_v31   ;;  %v512_v31 = vlaneseq  ;;  %v5818_v8 = vpop.permute.xlu0 %554 }
 0x31a   :  { %7484 = vst [vmem:[#allocation6_spill] sm:$0xff] %v5818_v8 }
 0x31b   :  { %v513_v38 = vshrl.u32 %v512_v31, 7 }
 0x31d   :  { %579 = vperm.xlu1 %5177, %v134_v52   ;;  %v5812_v52 = vsub.s32 0, %v513_v38  ;;  %v5827_v38 = vpop.permute.xlu0 %564 }
 0x31e   :  { %7486 = vst [vmem:[#allocation8_spill] sm:$0xff] %v5827_v38 }
 0x31f   :  { %v5816_v59 = vrot.slane %v5685_v0, %v5812_v52 }
 0x321   :  { %589 = vperm.xlu1 %5177, %v136_v14   ;;  %v516_v14 = vsub.f32 %v5454_v27, %v5816_v59  ;;  %v517_v31 = vsub.f32 %v5458_v28, %v5816_v59  ;;  %v518_v0 = vsub.f32 %v5462_v29, %v5816_v59 }
 0x325   :  { %599 = vperm.xlu1 %5177, %v138_v16  }
 0x329   :  { %609 = vperm.xlu1 %5177, %v140_v17   ;;  %v5823_v17 = vmul.f32 %v5808_v15, %v516_v14  ;;  %v519_v14 = vsub.f32 %v5466_v30, %v5816_v59 }
 0x32b   :  { %7485 = vst [vmem:[#allocation7_spill] sm:$0xff] %v5823_v17  ;;  %v628_v27 = vmul.f32 %v5823_v17, %v5823_v17 }
 0x389   :  { %v408_v12 = vpop.xlane.xlu1 %407 }
 0x38a   :  { %v409_v16 = vmul.f32 0.0625, %v408_v12  ;;  %v5839_v12 = vmul.f32 %v5810_v45, %v518_v0 }
 0x38c   :  { %v410_v18 = vadd.f32 1e-05, %v409_v16  ;;  %7489 = vst [vmem:[#allocation11_spill] sm:$0xff] %v5839_v12  ;;  %v630_v0 = vmul.f32 %v5839_v12, %v5839_v12 }
 0x38d   :  { %v5829_v7 = vpop.permute.xlu1 %539 }
 0x38e   :  { %7487 = vst [vmem:[#allocation9_spill] sm:$0xff] %v5829_v7  ;;  %5178 = vrsqrt.f32 %v410_v18  ;;  %v5834_v5 = vmul.f32 %v5829_v7, %v517_v31  ;;  %v520_v18 = vsub.f32 %v5491_v37, %v5816_v59  ;;  %v5852_v7 = vpop.permute.xlu0 %574 }
 0x38f   :  { %7491 = vst [vmem:[#allocation13_spill] sm:$0xff] %v5852_v7 }
 0x390   :  { %7488 = vst [vmem:[#allocation10_spill] sm:$0xff] %v5834_v5  ;;  %v629_v28 = vmul.f32 %v5834_v5, %v5834_v5  ;;  %v5857_v17 = vmul.f32 %v5818_v8, %v520_v18  ;;  %v521_v5 = vsub.f32 %v5487_v36, %v5816_v59 }
 0x391   :  { %v5845_v16 = vpop.permute.xlu1 %549 }
 0x392   :  { %v5850_v29 = vmul.f32 %v5845_v16, %v519_v14  ;;  %v4667_v31 = vpack.c.bf16 %v629_v28, %v628_v27  ;;  %7492 = vst [vmem:[#allocation14_spill] sm:$0xff] %v5857_v17  ;;  %v7494_v14 = vmov 0.0|0.0   ;;  %v522_v27 = vsub.f32 %v5516_v44, %v5816_v59  ;;  %v413_v44 = vld [vmem:[%s7497_s30] sm:$0x1] }
 0x393   :  { %v632_v8 = vmul.f32 %v5857_v17, %v5857_v17 }
 0x394   :  { %7490 = vst [vmem:[#allocation12_spill] sm:$0xff] %v5850_v29  ;;  %v631_v30 = vmul.f32 %v5850_v29, %v5850_v29  ;;  %4668 = vmatpush3.bf16.msra.mxu1 %v4667_v31  ;;  %v5874_v31 = vmul.f32 %v5827_v38, %v522_v27  ;;  %v523_v29 = vsub.f32 %v5512_v43, %v5816_v59  ;;  %v415_v43 = vld [vmem:[%s7379_s9] sm:$0x1] }
 0x395   :  { %v5863_v37 = vpop.permute.xlu1 %559  ;;  %4669 = vmatprep.subr.bf16.mxu1 %v7494_v14  ;;  %v524_v27 = vsub.f32 %v5541_v51, %v5816_v59  ;;  %v525_v51 = vsub.f32 %v5537_v50, %v5816_v59 }
 0x396   :  { %7493 = vst [vmem:[#allocation15_spill] sm:$0xff] %v5863_v37  ;;  %v5869_v28 = vmul.f32 %v5863_v37, %v521_v5  ;;  %v4670_v12 = vpack.c.bf16 %v631_v30, %v630_v0  ;;  %7496 = vst [vmem:[#allocation17_spill] sm:$0xff] %v5874_v31  ;;  %v5883_v5 = vpop.permute.xlu0 %584  ;;  %v634_v38 = vmul.f32 %v5874_v31, %v5874_v31 }
 0x397   :  { %7498 = vst [vmem:[#allocation18_spill] sm:$0xff] %v5883_v5  ;;  %v5900_v37 = vmul.f32 %v5852_v7, %v524_v27 }
 0x398   :  { %7495 = vst [vmem:[#allocation16_spill] sm:$0xff] %v5869_v28  ;;  %v5179_v18 = vpop.eup %5178  ;;  %v633_v36 = vmul.f32 %v5869_v28, %v5869_v28  ;;  %4671 = vmatpush3.bf16.msra.mxu1 %v4670_v12 }
 0x399   :  { %v5885_v0 = vpop.permute.xlu1 %569  ;;  %4672 = vmatprep.subr.bf16.mxu1 %v7494_v14  ;;  %v412_v30 = vmul.f32 %v5179_v18, %v5745_v13  ;;  %7501 = vst [vmem:[#allocation21_spill] sm:$0xff] %v5900_v37  ;;  %v526_v18 = vsub.f32 %v5566_v58, %v5816_v59  ;;  %v527_v58 = vsub.f32 %v5562_v57, %v5816_v59 }
 0x39a   :  { %7499 = vst [vmem:[#allocation19_spill] sm:$0xff] %v5885_v0  ;;  %v5892_v12 = vmul.f32 %v5885_v0, %v523_v29  ;;  %v4673_v28 = vpack.c.bf16 %v633_v36, %v632_v8 }
 0x39b   :  { %v414_v17 = vmul.f32 %v413_v44, %v412_v30  ;;  %v5914_v30 = vpop.permute.xlu0 %594  ;;  %v5919_v50 = vmul.f32 %v5883_v5, %v526_v18  ;;  %v529_v18 = vsub.f32 %v5589_v1, %v5816_v59  ;;  %v916_v5 = vld [vmem:[%s7382_s12 + $0x20] sm:$0xff] }
 0x39c   :  { %7500 = vst [vmem:[#allocation20_spill] sm:$0xff] %v5892_v12  ;;  %v635_v13 = vmul.f32 %v5892_v12, %v5892_v12  ;;  %4674 = vmatpush3.bf16.msra.mxu1 %v4673_v28  ;;  %7504 = vst [vmem:[#allocation24_spill] sm:$0xff] %v5914_v30  ;;  %v636_v28 = vmul.f32 %v5900_v37, %v5900_v37 }
 0x39d   :  { %v5906_v29 = vpop.permute.xlu1 %579  ;;  %v416_v8 = vadd.f32 %v415_v43, %v414_v17  ;;  %4675 = vmatprep.subr.bf16.mxu1 %v7494_v14  ;;  %7505 = vst [vmem:[#allocation25_spill] sm:$0xff] %v5919_v50 }
 0x39e   :  { %7502 = vst [vmem:[#allocation22_spill] sm:$0xff] %v5906_v29  ;;  %v5912_v36 = vmul.f32 %v5906_v29, %v525_v51  ;;  %v4676_v44 = vpack.c.bf16 %v635_v13, %v634_v38  ;;  %v528_v38 = vsub.f32 %v5593_v2, %v5816_v59  ;;  %v638_v51 = vmul.f32 %v5919_v50, %v5919_v50 }
 0x39f   :  { %3857 = vmatmul.mubr.f32.vlgmr.msra.gmra.mrb[0].mxu0 %v416_v8 }
 0x3a0   :  { %7503 = vst [vmem:[#allocation23_spill] sm:$0xff] %v5912_v36  ;;  %v637_v17 = vmul.f32 %v5912_v36, %v5912_v36  ;;  %4677 = vmatpush3.bf16.msra.mxu1 %v4676_v44  ;;  %v5936_v8 = vmul.f32 %v5914_v30, %v528_v38  ;;  %v5942_v44 = vpop.permute.xlu0 %604 }
 0x3a1   :  { %v5925_v27 = vpop.permute.xlu1 %589  ;;  %4678 = vmatprep.subr.bf16.mxu1 %v7494_v14  ;;  %7509 = vst [vmem:[#allocation29_spill] sm:$0xff] %v5942_v44 }
 0x3a2   :  { %7506 = vst [vmem:[#allocation26_spill] sm:$0xff] %v5925_v27  ;;  %v5931_v43 = vmul.f32 %v5925_v27, %v527_v58  ;;  %v4679_v13 = vpack.c.bf16 %v637_v17, %v636_v28  ;;  %7508 = vst [vmem:[#allocation28_spill] sm:$0xff] %v5936_v8  ;;  %v530_v28 = vsub.f32 %v5618_v10, %v5816_v59 }
 0x3a3   :  { %v640_v38 = vmul.f32 %v5936_v8, %v5936_v8 }
 0x3a4   :  { %7507 = vst [vmem:[#allocation27_spill] sm:$0xff] %v5931_v43  ;;  %v639_v57 = vmul.f32 %v5931_v43, %v5931_v43  ;;  %4680 = vmatpush3.bf16.msra.mxu1 %v4679_v13  ;;  %v5955_v13 = vmul.f32 %v5942_v44, %v530_v28  ;;  %v531_v43 = vsub.f32 %v5614_v9, %v5816_v59  ;;  %v7426_v9 = vmov 1.0   ;;  %v5976_v59 = vld [vmem:[%s7515_s4] sm:$0xff]  ;;  %v915_v44 = vld [vmem:[%s7382_s12 + $0x18] sm:$0xff] }
 0x3a5   :  { %v5944_v2 = vpop.permute.xlu1 %599  ;;  %4681 = vmatprep.subr.bf16.mxu1 %v7494_v14  ;;  %3926 = vmatprep.mubr.f32.mxu0 %v5976_v59 }
 0x3a6   :  { %7510 = vst [vmem:[#allocation30_spill] sm:$0xff] %v5944_v2  ;;  %v5950_v17 = vmul.f32 %v5944_v2, %v529_v18  ;;  %v4682_v58 = vpack.c.bf16 %v639_v57, %v638_v51  ;;  %7512 = vst [vmem:[#allocation32_spill] sm:$0xff] %v5955_v13  ;;  %v642_v57 = vmul.f32 %v5955_v13, %v5955_v13 }
 0x3a8   :  { %7511 = vst [vmem:[#allocation31_spill] sm:$0xff] %v5950_v17  ;;  %v641_v1 = vmul.f32 %v5950_v17, %v5950_v17  ;;  %4683 = vmatpush3.bf16.msra.mxu1 %v4682_v58  ;;  %v3233_v58 = vld [vmem:[%s7382_s12 + $0x88] sm:$0xff] }
 0x3a9   :  { %v5961_v50 = vpop.permute.xlu1 %609  ;;  %4684 = vmatprep.subr.bf16.mxu1 %v7494_v14 }
 0x3aa   :  { %7513 = vst [vmem:[#allocation33_spill] sm:$0xff] %v5961_v50  ;;  %v5965_v10 = vmul.f32 %v5961_v50, %v531_v43  ;;  %v4685_v51 = vpack.c.bf16 %v641_v1, %v640_v38  ;;  %v3232_v43 = vld [vmem:[%s7382_s12 + $0x80] sm:$0xff]  ;;  %v3234_v38 = vld [vmem:[%s7382_s12 + $0x90] sm:$0xff] }
 0x3ab   :  { %v4722_v1 = vpack.c.bf16 %v3233_v58, %v3232_v43  ;;  %v3238_v43 = vld [vmem:[%s7382_s12 + $0xb0] sm:$0xff]  ;;  %v3239_v58 = vld [vmem:[%s7382_s12 + $0xb8] sm:$0xff] }
 0x3ac   :  { %7514 = vst [vmem:[#allocation34_spill] sm:$0xff] %v5965_v10  ;;  %v643_v18 = vmul.f32 %v5965_v10, %v5965_v10  ;;  %4686 = vmatpush3.bf16.msra.mxu1 %v4685_v51  ;;  %v3235_v51 = vld [vmem:[%s7382_s12 + $0x98] sm:$0xff] }
 0x3ad   :  { %4687 = vmatprep.subr.bf16.mxu1 %v7494_v14 }
 0x3ae   :  { %v4688_v28 = vpack.c.bf16 %v643_v18, %v642_v57  ;;  %v4726_v57 = vpack.c.bf16 %v3235_v51, %v3234_v38  ;;  %v3236_v18 = vld [vmem:[%s7382_s12 + $0xa0] sm:$0xff]  ;;  %v4734_v38 = vpack.c.bf16 %v3239_v58, %v3238_v43 }
 0x3af   :  { %v3240_v51 = vld [vmem:[%s7382_s12 + $0xc0] sm:$0xff] }
 0x3b0   :  { %4689 = vmatpush3.bf16.msra.mxu1 %v4688_v28  ;;  %v3237_v28 = vld [vmem:[%s7382_s12 + $0xa8] sm:$0xff]  ;;  %v3244_v58 = vld [vmem:[%s7382_s12 + $0xe0] sm:$0xff] }
 0x3b1   :  { %4723 = vmatprep.subr.bf16.mxu1 %v4722_v1 }
 0x3b3   :  { %3892 = vmatmul.mubr.f32.vlgmr.msra.gmra.mrb[4].mxu1 %v7426_v9  ;;  %v4730_v9 = vpack.c.bf16 %v3237_v28, %v3236_v18  ;;  %v3242_v28 = vld [vmem:[%s7382_s12 + $0xd0] sm:$0xff] }
 0x3b4   :  { %4725 = vmatpush3.bf16.msra.mxu1 %v4722_v1  ;;  %v3241_v1 = vld [vmem:[%s7382_s12 + $0xc8] sm:$0xff] }
 0x3b5   :  { %4727 = vmatprep.subr.bf16.mxu1 %v4726_v57  ;;  %v4738_v18 = vpack.c.bf16 %v3241_v1, %v3240_v51  ;;  %v433_v51 = vld [vmem:[%s7381_s11] sm:$0x1] }
 0x3b8   :  { %4729 = vmatpush3.bf16.msra.mxu1 %v4726_v57  ;;  %v3243_v57 = vld [vmem:[%s7382_s12 + $0xd8] sm:$0xff] }
 0x3b9   :  { %4731 = vmatprep.subr.bf16.mxu1 %v4730_v9  ;;  %v4742_v43 = vpack.c.bf16 %v3243_v57, %v3242_v28  ;;  %v3247_v28 = vld [vmem:[%s7382_s12 + $0xf8] sm:$0xff] }
 0x3bc   :  { %4733 = vmatpush3.bf16.msra.mxu1 %v4730_v9  ;;  %v3245_v9 = vld [vmem:[%s7382_s12 + $0xe8] sm:$0xff] }
 0x3bd   :  { %4735 = vmatprep.subr.bf16.mxu1 %v4734_v38  ;;  %v4746_v1 = vpack.c.bf16 %v3245_v9, %v3244_v58 }
 0x3c0   :  { %4737 = vmatpush3.bf16.msra.mxu1 %v4734_v38  ;;  %v3246_v38 = vld [vmem:[%s7382_s12 + $0xf0] sm:$0xff] }
 0x3c1   :  { %4739 = vmatprep.subr.bf16.mxu1 %v4738_v18 }
 0x3c4   :  { %4741 = vmatpush3.bf16.msra.mxu1 %v4738_v18  ;;  %v4750_v18 = vpack.c.bf16 %v3247_v28, %v3246_v38 }
 0x3c5   :  { %4743 = vmatprep.subr.bf16.mxu1 %v4742_v43 }
 0x3c8   :  { %4745 = vmatpush3.bf16.msra.mxu1 %v4742_v43 }
 0x3c9   :  { %4747 = vmatprep.subr.bf16.mxu1 %v4746_v1 }
 0x3cc   :  { %4749 = vmatpush3.bf16.msra.mxu1 %v4746_v1 }
 0x3cd   :  { %4751 = vmatprep.subr.bf16.mxu1 %v4750_v18 }
 0x3d0   :  { %4753 = vmatpush3.bf16.msra.mxu1 %v4750_v18  ;;  %v6144_v18 = vld [vmem:[%s7515_s4 + $0x20] sm:$0xff] }
 0x472   :  { %v500_v57 = vpop.f32.mrb[0].mxu0 }
 0x473   :  { %v501_v10 = vadd.f32 %v500_v57, %v433_v51  ;;  %v3858_v13 = vpop.f32.mrb[1].mxu0  ;;  %v6139_v57 = vld [vmem:[%s7515_s4 + $0x18] sm:$0xff] }
 0x475   :  { %v504_v17 = vsub.f32 0.0, %v501_v10 }
 0x477   :  { %v505_v8 = vmul.f32 1.442695, %v504_v17 }
 0x479   :  { %5180 = vpow2.f32 %v505_v8 }
 0x483   :  { %v5181_v58 = vpop.eup %5180 }
 0x484   :  { %v507_v9 = vadd.f32 1.0, %v5181_v58  ;;  %v6151_v58 = vld [vmem:[%s7515_s4 + $0x28] sm:$0xff] }
 0x486   :  { %5182 = vrcp.f32 %v507_v9  ;;  %v6030_v36 = vpop.f32.mrb[4].mxu1  ;;  %v6156_v9 = vld [vmem:[%s7515_s4 + $0x30] sm:$0xff] }
 0x487   :  { %7516 = vst [vmem:[#allocation35_spill] sm:$0xff] %v6030_v36  ;;  %v3893_v37 = vpop.f32.mrb[5].mxu1 }
 0x490   :  { %v5183_v12 = vpop.eup %5182 }
 0x491   :  { %v509_v31 = vmul.f32 2.0, %v5183_v12 }
 0x493   :  { %v510_v50 = vadd.f32 0.25, %v509_v31 }
 0x495   :  { %v6033_v13 = vmul.f32 %v510_v50, %v5742_v11 }
 0x497   :  { %7517 = vst [vmem:[#allocation36_spill] sm:$0xff] %v6033_v13  ;;  %v6037_v10 = vrot.slane %v6033_v13, %v5812_v52  ;;  %v875_v8 = vmul.f32 %v6030_v36, %v6033_v13 }
 0x499   :  { %7518 = vst [vmem:[#allocation37_spill] sm:$0xff] %v6037_v10  ;;  %v6043_v17 = vmul.f32 %v6037_v10, %v5431_v21  ;;  %v6047_v37 = vmul.f32 %v6037_v10, %v5436_v22  ;;  %v6051_v31 = vmul.f32 %v6037_v10, %v5441_v23  ;;  %v6055_v11 = vmul.f32 %v6037_v10, %v5448_v25 }
 0x49a   :  { %v6061_v50 = vmul.f32 %v6037_v10, %v5482_v35  ;;  %v6065_v21 = vmul.f32 %v6037_v10, %v5475_v33  ;;  %v6071_v23 = vmul.f32 %v6037_v10, %v5507_v42  ;;  %v6075_v25 = vmul.f32 %v6037_v10, %v5500_v40 }
 0x49b   :  { %v4690_v12 = vpack.c.bf16 %v6047_v37, %v6043_v17  ;;  %v4694_v22 = vpack.c.bf16 %v6055_v11, %v6051_v31  ;;  %v6080_v33 = vmul.f32 %v875_v8, %v6033_v13  ;;  %v6084_v43 = vmul.f32 %v6037_v10, %v5532_v49  ;;  %v6163_v8 = vld [vmem:[%s7515_s4 + $0x38] sm:$0xff]  ;;  %v913_v13 = vld [vmem:[%s7382_s12 + $0x8] sm:$0xff] }
 0x49c   :  { %v4698_v35 = vpack.c.bf16 %v6065_v21, %v6061_v50  ;;  %v6088_v42 = vmul.f32 %v6037_v10, %v5525_v47  ;;  %v4702_v40 = vpack.c.bf16 %v6075_v25, %v6071_v23  ;;  %v6094_v51 = vmul.f32 %v6037_v10, %v5557_v56 }
 0x49d   :  { %4691 = vmatprep.subr.bf16.mxu0 %v4690_v12  ;;  %7519 = vst [vmem:[#allocation38_spill] sm:$0xff] %v6080_v33  ;;  %v6098_v1 = vmul.f32 %v6037_v10, %v5550_v54  ;;  %v6104_v47 = vmul.f32 %v6037_v10, %v5582_v63  ;;  %v6108_v38 = vmul.f32 %v6037_v10, %v5575_v61  ;;  %v912_v33 = vld [vmem:[%s7382_s12] sm:$0xff] }
 0x49e   :  { %4693 = vmatpush3.bf16.msra.mxu0 %v4690_v12  ;;  %v4706_v49 = vpack.c.bf16 %v6088_v42, %v6084_v43  ;;  %v6114_v54 = vmul.f32 %v6037_v10, %v5607_v6  ;;  %v6118_v28 = vmul.f32 %v6037_v10, %v5600_v4  ;;  %v6127_v6 = vld [vmem:[%s7515_s4 + $0x8] sm:$0xff]  ;;  %v6132_v4 = vld [vmem:[%s7515_s4 + $0x10] sm:$0xff]  ;;  %v6168_v12 = vld [vmem:[%s7515_s4 + $0x40] sm:$0xff]  ;;  %v4754_v36 = vpack.c.bf16 %v913_v13, %v912_v33 }
 0x49f   :  { %4695 = vmatprep.subr.bf16.mxu0 %v4694_v22  ;;  %v4710_v56 = vpack.c.bf16 %v6098_v1, %v6094_v51  ;;  %v4714_v63 = vpack.c.bf16 %v6108_v38, %v6104_v47  ;;  %v914_v10 = vld [vmem:[%s7382_s12 + $0x10] sm:$0xff]  ;;  %v917_v13 = vld [vmem:[%s7382_s12 + $0x28] sm:$0xff] }
 0x4a0   :  { %v4718_v61 = vpack.c.bf16 %v6118_v28, %v6114_v54  ;;  %4755 = vmatprep.subr.bf16.mxu1 %v4754_v36  ;;  %v4758_v30 = vpack.c.bf16 %v915_v44, %v914_v10  ;;  %v4762_v7 = vpack.c.bf16 %v917_v13, %v916_v5  ;;  %v918_v44 = vld [vmem:[%s7382_s12 + $0x30] sm:$0xff]  ;;  %v919_v10 = vld [vmem:[%s7382_s12 + $0x38] sm:$0xff]  ;;  %v920_v5 = vld [vmem:[%s7382_s12 + $0x40] sm:$0xff] }
 0x4a2   :  { %4697 = vmatpush3.bf16.msra.mxu0 %v4694_v22  ;;  %v6175_v22 = vld [vmem:[%s7515_s4 + $0x48] sm:$0xff] }
 0x4a3   :  { %4699 = vmatprep.subr.bf16.mxu0 %v4698_v35 }
 0x4a6   :  { %4701 = vmatpush3.bf16.msra.mxu0 %v4698_v35  ;;  %v6180_v35 = vld [vmem:[%s7515_s4 + $0x50] sm:$0xff] }
 0x4a7   :  { %4703 = vmatprep.subr.bf16.mxu0 %v4702_v40 }
 0x4aa   :  { %4705 = vmatpush3.bf16.msra.mxu0 %v4702_v40  ;;  %v6187_v40 = vld [vmem:[%s7515_s4 + $0x58] sm:$0xff] }
 0x4ab   :  { %4707 = vmatprep.subr.bf16.mxu0 %v4706_v49 }
 0x4ae   :  { %4709 = vmatpush3.bf16.msra.mxu0 %v4706_v49  ;;  %v6192_v49 = vld [vmem:[%s7515_s4 + $0x60] sm:$0xff] }
 0x4af   :  { %4711 = vmatprep.subr.bf16.mxu0 %v4710_v56 }
 0x4b2   :  { %4713 = vmatpush3.bf16.msra.mxu0 %v4710_v56  ;;  %v6199_v56 = vld [vmem:[%s7515_s4 + $0x68] sm:$0xff] }
 0x4b3   :  { %4715 = vmatprep.subr.bf16.mxu0 %v4714_v63 }
 0x4b6   :  { %4717 = vmatpush3.bf16.msra.mxu0 %v4714_v63  ;;  %v6204_v63 = vld [vmem:[%s7515_s4 + $0x70] sm:$0xff] }
 0x4b7   :  { %4719 = vmatprep.subr.bf16.mxu0 %v4718_v61 }
 0x4ba   :  { %4721 = vmatpush3.bf16.msra.mxu0 %v4718_v61  ;;  %v6211_v61 = vld [vmem:[%s7515_s4 + $0x78] sm:$0xff] }
 0x4bd   :  { %3927 = vmatmul.mubr.f32.vlgmr.msra.gmra.mrb[2].mxu0 %v6127_v6 }
 0x4be   :  { %3929 = vmatprep.mubr.f32.mxu0 %v6132_v4 }
 0x4c1   :  { %3930 = vmatmul.mubr.f32.gmra.mrb[4].mxu0 %v6139_v57 }
 0x4c2   :  { %3932 = vmatprep.mubr.f32.mxu0 %v6144_v18 }
 0x4c5   :  { %3933 = vmatmul.mubr.f32.gmra.mrb[6].mxu0 %v6151_v58 }
 0x4c6   :  { %3935 = vmatprep.mubr.f32.mxu0 %v6156_v9 }
 0x4c9   :  { %3936 = vmatmul.mubr.f32.gmra.mrb[8].mxu0 %v6163_v8 }
 0x4ca   :  { %3938 = vmatprep.mubr.f32.mxu0 %v6168_v12 }
 0x4cd   :  { %3939 = vmatmul.mubr.f32.gmra.mrb[10].mxu0 %v6175_v22 }
 0x4ce   :  { %3941 = vmatprep.mubr.f32.mxu0 %v6180_v35 }
 0x4d1   :  { %3942 = vmatmul.mubr.f32.gmra.mrb[12].mxu0 %v6187_v40 }
 0x4d2   :  { %3944 = vmatprep.mubr.f32.mxu0 %v6192_v49 }
 0x4d5   :  { %3945 = vmatmul.mubr.f32.gmra.mrb[14].mxu0 %v6199_v56 }
 0x4d6   :  { %3947 = vmatprep.mubr.f32.mxu0 %v6204_v63 }
 0x4d9   :  { %3948 = vmatmul.mubr.f32.gmra.mrb[16].mxu0 %v6211_v61 }
 0x4da   :  { %4094 = vmatprep.mubr.f32.mxu0 %v5976_v59 }
 0x590   :  { %v3928_v2 = vpop.f32.mrb[2].mxu0 }
 0x591   :  { %v994_v59 = vpop.f32.mrb[3].mxu0 }
 0x592   :  { %v4786_v27 = vpack.c.bf16 %v3928_v2, %v994_v59  ;;  %3982 = vmatprep.mubr.f32.mxu1 %v994_v59 }
 0x593   :  { %3983 = vmatmul.mubr.f32.vlgmr.msra.gmra.mrb[6].mxu1 %v3928_v2 }
 0x594   :  { %v3931_v33 = vpop.f32.mrb[4].mxu0  ;;  %4757 = vmatpush3.bf16.msra.mxu1 %v4754_v36  ;;  %4787 = vmatprep.subr.bf16.mxu0 %v4786_v27 }
 0x595   :  { %v1004_v29 = vpop.f32.mrb[5].mxu0  ;;  %4789 = vmatpush3.bf16.msra.mxu0 %v4786_v27  ;;  %4759 = vmatprep.subr.bf16.mxu1 %v4758_v30  ;;  %v4766_v27 = vpack.c.bf16 %v919_v10, %v918_v44  ;;  %v922_v44 = vld [vmem:[%s7382_s12 + $0x50] sm:$0xff]  ;;  %v923_v10 = vld [vmem:[%s7382_s12 + $0x58] sm:$0xff] }
 0x596   :  { %v4790_v0 = vpack.c.bf16 %v3931_v33, %v1004_v29  ;;  %3985 = vmatprep.mubr.f32.mxu1 %v1004_v29  ;;  %v921_v29 = vld [vmem:[%s7382_s12 + $0x48] sm:$0xff] }
 0x597   :  { %3986 = vmatmul.mubr.f32.gmra.mrb[8].mxu1 %v3931_v33 }
 0x598   :  { %v3934_v59 = vpop.f32.mrb[6].mxu0  ;;  %4761 = vmatpush3.bf16.msra.mxu1 %v4758_v30  ;;  %4791 = vmatprep.subr.bf16.mxu0 %v4790_v0 }
 0x599   :  { %v1014_v36 = vpop.f32.mrb[7].mxu0  ;;  %4793 = vmatpush3.bf16.msra.mxu0 %v4790_v0  ;;  %4763 = vmatprep.subr.bf16.mxu1 %v4762_v7  ;;  %v4770_v0 = vpack.c.bf16 %v921_v29, %v920_v5  ;;  %v924_v5 = vld [vmem:[%s7382_s12 + $0x60] sm:$0xff]  ;;  %v925_v29 = vld [vmem:[%s7382_s12 + $0x68] sm:$0xff] }
 0x59a   :  { %v4794_v2 = vpack.c.bf16 %v3934_v59, %v1014_v36  ;;  %3988 = vmatprep.mubr.f32.mxu1 %v1014_v36 }
 0x59b   :  { %3989 = vmatmul.mubr.f32.gmra.mrb[10].mxu1 %v3934_v59  ;;  %v4774_v59 = vpack.c.bf16 %v923_v10, %v922_v44  ;;  %v926_v44 = vld [vmem:[%s7382_s12 + $0x70] sm:$0xff]  ;;  %v927_v10 = vld [vmem:[%s7382_s12 + $0x78] sm:$0xff] }
 0x59c   :  { %v3937_v13 = vpop.f32.mrb[8].mxu0  ;;  %4765 = vmatpush3.bf16.msra.mxu1 %v4762_v7  ;;  %4795 = vmatprep.subr.bf16.mxu0 %v4794_v2 }
 0x59d   :  { %v1024_v30 = vpop.f32.mrb[9].mxu0  ;;  %4797 = vmatpush3.bf16.msra.mxu0 %v4794_v2  ;;  %4767 = vmatprep.subr.bf16.mxu1 %v4766_v27 }
 0x59e   :  { %v4798_v33 = vpack.c.bf16 %v3937_v13, %v1024_v30  ;;  %3991 = vmatprep.mubr.f32.mxu1 %v1024_v30 }
 0x59f   :  { %3992 = vmatmul.mubr.f32.gmra.mrb[12].mxu1 %v3937_v13  ;;  %v4778_v13 = vpack.c.bf16 %v925_v29, %v924_v5  ;;  %v3248_v5 = vld [vmem:[%s7382_s12 + $0x100] sm:$0xff]  ;;  %v3249_v29 = vld [vmem:[%s7382_s12 + $0x108] sm:$0xff] }
 0x5a0   :  { %v3940_v36 = vpop.f32.mrb[10].mxu0  ;;  %4769 = vmatpush3.bf16.msra.mxu1 %v4766_v27  ;;  %4799 = vmatprep.subr.bf16.mxu0 %v4798_v33 }
 0x5a1   :  { %v1034_v7 = vpop.f32.mrb[11].mxu0  ;;  %4801 = vmatpush3.bf16.msra.mxu0 %v4798_v33  ;;  %4771 = vmatprep.subr.bf16.mxu1 %v4770_v0 }
 0x5a2   :  { %v4802_v2 = vpack.c.bf16 %v3940_v36, %v1034_v7  ;;  %3994 = vmatprep.mubr.f32.mxu1 %v1034_v7 }
 0x5a3   :  { %3995 = vmatmul.mubr.f32.gmra.mrb[14].mxu1 %v3940_v36  ;;  %v4782_v36 = vpack.c.bf16 %v927_v10, %v926_v44  ;;  %v3250_v44 = vld [vmem:[%s7382_s12 + $0x110] sm:$0xff]  ;;  %v3251_v10 = vld [vmem:[%s7382_s12 + $0x118] sm:$0xff] }
 0x5a4   :  { %v3943_v30 = vpop.f32.mrb[12].mxu0  ;;  %4773 = vmatpush3.bf16.msra.mxu1 %v4770_v0  ;;  %4803 = vmatprep.subr.bf16.mxu0 %v4802_v2 }
 0x5a5   :  { %v1044_v27 = vpop.f32.mrb[13].mxu0  ;;  %4805 = vmatpush3.bf16.msra.mxu0 %v4802_v2  ;;  %4775 = vmatprep.subr.bf16.mxu1 %v4774_v59 }
 0x5a6   :  { %v4806_v33 = vpack.c.bf16 %v3943_v30, %v1044_v27  ;;  %3997 = vmatprep.mubr.f32.mxu1 %v1044_v27 }
 0x5a7   :  { %3998 = vmatmul.mubr.f32.gmra.mrb[16].mxu1 %v3943_v30  ;;  %v4818_v30 = vpack.c.bf16 %v3249_v29, %v3248_v5  ;;  %v6351_v5 = vld [vmem:[%s7383_s13] ss:$0 sm:$0xff] }
 0x5a8   :  { %v3946_v7 = vpop.f32.mrb[14].mxu0  ;;  %4777 = vmatpush3.bf16.msra.mxu1 %v4774_v59  ;;  %4807 = vmatprep.subr.bf16.mxu0 %v4806_v33 }
 0x5a9   :  { %v1054_v0 = vpop.f32.mrb[15].mxu0  ;;  %4809 = vmatpush3.bf16.msra.mxu0 %v4806_v33  ;;  %4779 = vmatprep.subr.bf16.mxu1 %v4778_v13 }
 0x5aa   :  { %v4810_v2 = vpack.c.bf16 %v3946_v7, %v1054_v0  ;;  %4000 = vmatprep.mubr.f32.mxu1 %v1054_v0  ;;  %v3253_v0 = vld [vmem:[%s7382_s12 + $0x128] sm:$0xff] }
 0x5ab   :  { %4001 = vmatmul.mubr.f32.gmra.mrb[18].mxu1 %v3946_v7  ;;  %v3252_v7 = vld [vmem:[%s7382_s12 + $0x120] sm:$0xff] }
 0x5ac   :  { %v3949_v27 = vpop.f32.mrb[16].mxu0  ;;  %4781 = vmatpush3.bf16.msra.mxu1 %v4778_v13  ;;  %4811 = vmatprep.subr.bf16.mxu0 %v4810_v2  ;;  %v4822_v13 = vpack.c.bf16 %v3251_v10, %v3250_v44 }
 0x5ad   :  { %v1064_v59 = vpop.f32.mrb[17].mxu0  ;;  %4813 = vmatpush3.bf16.msra.mxu0 %v4810_v2  ;;  %4783 = vmatprep.subr.bf16.mxu1 %v4782_v36  ;;  %v3255_v2 = vld [vmem:[%s7382_s12 + $0x138] sm:$0xff] }
 0x5ae   :  { %v4814_v33 = vpack.c.bf16 %v3949_v27, %v1064_v59  ;;  %4003 = vmatprep.mubr.f32.mxu1 %v1064_v59 }
 0x5af   :  { %4004 = vmatmul.mubr.f32.gmra.mrb[20].mxu1 %v3949_v27 }
 0x5b0   :  { %4785 = vmatpush3.bf16.msra.mxu1 %v4782_v36  ;;  %4038 = vmatprep.mubr.f32.mxu1 %v6043_v17  ;;  %v4826_v17 = vpack.c.bf16 %v3253_v0, %v3252_v7  ;;  %v3254_v36 = vld [vmem:[%s7382_s12 + $0x130] sm:$0xff] }
 0x5b1   :  { %4815 = vmatprep.subr.bf16.mxu0 %v4814_v33  ;;  %4819 = vmatprep.subr.bf16.mxu1 %v4818_v30 }
 0x5b2   :  { %4817 = vmatpush3.bf16.msra.mxu0 %v4814_v33 }
 0x5b3   :  { %4039 = vmatmul.mubr.f32.vlgmr.msra.gmra.mrb[6].mxu1 %v6047_v37  ;;  %4850 = vmatprep.subr.bf16.mxu0 %v7494_v14  ;;  %v4830_v37 = vpack.c.bf16 %v3255_v2, %v3254_v36 }
 0x5b4   :  { %4041 = vmatprep.mubr.f32.mxu1 %v6051_v31  ;;  %4821 = vmatpush3.bf16.msra.mxu1 %v4818_v30  ;;  %v3256_v31 = vld [vmem:[%s7382_s12 + $0x140] sm:$0xff] }
 0x5b5   :  { %4095 = vmatmul.mubr.f32.vlgmr.msra.gmra.mrb[18].mxu0 %v6127_v6  ;;  %4823 = vmatprep.subr.bf16.mxu1 %v4822_v13  ;;  %v3257_v6 = vld [vmem:[%s7382_s12 + $0x148] sm:$0xff] }
 0x5b6   :  { %4097 = vmatprep.mubr.f32.mxu0 %v6132_v4  ;;  %v3259_v4 = vld [vmem:[%s7382_s12 + $0x158] sm:$0xff] }
 0x5b7   :  { %4042 = vmatmul.mubr.f32.gmra.mrb[8].mxu1 %v6055_v11  ;;  %v4834_v11 = vpack.c.bf16 %v3257_v6, %v3256_v31 }
 0x5b8   :  { %4044 = vmatprep.mubr.f32.mxu1 %v6061_v50  ;;  %4825 = vmatpush3.bf16.msra.mxu1 %v4822_v13  ;;  %v3258_v50 = vld [vmem:[%s7382_s12 + $0x150] sm:$0xff] }
 0x5b9   :  { %4098 = vmatmul.mubr.f32.gmra.mrb[20].mxu0 %v6139_v57  ;;  %4827 = vmatprep.subr.bf16.mxu1 %v4826_v17  ;;  %v3261_v57 = vld [vmem:[%s7382_s12 + $0x168] sm:$0xff] }
 0x5ba   :  { %4100 = vmatprep.mubr.f32.mxu0 %v6144_v18  ;;  %v3263_v18 = vld [vmem:[%s7382_s12 + $0x178] sm:$0xff] }
 0x5bb   :  { %4045 = vmatmul.mubr.f32.gmra.mrb[10].mxu1 %v6065_v21  ;;  %v4838_v21 = vpack.c.bf16 %v3259_v4, %v3258_v50 }
 0x5bc   :  { %4047 = vmatprep.mubr.f32.mxu1 %v6071_v23  ;;  %4829 = vmatpush3.bf16.msra.mxu1 %v4826_v17  ;;  %v3260_v23 = vld [vmem:[%s7382_s12 + $0x160] sm:$0xff] }
 0x5bd   :  { %4101 = vmatmul.mubr.f32.gmra.mrb[22].mxu0 %v6151_v58  ;;  %4831 = vmatprep.subr.bf16.mxu1 %v4830_v37 }
 0x5be   :  { %4103 = vmatprep.mubr.f32.mxu0 %v6156_v9 }
 0x5bf   :  { %4048 = vmatmul.mubr.f32.gmra.mrb[12].mxu1 %v6075_v25  ;;  %v4842_v25 = vpack.c.bf16 %v3261_v57, %v3260_v23 }
 0x5c0   :  { %4050 = vmatprep.mubr.f32.mxu1 %v6084_v43  ;;  %4833 = vmatpush3.bf16.msra.mxu1 %v4830_v37  ;;  %v3262_v43 = vld [vmem:[%s7382_s12 + $0x170] sm:$0xff] }
 0x5c1   :  { %4104 = vmatmul.mubr.f32.gmra.mrb[24].mxu0 %v6163_v8  ;;  %4835 = vmatprep.subr.bf16.mxu1 %v4834_v11 }
 0x5c2   :  { %4106 = vmatprep.mubr.f32.mxu0 %v6168_v12 }
 0x5c3   :  { %4051 = vmatmul.mubr.f32.gmra.mrb[14].mxu1 %v6088_v42  ;;  %v4846_v42 = vpack.c.bf16 %v3263_v18, %v3262_v43 }
 0x5c4   :  { %4053 = vmatprep.mubr.f32.mxu1 %v6094_v51  ;;  %4837 = vmatpush3.bf16.msra.mxu1 %v4834_v11  ;;  %v7520_v51 = vmov 0.0  }
 0x5c5   :  { %4107 = vmatmul.mubr.f32.gmra.mrb[26].mxu0 %v6175_v22  ;;  %4839 = vmatprep.subr.bf16.mxu1 %v4838_v21 }
 0x5c6   :  { %4109 = vmatprep.mubr.f32.mxu0 %v6180_v35 }
 0x5c7   :  { %4054 = vmatmul.mubr.f32.gmra.mrb[16].mxu1 %v6098_v1 }
 0x5c8   :  { %4056 = vmatprep.mubr.f32.mxu1 %v6104_v47  ;;  %4841 = vmatpush3.bf16.msra.mxu1 %v4838_v21 }
 0x5c9   :  { %4110 = vmatmul.mubr.f32.gmra.mrb[28].mxu0 %v6187_v40  ;;  %4843 = vmatprep.subr.bf16.mxu1 %v4842_v25 }
 0x5ca   :  { %4112 = vmatprep.mubr.f32.mxu0 %v6192_v49 }
 0x5cb   :  { %4057 = vmatmul.mubr.f32.gmra.mrb[18].mxu1 %v6108_v38 }
 0x5cc   :  { %4059 = vmatprep.mubr.f32.mxu1 %v6114_v54  ;;  %4845 = vmatpush3.bf16.msra.mxu1 %v4842_v25 }
 0x5cd   :  { %4113 = vmatmul.mubr.f32.gmra.mrb[30].mxu0 %v6199_v56  ;;  %4847 = vmatprep.subr.bf16.mxu1 %v4846_v42 }
 0x5ce   :  { %4115 = vmatprep.mubr.f32.mxu0 %v6204_v63 }
 0x5cf   :  { %4060 = vmatmul.mubr.f32.gmra.mrb[20].mxu1 %v6118_v28 }
 0x5d0   :  { %4849 = vmatpush3.bf16.msra.mxu1 %v4846_v42 }
 0x5d1   :  { %4116 = vmatmul.mubr.f32.gmra.mrb[32].mxu0 %v6211_v61  ;;  %4898 = vmatprep.subr.bf16.mxu1 %v7494_v14 }
 0x5d2   :  { %4206 = vmatprep.mubr.msk.f32.mxu0 %vm5241_vm0, %v7520_v51 }
 0x688   :  { %v4096_v1 = vpop.f32.mrb[18].mxu0 }
 0x689   :  { %v1446_v47 = vpop.f32.mrb[19].mxu0 }
 0x68a   :  { %4150 = vmatprep.mubr.f32.mxu1 %v1446_v47 }
 0x68b   :  { %4151 = vmatmul.mubr.f32.vlgmr.msra.gmra.mrb[6].mxu1 %v4096_v1 }
 0x68c   :  { %v4099_v38 = vpop.f32.mrb[20].mxu0 }
 0x68d   :  { %v1456_v54 = vpop.f32.mrb[21].mxu0 }
 0x68e   :  { %4153 = vmatprep.mubr.f32.mxu1 %v1456_v54 }
 0x68f   :  { %4154 = vmatmul.mubr.f32.gmra.mrb[8].mxu1 %v4099_v38 }
 0x690   :  { %v4102_v58 = vpop.f32.mrb[22].mxu0 }
 0x691   :  { %v1466_v9 = vpop.f32.mrb[23].mxu0 }
 0x692   :  { %4156 = vmatprep.mubr.f32.mxu1 %v1466_v9 }
 0x693   :  { %4157 = vmatmul.mubr.f32.gmra.mrb[10].mxu1 %v4102_v58 }
 0x694   :  { %v4105_v28 = vpop.f32.mrb[24].mxu0 }
 0x695   :  { %v1476_v8 = vpop.f32.mrb[25].mxu0 }
 0x696   :  { %4159 = vmatprep.mubr.f32.mxu1 %v1476_v8 }
 0x697   :  { %4160 = vmatmul.mubr.f32.gmra.mrb[12].mxu1 %v4105_v28 }
 0x698   :  { %v4108_v12 = vpop.f32.mrb[26].mxu0 }
 0x699   :  { %v1486_v22 = vpop.f32.mrb[27].mxu0 }
 0x69a   :  { %4162 = vmatprep.mubr.f32.mxu1 %v1486_v22 }
 0x69b   :  { %4163 = vmatmul.mubr.f32.gmra.mrb[14].mxu1 %v4108_v12 }
 0x69c   :  { %v4111_v35 = vpop.f32.mrb[28].mxu0 }
 0x69d   :  { %v1496_v40 = vpop.f32.mrb[29].mxu0 }
 0x69e   :  { %4165 = vmatprep.mubr.f32.mxu1 %v1496_v40 }
 0x69f   :  { %4166 = vmatmul.mubr.f32.gmra.mrb[16].mxu1 %v4111_v35 }
 0x6a0   :  { %v4114_v49 = vpop.f32.mrb[30].mxu0 }
 0x6a1   :  { %v1506_v56 = vpop.f32.mrb[31].mxu0 }
 0x6a2   :  { %4168 = vmatprep.mubr.f32.mxu1 %v1506_v56 }
 0x6a3   :  { %4169 = vmatmul.mubr.f32.gmra.mrb[18].mxu1 %v4114_v49 }
 0x6a4   :  { %v4117_v63 = vpop.f32.mrb[32].mxu0 }
 0x6a5   :  { %v1516_v61 = vpop.f32.mrb[33].mxu0 }
 0x6a6   :  { %4171 = vmatprep.mubr.f32.mxu1 %v1516_v61 }
 0x6a7   :  { %4172 = vmatmul.mubr.f32.gmra.mrb[20].mxu1 %v4117_v63 }
 0x6a8   :  { %4276 = vmatprep.mubr.msk.f32.mxu1 %vm5241_vm0, %v7520_v51 }
 0x75e   :  { %v4152_v29 = vpop.f32.mrb[6].mxu1 }
 0x75f   :  { %v1711_v27 = vadd.f32 %v4152_v29, %v6351_v5  ;;  %v1608_v59 = vpop.f32.mrb[7].mxu1 }
 0x760   :  { %v1710_v30 = vadd.f32 %v6351_v5, %v1608_v59 }
 0x761   :  { %vm1727_vm2 = vcmp.gt.f32.partialorder %v1711_v27, 0.0  ;;  %v1743_v33 = vmul.f32 0.01, %v1711_v27 }
 0x762   :  { %vm1726_vm3 = vcmp.gt.f32.partialorder %v1710_v30, 0.0  ;;  %v1742_v44 = vmul.f32 0.01, %v1710_v30  ;;  %v4155_v10 = vpop.f32.mrb[8].mxu1 }
 0x763   :  { %v6355_v13 = vsel %vm1727_vm2, %v1711_v27, %v1743_v33  ;;  %v1713_v7 = vadd.f32 %v4155_v10, %v6351_v5  ;;  %v1618_v0 = vpop.f32.mrb[9].mxu1 }
 0x764   :  { %v6360_v17 = vmul.f32 %v6355_v13, %v5450_v26  ;;  %v6362_v36 = vsel %vm1726_vm3, %v1710_v30, %v1742_v44  ;;  %v1712_v2 = vadd.f32 %v6351_v5, %v1618_v0 }
 0x765   :  { %v6367_v37 = vmul.f32 %v6362_v36, %v5426_v20  ;;  %vm1729_vm4 = vcmp.gt.f32.partialorder %v1713_v7, 0.0  ;;  %v1745_v31 = vmul.f32 0.01, %v1713_v7 }
 0x766   :  { %vm1728_vm5 = vcmp.gt.f32.partialorder %v1712_v2, 0.0  ;;  %v1744_v6 = vmul.f32 0.01, %v1712_v2  ;;  %v4158_v11 = vpop.f32.mrb[10].mxu1 }
 0x767   :  { %v6369_v50 = vsel %vm1729_vm4, %v1713_v7, %v1745_v31  ;;  %v1715_v4 = vadd.f32 %v4158_v11, %v6351_v5  ;;  %v1628_v21 = vpop.f32.mrb[11].mxu1  ;;  %v4851_v26 = vpack.c.bf16 %v6360_v17, %v6367_v37 }
 0x768   :  { %v6376_v23 = vmul.f32 %v6369_v50, %v5443_v24  ;;  %v6378_v57 = vsel %vm1728_vm5, %v1712_v2, %v1744_v6  ;;  %v1714_v20 = vadd.f32 %v6351_v5, %v1628_v21 }
 0x769   :  { %v6383_v25 = vmul.f32 %v6378_v57, %v5424_v19  ;;  %vm1731_vm6 = vcmp.gt.f32.partialorder %v1715_v4, 0.0  ;;  %v1747_v43 = vmul.f32 0.01, %v1715_v4  ;;  %4852 = vmatpush3.bf16.msra.mxu0 %v4851_v26 }
 0x76a   :  { %vm1730_vm7 = vcmp.gt.f32.partialorder %v1714_v20, 0.0  ;;  %v1746_v18 = vmul.f32 0.01, %v1714_v20  ;;  %v4161_v42 = vpop.f32.mrb[12].mxu1  ;;  %4853 = vmatprep.subr.bf16.mxu0 %v7494_v14 }
 0x76b   :  { %v6386_v1 = vsel %vm1731_vm6, %v1715_v4, %v1747_v43  ;;  %v1717_v24 = vadd.f32 %v4161_v42, %v6351_v5  ;;  %v1638_v47 = vpop.f32.mrb[13].mxu1  ;;  %v4854_v38 = vpack.c.bf16 %v6376_v23, %v6383_v25 }
 0x76c   :  { %v6393_v19 = vmul.f32 %v6386_v1, %v5470_v32  ;;  %v6395_v54 = vsel %vm1730_vm7, %v1714_v20, %v1746_v18  ;;  %v1716_v58 = vadd.f32 %v6351_v5, %v1638_v47 }
 0x76d   :  { %v6400_v9 = vmul.f32 %v6395_v54, %v5477_v34  ;;  %vm1733_vm8 = vcmp.gt.f32.partialorder %v1717_v24, 0.0  ;;  %v1749_v28 = vmul.f32 0.01, %v1717_v24  ;;  %4855 = vmatpush3.bf16.msra.mxu0 %v4854_v38 }
 0x76e   :  { %vm1732_vm9 = vcmp.gt.f32.partialorder %v1716_v58, 0.0  ;;  %v1748_v8 = vmul.f32 0.01, %v1716_v58  ;;  %v4164_v12 = vpop.f32.mrb[14].mxu1  ;;  %4856 = vmatprep.subr.bf16.mxu0 %v7494_v14 }
 0x76f   :  { %v6403_v22 = vsel %vm1733_vm8, %v1717_v24, %v1749_v28  ;;  %v1719_v32 = vadd.f32 %v4164_v12, %v6351_v5  ;;  %v1648_v35 = vpop.f32.mrb[15].mxu1  ;;  %v4857_v40 = vpack.c.bf16 %v6393_v19, %v6400_v9 }
 0x770   :  { %v6410_v34 = vmul.f32 %v6403_v22, %v5495_v39  ;;  %v6412_v49 = vsel %vm1732_vm9, %v1716_v58, %v1748_v8  ;;  %v1718_v56 = vadd.f32 %v6351_v5, %v1648_v35 }
 0x771   :  { %v6417_v63 = vmul.f32 %v6412_v49, %v5502_v41  ;;  %vm1735_vm10 = vcmp.gt.f32.partialorder %v1719_v32, 0.0  ;;  %v1751_v61 = vmul.f32 0.01, %v1719_v32  ;;  %4858 = vmatpush3.bf16.msra.mxu0 %v4857_v40 }
 0x772   :  { %vm1734_vm11 = vcmp.gt.f32.partialorder %v1718_v56, 0.0  ;;  %v1750_v29 = vmul.f32 0.01, %v1718_v56  ;;  %v4167_v27 = vpop.f32.mrb[16].mxu1  ;;  %4859 = vmatprep.subr.bf16.mxu0 %v7494_v14 }
 0x773   :  { %v6420_v59 = vsel %vm1735_vm10, %v1719_v32, %v1751_v61  ;;  %v1721_v39 = vadd.f32 %v4167_v27, %v6351_v5  ;;  %v1658_v30 = vpop.f32.mrb[17].mxu1  ;;  %v4860_v33 = vpack.c.bf16 %v6410_v34, %v6417_v63  ;;  %v1861_v61 = vld [vmem:[%s7385_s15] sm:$0xff] }
 0x774   :  { %v6427_v41 = vmul.f32 %v6420_v59, %v5520_v46  ;;  %v6429_v44 = vsel %vm1734_vm11, %v1718_v56, %v1750_v29  ;;  %v1720_v10 = vadd.f32 %v6351_v5, %v1658_v30  ;;  %v1862_v29 = vld [vmem:[%s7385_s15 + $0x8] sm:$0xff]  ;;  %v1864_v30 = vld [vmem:[%s7385_s15 + $0x18] sm:$0xff] }
 0x775   :  { %v6434_v7 = vmul.f32 %v6429_v44, %v5527_v48  ;;  %vm1737_vm12 = vcmp.gt.f32.partialorder %v1721_v39, 0.0  ;;  %v1753_v0 = vmul.f32 0.01, %v1721_v39  ;;  %4861 = vmatpush3.bf16.msra.mxu0 %v4860_v33  ;;  %v4875_v27 = vpack.c.bf16 %v1862_v29, %v1861_v61  ;;  %v5198_v33 = vld [vmem:[%s7480_s5] sm:$0x1] }
 0x776   :  { %vm1736_vm13 = vcmp.gt.f32.partialorder %v1720_v10, 0.0  ;;  %v1752_v2 = vmul.f32 0.01, %v1720_v10  ;;  %v4170_v31 = vpop.f32.mrb[18].mxu1  ;;  %4862 = vmatprep.subr.bf16.mxu0 %v7494_v14 }
 0x777   :  { %v6437_v6 = vsel %vm1737_vm12, %v1721_v39, %v1753_v0  ;;  %v1723_v46 = vadd.f32 %v4170_v31, %v6351_v5  ;;  %v1668_v11 = vpop.f32.mrb[19].mxu1  ;;  %v4863_v4 = vpack.c.bf16 %v6427_v41, %v6434_v7  ;;  %v1863_v39 = vld [vmem:[%s7385_s15 + $0x10] sm:$0xff]  ;;  %v1865_v0 = vld [vmem:[%s7385_s15 + $0x20] sm:$0xff] }
 0x778   :  { %v6444_v48 = vmul.f32 %v6437_v6, %v5545_v53  ;;  %v6446_v21 = vsel %vm1736_vm13, %v1720_v10, %v1752_v2  ;;  %v1722_v26 = vadd.f32 %v6351_v5, %v1668_v11  ;;  %v4878_v10 = vpack.c.bf16 %v1864_v30, %v1863_v39  ;;  %v1866_v2 = vld [vmem:[%s7385_s15 + $0x28] sm:$0xff]  ;;  %v1868_v11 = vld [vmem:[%s7385_s15 + $0x38] sm:$0xff] }
 0x779   :  { %v6451_v20 = vmul.f32 %v6446_v21, %v5552_v55  ;;  %vm1739_vm14 = vcmp.gt.f32.partialorder %v1723_v46, 0.0  ;;  %v1755_v43 = vmul.f32 0.01, %v1723_v46  ;;  %4864 = vmatpush3.bf16.msra.mxu0 %v4863_v4  ;;  %v4881_v31 = vpack.c.bf16 %v1866_v2, %v1865_v0  ;;  %v7522_v2 = vld [vmem:[#allocation9_spill] sm:$0xff] }
 0x77a   :  { %vm1738_vm15 = vcmp.gt.f32.partialorder %v1722_v26, 0.0  ;;  %v1754_v18 = vmul.f32 0.01, %v1722_v26  ;;  %v4173_v42 = vpop.f32.mrb[20].mxu1  ;;  %4865 = vmatprep.subr.bf16.mxu0 %v7494_v14 }
 0x77b   :  { %v6454_v24 = vsel %vm1739_vm14, %v1723_v46, %v1755_v43  ;;  %v1725_v53 = vadd.f32 %v4173_v42, %v6351_v5  ;;  %v1678_v47 = vpop.f32.mrb[21].mxu1  ;;  %v4866_v38 = vpack.c.bf16 %v6444_v48, %v6451_v20  ;;  %v1867_v46 = vld [vmem:[%s7385_s15 + $0x30] sm:$0xff]  ;;  %v1870_v43 = vld [vmem:[%s7385_s15 + $0x48] sm:$0xff] }
 0x77c   :  { %v6461_v55 = vmul.f32 %v6454_v24, %v5570_v60  ;;  %v6463_v58 = vsel %vm1738_vm15, %v1722_v26, %v1754_v18  ;;  %v1724_v28 = vadd.f32 %v6351_v5, %v1678_v47  ;;  %v4884_v4 = vpack.c.bf16 %v1868_v11, %v1867_v46  ;;  %v1869_v26 = vld [vmem:[%s7385_s15 + $0x40] sm:$0xff]  ;;  %v1871_v42 = vld [vmem:[%s7385_s15 + $0x50] sm:$0xff] }
 0x77d   :  { %v6468_v8 = vmul.f32 %v6463_v58, %v5577_v62  ;;  %vm1741_vm2 = vcmp.gt.f32.partialorder %v1725_v53, 0.0  ;;  %v1757_v12 = vmul.f32 0.01, %v1725_v53  ;;  %4867 = vmatpush3.bf16.msra.mxu0 %v4866_v38  ;;  %v7521_v62 = vld [vmem:[#allocation5_spill] sm:$0xff]  ;;  %v4887_v18 = vpack.c.bf16 %v1870_v43, %v1869_v26 }
 0x77e   :  { %vm1740_vm3 = vcmp.gt.f32.partialorder %v1724_v28, 0.0  ;;  %v1756_v32 = vmul.f32 0.01, %v1724_v28  ;;  %4868 = vmatprep.subr.bf16.mxu0 %v7494_v14  ;;  %v1873_v38 = vld [vmem:[%s7385_s15 + $0x60] sm:$0xff] }
 0x77f   :  { %v6471_v35 = vsel %vm1741_vm2, %v1725_v53, %v1757_v12  ;;  %v4869_v60 = vpack.c.bf16 %v6461_v55, %v6468_v8  ;;  %v1872_v53 = vld [vmem:[%s7385_s15 + $0x58] sm:$0xff] }
 0x780   :  { %v6477_v40 = vmul.f32 %v6471_v35, %v5595_v3  ;;  %v6479_v5 = vsel %vm1740_vm3, %v1724_v28, %v1756_v32  ;;  %v4890_v47 = vpack.c.bf16 %v1872_v53, %v1871_v42  ;;  %v1874_v28 = vld [vmem:[%s7385_s15 + $0x68] sm:$0xff]  ;;  %v1875_v32 = vld [vmem:[%s7385_s15 + $0x70] sm:$0xff] }
 0x781   :  { %v6483_v56 = vmul.f32 %v6479_v5, %v7521_v62  ;;  %4870 = vmatpush3.bf16.msra.mxu0 %v4869_v60  ;;  %v4893_v12 = vpack.c.bf16 %v1874_v28, %v1873_v38  ;;  %v1876_v60 = vld [vmem:[%s7385_s15 + $0x78] sm:$0xff] }
 0x782   :  { %4871 = vmatprep.subr.bf16.mxu0 %v7494_v14  ;;  %v4896_v62 = vpack.c.bf16 %v1876_v60, %v1875_v32 }
 0x783   :  { %v4872_v3 = vpack.c.bf16 %v6477_v40, %v6483_v56 }
 0x785   :  { %4873 = vmatpush3.bf16.msra.mxu0 %v4872_v3 }
 0x786   :  { %4874 = vmatprep.subr.bf16.mxu0 %v7494_v14 }
 0x788   :  { %4207 = vmatmul.mubr.f32.vlgmr.msra.gmra.mrb[34].mxu0 %v5198_v33 }
 0x789   :  { %4876 = vmatpush3.bf16.msra.mxu0 %v4875_v27  ;;  %4241 = vmatprep.mubr.msk.f32.mxu0 %vm5241_vm0, %v7520_v51 }
 0x78a   :  { %4877 = vmatprep.subr.bf16.mxu0 %v7494_v14 }
 0x78d   :  { %4879 = vmatpush3.bf16.msra.mxu0 %v4878_v10 }
 0x78e   :  { %4880 = vmatprep.subr.bf16.mxu0 %v7494_v14 }
 0x791   :  { %4882 = vmatpush3.bf16.msra.mxu0 %v4881_v31  ;;  %v7523_v31 = vld [vmem:[#allocation6_spill] sm:$0xff] }
 0x792   :  { %4883 = vmatprep.subr.bf16.mxu0 %v7494_v14 }
 0x795   :  { %4885 = vmatpush3.bf16.msra.mxu0 %v4884_v4 }
 0x796   :  { %4886 = vmatprep.subr.bf16.mxu0 %v7494_v14 }
 0x799   :  { %4888 = vmatpush3.bf16.msra.mxu0 %v4887_v18 }
 0x79a   :  { %4889 = vmatprep.subr.bf16.mxu0 %v7494_v14 }
 0x79d   :  { %4891 = vmatpush3.bf16.msra.mxu0 %v4890_v47 }
 0x79e   :  { %4892 = vmatprep.subr.bf16.mxu0 %v7494_v14 }
 0x7a1   :  { %4894 = vmatpush3.bf16.msra.mxu0 %v4893_v12 }
 0x7a2   :  { %4895 = vmatprep.subr.bf16.mxu0 %v7494_v14 }
 0x7a5   :  { %4897 = vmatpush3.bf16.msra.mxu0 %v4896_v62  ;;  %v7527_v62 = vld [vmem:[#allocation13_spill] sm:$0xff] }
 0x7a6   :  { %4922 = vmatprep.subr.bf16.mxu0 %v7494_v14 }
 0x85b   :  { %v1857_v61 = vpop.f32.mrb[34].mxu0 }
 0x85c   :  { %v6551_v29 = vrot.slane %v1857_v61, %v5812_v52  ;;  %v4208_v3 = vpop.f32.mrb[35].mxu0  ;;  %4242 = vmatmul.mubr.f32.vlgmr.msra.gmra.mrb[36].mxu0 %v1857_v61 }
 0x85d   :  { %4311 = vmatprep.mubr.msk.f32.mxu0 %vm5241_vm0, %v7520_v51  ;;  %v7528_v3 = vld [vmem:[#allocation22_spill] sm:$0xff] }
 0x85e   :  { %v2067_v27 = vsub.f32 %v6367_v37, %v6551_v29  ;;  %v2068_v39 = vsub.f32 %v6360_v17, %v6551_v29  ;;  %v2069_v30 = vsub.f32 %v6383_v25, %v6551_v29  ;;  %v2070_v33 = vsub.f32 %v6376_v23, %v6551_v29 }
 0x85f   :  { %v2071_v10 = vsub.f32 %v6400_v9, %v6551_v29  ;;  %v2072_v0 = vsub.f32 %v6393_v19, %v6551_v29  ;;  %v2073_v11 = vsub.f32 %v6417_v63, %v6551_v29  ;;  %v7525_v63 = vld [vmem:[#allocation8_spill] sm:$0xff]  ;;  %v2075_v38 = vsub.f32 %v6434_v7, %v6551_v29 }
 0x860   :  { %v6568_v51 = vmul.f32 %v2067_v27, %v5808_v15  ;;  %v6571_v37 = vmul.f32 %v2068_v39, %v7522_v2  ;;  %v6574_v17 = vmul.f32 %v2069_v30, %v5810_v45  ;;  %v6577_v25 = vmul.f32 %v2070_v33, %v5845_v16  ;;  %v7524_v15 = vld [vmem:[#allocation15_spill] sm:$0xff] }
 0x861   :  { %v6584_v19 = vmul.f32 %v2071_v10, %v7523_v31  ;;  %v6587_v46 = vmul.f32 %v2072_v0, %v7524_v15  ;;  %v2074_v45 = vsub.f32 %v6410_v34, %v6551_v29  ;;  %v6603_v42 = vmul.f32 %v2073_v11, %v7525_v63  ;;  %v7526_v34 = vld [vmem:[#allocation19_spill] sm:$0xff] }
 0x862   :  { %v2099_v23 = vmul.f32 %v6568_v51, %v6568_v51  ;;  %v2100_v9 = vmul.f32 %v6571_v37, %v6571_v37  ;;  %v2101_v4 = vmul.f32 %v6574_v17, %v6574_v17  ;;  %v2102_v26 = vmul.f32 %v6577_v25, %v6577_v25 }
 0x863   :  { %v2103_v43 = vmul.f32 %v6584_v19, %v6584_v19  ;;  %v2104_v18 = vmul.f32 %v6587_v46, %v6587_v46  ;;  %v6606_v53 = vmul.f32 %v2074_v45, %v7526_v34  ;;  %v2076_v28 = vsub.f32 %v6427_v41, %v6551_v29 }
 0x864   :  { %v4923_v16 = vpack.c.bf16 %v2100_v9, %v2099_v23  ;;  %v4926_v47 = vpack.c.bf16 %v2102_v26, %v2101_v4  ;;  %v2105_v32 = vmul.f32 %v6603_v42, %v6603_v42  ;;  %v6618_v61 = vmul.f32 %v2075_v38, %v7527_v62  ;;  %v7531_v9 = vld [vmem:[#allocation24_spill] sm:$0xff]  ;;  %v7535_v26 = vld [vmem:[#allocation29_spill] sm:$0xff] }
 0x865   :  { %v4929_v12 = vpack.c.bf16 %v2104_v18, %v2103_v43  ;;  %v2106_v60 = vmul.f32 %v6606_v53, %v6606_v53  ;;  %v6621_v27 = vmul.f32 %v2076_v28, %v7528_v3  ;;  %v2077_v7 = vsub.f32 %v6451_v20, %v6551_v29  ;;  %v7529_v20 = vld [vmem:[#allocation18_spill] sm:$0xff]  ;;  %v7537_v18 = vld [vmem:[#allocation33_spill] sm:$0xff] }
 0x866   :  { %4924 = vmatpush3.bf16.msra.mxu0 %v4923_v16  ;;  %v2078_v41 = vsub.f32 %v6444_v48, %v6551_v29  ;;  %v2079_v30 = vsub.f32 %v6468_v8, %v6551_v29  ;;  %v2080_v33 = vsub.f32 %v6461_v55, %v6551_v29  ;;  %v2107_v10 = vmul.f32 %v6618_v61, %v6618_v61  ;;  %v7530_v48 = vld [vmem:[#allocation26_spill] sm:$0xff] }
 0x867   :  { %4925 = vmatprep.subr.bf16.mxu0 %v7494_v14  ;;  %v4932_v39 = vpack.c.bf16 %v2106_v60, %v2105_v32  ;;  %v2108_v0 = vmul.f32 %v6621_v27, %v6621_v27  ;;  %v6637_v2 = vmul.f32 %v2077_v7, %v7529_v20  ;;  %v2081_v55 = vsub.f32 %v6483_v56, %v6551_v29  ;;  %v7533_v16 = vld [vmem:[#allocation30_spill] sm:$0xff]  ;;  %v1877_v32 = vld [vmem:[%s7386_s16] sm:$0x1] }
 0x868   :  { %v6640_v23 = vmul.f32 %v2078_v41, %v7530_v48  ;;  %v6644_v8 = vmul.f32 %v2079_v30, %v7531_v9  ;;  %v2082_v31 = vsub.f32 %v6477_v40, %v6551_v29  ;;  %v6655_v4 = vmul.f32 %v2080_v33, %v7533_v16  ;;  %v7541_v30 = vld [vmem:[#allocation10_spill] sm:$0xff]  ;;  %v7542_v33 = vld [vmem:[#allocation37_spill] sm:$0xff] }
 0x869   :  { %v4935_v15 = vpack.c.bf16 %v2108_v0, %v2107_v10  ;;  %v2109_v11 = vmul.f32 %v6637_v2, %v6637_v2  ;;  %v6659_v43 = vmul.f32 %v2081_v55, %v7535_v26  ;;  %v754_v10 = vmul.f32 %v7542_v33, %v7541_v30  ;;  %v1968_v0 = vld [vmem:[%s7389_s19] sm:$0xff]  ;;  %v1969_v20 = vld [vmem:[%s7389_s19 + $0x8] sm:$0xff]  ;;  %v1970_v48 = vld [vmem:[%s7389_s19 + $0x10] sm:$0xff] }
 0x86a   :  { %4927 = vmatpush3.bf16.msra.mxu0 %v4926_v47  ;;  %7532 = vst [vmem:[#allocation5_spill] sm:$0xff] %v6644_v8  ;;  %v2110_v45 = vmul.f32 %v6640_v23, %v6640_v23  ;;  %7534 = vst [vmem:[#allocation9_spill] sm:$0xff] %v6655_v4  ;;  %v2111_v40 = vmul.f32 %v6644_v8, %v6644_v8  ;;  %v2112_v29 = vmul.f32 %v6655_v4, %v6655_v4  ;;  %v1971_v55 = vld [vmem:[%s7389_s19 + $0x18] sm:$0xff] }
 0x86b   :  { %4928 = vmatprep.subr.bf16.mxu0 %v7494_v14  ;;  %7536 = vst [vmem:[#allocation6_spill] sm:$0xff] %v6659_v43  ;;  %v6666_v63 = vmul.f32 %v2082_v31, %v7537_v18  ;;  %v2113_v47 = vmul.f32 %v6659_v43, %v6659_v43  ;;  %v4899_v9 = vpack.c.bf16 %v1969_v20, %v1968_v0  ;;  %v7547_v0 = vld [vmem:[#allocation17_spill] sm:$0xff] }
 0x86c   :  { %v4938_v56 = vpack.c.bf16 %v2110_v45, %v2109_v11  ;;  %v4941_v34 = vpack.c.bf16 %v2112_v29, %v2111_v40  ;;  %v4902_v31 = vpack.c.bf16 %v1971_v55, %v1970_v48  ;;  %v1973_v11 = vld [vmem:[%s7389_s19 + $0x28] sm:$0xff]  ;;  %v1976_v48 = vld [vmem:[%s7389_s19 + $0x40] sm:$0xff] }
 0x86d   :  { %7538 = vst [vmem:[#allocation15_spill] sm:$0xff] %v6666_v63  ;;  %v2114_v38 = vmul.f32 %v6666_v63, %v6666_v63  ;;  %4900 = vmatpush3.bf16.msra.mxu1 %v4899_v9  ;;  %v1977_v9 = vld [vmem:[%s7389_s19 + $0x48] sm:$0xff] }
 0x86e   :  { %4930 = vmatpush3.bf16.msra.mxu0 %v4929_v12  ;;  %v7539_v12 = vmov 1.0   ;;  %4901 = vmatprep.subr.bf16.mxu1 %v7494_v14  ;;  %v4911_v55 = vpack.c.bf16 %v1977_v9, %v1976_v48 }
 0x86f   :  { %4931 = vmatprep.subr.bf16.mxu0 %v7494_v14  ;;  %v4944_v28 = vpack.c.bf16 %v2114_v38, %v2113_v47 }
 0x871   :  { %4903 = vmatpush3.bf16.msra.mxu1 %v4902_v31  ;;  %v1978_v31 = vld [vmem:[%s7389_s19 + $0x50] sm:$0xff] }
 0x872   :  { %4933 = vmatpush3.bf16.msra.mxu0 %v4932_v39  ;;  %v7540_v39 = vld [vmem:[#allocation7_spill] sm:$0xff]  ;;  %4904 = vmatprep.subr.bf16.mxu1 %v7494_v14 }
 0x873   :  { %4934 = vmatprep.subr.bf16.mxu0 %v7494_v14  ;;  %v753_v20 = vmul.f32 %v7542_v33, %v7540_v39 }
 0x876   :  { %4936 = vmatpush3.bf16.msra.mxu0 %v4935_v15  ;;  %v1972_v15 = vld [vmem:[%s7389_s19 + $0x20] sm:$0xff] }
 0x877   :  { %4937 = vmatprep.subr.bf16.mxu0 %v7494_v14  ;;  %v4905_v45 = vpack.c.bf16 %v1973_v11, %v1972_v15  ;;  %v7548_v11 = vld [vmem:[#allocation20_spill] sm:$0xff] }
 0x879   :  { %4906 = vmatpush3.bf16.msra.mxu1 %v4905_v45 }
 0x87a   :  { %4939 = vmatpush3.bf16.msra.mxu0 %v4938_v56  ;;  %4907 = vmatprep.subr.bf16.mxu1 %v7494_v14  ;;  %v6722_v56 = vld [vmem:[%s7384_s14] sm:$0x1] }
 0x87b   :  { %4940 = vmatprep.subr.bf16.mxu0 %v7494_v14 }
 0x87e   :  { %4942 = vmatpush3.bf16.msra.mxu0 %v4941_v34 }
 0x87f   :  { %4943 = vmatprep.subr.bf16.mxu0 %v7494_v14 }
 0x882   :  { %4945 = vmatpush3.bf16.msra.mxu0 %v4944_v28 }
 0x885   :  { %4312 = vmatmul.mubr.f32.vlgmr.msra.gmra.mrb[38].mxu0 %v7539_v12 }
 0x92f   :  { %v1944_v60 = vpop.f32.mrb[36].mxu0 }
 0x930   :  { %v1945_v62 = vadd.f32 %v1944_v60, %v1877_v32  ;;  %v4243_v3 = vpop.f32.mrb[37].mxu0  ;;  %v7543_v60 = vld [vmem:[#allocation11_spill] sm:$0xff] }
 0x931   :  { %v7545_v3 = vld [vmem:[#allocation14_spill] sm:$0xff]  ;;  %v755_v45 = vmul.f32 %v7542_v33, %v7543_v60 }
 0x932   :  { %v1948_v7 = vmax.f32 %v1945_v62, 0.0  ;;  %v7544_v62 = vld [vmem:[#allocation12_spill] sm:$0xff] }
 0x934   :  { %v1949_v41 = vsel %vm397_vm1, %v1948_v7, 0.0 }
 0x935   :  { %1950 = vadd.xlane.f32.xlu0 %v1949_v41  ;;  %v1974_v41 = vld [vmem:[%s7389_s19 + $0x30] sm:$0xff] }
 0x939   :  { %717 = vadd.xlane.f32.xlu0 %v7540_v39  ;;  %v1979_v39 = vld [vmem:[%s7389_s19 + $0x58] sm:$0xff] }
 0x93a   :  { %v4914_v15 = vpack.c.bf16 %v1979_v39, %v1978_v31 }
 0x93d   :  { %719 = vadd.xlane.f32.xlu0 %v7541_v30  ;;  %v1975_v30 = vld [vmem:[%s7389_s19 + $0x38] sm:$0xff] }
 0x941   :  { %2190 = vadd.xlane.f32.xlu0 %v6571_v37 }
 0x945   :  { %2192 = vadd.xlane.f32.xlu0 %v6574_v17 }
 0x949   :  { %2194 = vadd.xlane.f32.xlu0 %v6577_v25 }
 0x94d   :  { %2196 = vadd.xlane.f32.xlu0 %v6584_v19 }
 0x951   :  { %2198 = vadd.xlane.f32.xlu0 %v6587_v46 }
 0x955   :  { %2200 = vadd.xlane.f32.xlu0 %v6603_v42 }
 0x959   :  { %771 = vadd.xlane.f32.xlu0 %v754_v10  ;;  %v4908_v10 = vpack.c.bf16 %v1975_v30, %v1974_v41  ;;  %v7551_v41 = vld [vmem:[#allocation25_spill] sm:$0xff] }
 0x95b   :  { %4909 = vmatpush3.bf16.msra.mxu1 %v4908_v10  ;;  %v759_v10 = vmul.f32 %v7542_v33, %v7547_v0 }
 0x95c   :  { %4910 = vmatprep.subr.bf16.mxu1 %v7494_v14 }
 0x95d   :  { %2202 = vadd.xlane.f32.xlu0 %v6606_v53 }
 0x95f   :  { %4912 = vmatpush3.bf16.msra.mxu1 %v4911_v55 }
 0x960   :  { %4913 = vmatprep.subr.bf16.mxu1 %v7494_v14 }
 0x961   :  { %2204 = vadd.xlane.f32.xlu0 %v6618_v61 }
 0x963   :  { %4915 = vmatpush3.bf16.msra.mxu1 %v4914_v15 }
 0x964   :  { %4916 = vmatprep.subr.bf16.mxu1 %v7494_v14 }
 0x965   :  { %2206 = vadd.xlane.f32.xlu0 %v6621_v27 }
 0x969   :  { %2208 = vadd.xlane.f32.xlu0 %v6637_v2 }
 0x96d   :  { %2210 = vadd.xlane.f32.xlu0 %v6640_v23 }
 0x971   :  { %2212 = vadd.xlane.f32.xlu0 %v6644_v8 }
 0x975   :  { %2214 = vadd.xlane.f32.xlu0 %v6655_v4 }
 0x979   :  { %2216 = vadd.xlane.f32.xlu0 %v6659_v43 }
 0x97d   :  { %2218 = vadd.xlane.f32.xlu0 %v6666_v63 }
 0x9c2   :  { %v1951_v16 = vpop.xlane.xlu0 %1950 }
 0x9c3   :  { %v1953_v26 = vmul.f32 0.03125, %v1951_v16  ;;  %v1980_v16 = vld [vmem:[%s7389_s19 + $0x60] sm:$0xff] }
 0x9c5   :  { %v1954_v40 = vsub.f32 %v1948_v7, %v1953_v26  ;;  %v7546_v7 = vld [vmem:[#allocation16_spill] sm:$0xff]  ;;  %v1981_v26 = vld [vmem:[%s7389_s19 + $0x68] sm:$0xff] }
 0x9c6   :  { %v718_v29 = vpop.xlane.xlu0 %717  ;;  %v758_v30 = vmul.f32 %v7542_v33, %v7546_v7 }
 0x9c7   :  { %v6725_v18 = vmul.f32 %v1954_v40, %v6722_v56  ;;  %v801_v38 = vmul.f32 %v718_v29, %v718_v29  ;;  %v4917_v40 = vpack.c.bf16 %v1981_v26, %v1980_v16  ;;  %v1982_v29 = vld [vmem:[%s7389_s19 + $0x70] sm:$0xff] }
 0x9c9   :  { %v1956_v34 = vmul.f32 %v6725_v18, %v6725_v18  ;;  %4918 = vmatpush3.bf16.msra.mxu1 %v4917_v40 }
 0x9ca   :  { %v720_v47 = vpop.xlane.xlu0 %719  ;;  %4919 = vmatprep.subr.bf16.mxu1 %v7494_v14  ;;  %v7552_v14 = vld [vmem:[#allocation27_spill] sm:$0xff] }
 0x9cb   :  { %v802_v28 = vmul.f32 %v720_v47, %v720_v47  ;;  %v1957_v12 = vsel %vm397_vm1, %v1956_v34, 0.0  ;;  %v1983_v34 = vld [vmem:[%s7389_s19 + $0x78] sm:$0xff] }
 0x9cc   :  { %1958 = vadd.xlane.f32.xlu1 %v1957_v12  ;;  %v4920_v47 = vpack.c.bf16 %v1983_v34, %v1982_v29  ;;  %v7550_v12 = vld [vmem:[#allocation23_spill] sm:$0xff] }
 0x9cd   :  { %v6730_v32 = vadd.f32 %v802_v28, %v801_v38  ;;  %v7549_v38 = vld [vmem:[#allocation21_spill] sm:$0xff]  ;;  %v756_v28 = vmul.f32 %v7542_v33, %v7544_v62  ;;  %v762_v9 = vmul.f32 %v7542_v33, %v7550_v12 }
 0x9ce   :  { %4921 = vmatpush3.bf16.msra.mxu1 %v4920_v47  ;;  %v761_v48 = vmul.f32 %v7542_v33, %v7549_v38 }
 0x9d0   :  { %2188 = vadd.xlane.f32.xlu1 %v6568_v51 }
 0x9d4   :  { %721 = vadd.xlane.f32.xlu1 %v7543_v60  ;;  %v757_v60 = vmul.f32 %v7542_v33, %v7545_v3 }
 0x9d8   :  { %723 = vadd.xlane.f32.xlu1 %v7544_v62  ;;  %v7553_v62 = vld [vmem:[#allocation28_spill] sm:$0xff] }
 0x9dc   :  { %725 = vadd.xlane.f32.xlu1 %v7545_v3  ;;  %v7554_v3 = vld [vmem:[#allocation31_spill] sm:$0xff] }
 0x9e0   :  { %727 = vadd.xlane.f32.xlu1 %v7546_v7  ;;  %v7555_v7 = vld [vmem:[#allocation32_spill] sm:$0xff] }
 0x9e4   :  { %729 = vadd.xlane.f32.xlu1 %v7547_v0  ;;  %v2191_v0 = vpop.xlane.xlu0 %2190 }
 0x9e5   :  { %v2273_v29 = vmul.f32 %v2191_v0, %v2191_v0 }
 0x9e8   :  { %769 = vadd.xlane.f32.xlu1 %v753_v20  ;;  %v760_v20 = vmul.f32 %v7542_v33, %v7548_v11  ;;  %v2193_v55 = vpop.xlane.xlu0 %2192 }
 0x9e9   :  { %v2274_v47 = vmul.f32 %v2193_v55, %v2193_v55  ;;  %v1964_v55 = vld [vmem:[%s7387_s17] sm:$0x1] }
 0x9ec   :  { %731 = vadd.xlane.f32.xlu1 %v7548_v11  ;;  %v2195_v31 = vpop.xlane.xlu0 %2194 }
 0x9f0   :  { %773 = vadd.xlane.f32.xlu1 %v755_v45  ;;  %v2197_v39 = vpop.xlane.xlu0 %2196 }
 0x9f4   :  { %733 = vadd.xlane.f32.xlu1 %v7549_v38  ;;  %v2199_v15 = vpop.xlane.xlu0 %2198 }
 0x9f5   :  { %v2277_v43 = vmul.f32 %v2199_v15, %v2199_v15 }
 0x9f8   :  { %775 = vadd.xlane.f32.xlu1 %v756_v28  ;;  %v2201_v16 = vpop.xlane.xlu0 %2200 }
 0x9f9   :  { %v2278_v0 = vmul.f32 %v2201_v16, %v2201_v16 }
 0x9fc   :  { %735 = vadd.xlane.f32.xlu1 %v7550_v12  ;;  %v772_v28 = vpop.xlane.xlu0 %771 }
 0xa00   :  { %777 = vadd.xlane.f32.xlu1 %v757_v60 }
 0xa04   :  { %737 = vadd.xlane.f32.xlu1 %v7551_v41 }
 0xa08   :  { %779 = vadd.xlane.f32.xlu1 %v758_v30  ;;  %v2275_v30 = vmul.f32 %v2195_v31, %v2195_v31 }
 0xa0c   :  { %739 = vadd.xlane.f32.xlu1 %v7552_v14 }
 0xa10   :  { %781 = vadd.xlane.f32.xlu1 %v759_v10 }
 0xa14   :  { %741 = vadd.xlane.f32.xlu1 %v7553_v62 }
 0xa18   :  { %783 = vadd.xlane.f32.xlu1 %v760_v20  ;;  %v2276_v20 = vmul.f32 %v2197_v39, %v2197_v39 }
 0xa1c   :  { %743 = vadd.xlane.f32.xlu1 %v7554_v3 }
 0xa20   :  { %785 = vadd.xlane.f32.xlu1 %v761_v48 }
 0xa24   :  { %745 = vadd.xlane.f32.xlu1 %v7555_v7 }
 0xa28   :  { %787 = vadd.xlane.f32.xlu1 %v762_v9 }
 0xa59   :  { %v1959_v45 = vpop.xlane.xlu1 %1958 }
 0xa5a   :  { %v1960_v11 = vmul.f32 0.03125, %v1959_v45 }
 0xa5c   :  { %v1961_v26 = vadd.f32 1e-05, %v1960_v11  ;;  %v2203_v11 = vpop.xlane.xlu0 %2202 }
 0xa5d   :  { %v2189_v40 = vpop.xlane.xlu1 %2188  ;;  %v2279_v39 = vmul.f32 %v2203_v11, %v2203_v11 }
 0xa5e   :  { %5184 = vrsqrt.f32 %v1961_v26  ;;  %v2272_v34 = vmul.f32 %v2189_v40, %v2189_v40 }
 0xa60   :  { %v2288_v38 = vadd.f32 %v2273_v29, %v2272_v34 }
 0xa61   :  { %v722_v60 = vpop.xlane.xlu1 %721 }
 0xa62   :  { %v2289_v12 = vadd.f32 %v2288_v38, %v2274_v47  ;;  %v803_v10 = vmul.f32 %v722_v60, %v722_v60 }
 0xa64   :  { %v2290_v48 = vadd.f32 %v2289_v12, %v2275_v30  ;;  %v818_v9 = vadd.f32 %v6730_v32, %v803_v10  ;;  %v1966_v32 = vld [vmem:[%s7388_s18] sm:$0x1] }
 0xa65   :  { %v724_v63 = vpop.xlane.xlu1 %723 }
 0xa66   :  { %v2291_v45 = vadd.f32 %v2290_v48, %v2276_v20  ;;  %v804_v4 = vmul.f32 %v724_v63, %v724_v63  ;;  %v839_v20 = vmul.f32 %v772_v28, %v772_v28 }
 0xa68   :  { %v5185_v8 = vpop.eup %5184  ;;  %v2292_v26 = vadd.f32 %v2291_v45, %v2277_v43  ;;  %v819_v40 = vadd.f32 %v818_v9, %v804_v4 }
 0xa69   :  { %v1963_v31 = vmul.f32 %v5185_v8, %v6725_v18  ;;  %v726_v29 = vpop.xlane.xlu1 %725  ;;  %v6811_v8 = vld [vmem:[%s7515_s4] sm:$0xff] }
 0xa6a   :  { %v2293_v34 = vadd.f32 %v2292_v26, %v2278_v0  ;;  %v805_v47 = vmul.f32 %v726_v29, %v726_v29  ;;  %v6818_v26 = vpop.f32.mrb[38].mxu0 }
 0xa6b   :  { %v1965_v63 = vmul.f32 %v1964_v55, %v1963_v31  ;;  %v1984_v55 = vld [vmem:[%s7390_s20] sm:$0x1] }
 0xa6c   :  { %v6806_v15 = vadd.f32 %v2293_v34, %v2279_v39  ;;  %v820_v16 = vadd.f32 %v819_v40, %v805_v47  ;;  %v4313_v40 = vpop.f32.mrb[39].mxu0 }
 0xa6d   :  { %v728_v43 = vpop.xlane.xlu1 %727  ;;  %v1967_v4 = vadd.f32 %v1966_v32, %v1965_v63 }
 0xa6e   :  { %v806_v38 = vmul.f32 %v728_v43, %v728_v43 }
 0xa6f   :  { %4277 = vmatmul.mubr.f32.vlgmr.msra.gmra.mrb[22].mxu1 %v1967_v4 }
 0xa70   :  { %v821_v60 = vadd.f32 %v820_v16, %v806_v38  ;;  %4346 = vmatprep.mubr.f32.mxu1 %v6811_v8 }
 0xa71   :  { %v730_v18 = vpop.xlane.xlu1 %729 }
 0xa72   :  { %v807_v30 = vmul.f32 %v730_v18, %v730_v18 }
 0xa74   :  { %v822_v12 = vadd.f32 %v821_v60, %v807_v30 }
 0xa75   :  { %v770_v10 = vpop.xlane.xlu1 %769 }
 0xa76   :  { %v838_v48 = vmul.f32 %v770_v10, %v770_v10 }
 0xa78   :  { %v6814_v9 = vadd.f32 %v839_v20, %v838_v48 }
 0xa79   :  { %v732_v45 = vpop.xlane.xlu1 %731 }
 0xa7a   :  { %v808_v11 = vmul.f32 %v732_v45, %v732_v45 }
 0xa7c   :  { %v6816_v0 = vadd.f32 %v822_v12, %v808_v11 }
 0xb42   :  { %v2051_v31 = vpop.f32.mrb[22].mxu1 }
 0xb43   :  { %v2052_v29 = vadd.f32 %v2051_v31, %v1984_v55  ;;  %v4278_v39 = vpop.f32.mrb[23].mxu1 }
 0xb45   :  { %v2055_v34 = vsub.f32 0.0, %v2052_v29 }
 0xb47   :  { %v2056_v47 = vmul.f32 1.442695, %v2055_v34  ;;  %v7561_v34 = vld [vmem:[#allocation36_spill] sm:$0xff] }
 0xb49   :  { %5186 = vpow2.f32 %v2056_v47  ;;  %v880_v47 = vmul.f32 %v7561_v34, %v7561_v34  ;;  %v3268_v34 = vld [vmem:[%s7391_s21 + $0x98] sm:$0xff] }
 0xb53   :  { %v5187_v28 = vpop.eup %5186 }
 0xb54   :  { %v2058_v32 = vadd.f32 1.0, %v5187_v28  ;;  %v881_v28 = vsel %vm397_vm1, %v880_v47, 0.0 }
 0xb56   :  { %5188 = vrcp.f32 %v2058_v32  ;;  %v6970_v32 = vld [vmem:[%s7515_s4 + $0x18] sm:$0xff] }
 0xb60   :  { %v5189_v63 = vpop.eup %5188 }
 0xb61   :  { %v2060_v16 = vmul.f32 2.0, %v5189_v63  ;;  %v6978_v63 = vld [vmem:[%s7515_s4 + $0x20] sm:$0xff] }
 0xb63   :  { %v2061_v43 = vadd.f32 0.25, %v2060_v16  ;;  %v7562_v16 = vld [vmem:[#allocation38_spill] sm:$0xff] }
 0xb65   :  { %v6824_v4 = vmul.f32 %v2061_v43, %v6722_v56  ;;  %v877_v43 = vsel %vm397_vm1, %v7562_v16, 0.0 }
 0xb67   :  { %v6828_v38 = vrot.slane %v6824_v4, %v5812_v52  ;;  %v2346_v60 = vmul.f32 %v6818_v26, %v6824_v4 }
 0xb69   :  { %v2225_v18 = vmul.f32 %v6828_v38, %v6571_v37  ;;  %v2224_v30 = vmul.f32 %v6828_v38, %v6568_v51  ;;  %v6838_v12 = vmul.f32 %v6828_v38, %v6362_v36  ;;  %v6842_v56 = vmul.f32 %v6828_v38, %v6355_v13  ;;  %v7556_v37 = vld [vmem:[#allocation34_spill] sm:$0xff] }
 0xb6a   :  { %v6846_v52 = vmul.f32 %v6828_v38, %v6378_v57  ;;  %v6850_v10 = vmul.f32 %v6828_v38, %v6369_v50  ;;  %v2226_v13 = vmul.f32 %v6828_v38, %v6574_v17  ;;  %v6860_v57 = vmul.f32 %v6828_v38, %v6395_v54 }
 0xb6b   :  { %2242 = vadd.xlane.f32.xlu0 %v2225_v18  ;;  %2240 = vadd.xlane.f32.xlu1 %v2224_v30  ;;  %v4946_v51 = vpack.c.bf16 %v6842_v56, %v6838_v12  ;;  %v6864_v50 = vmul.f32 %v6828_v38, %v6386_v1  ;;  %v2227_v48 = vmul.f32 %v6828_v38, %v6577_v25  ;;  %v6994_v30 = vld [vmem:[%s7515_s4 + $0x30] sm:$0xff] }
 0xb6c   :  { %v4950_v36 = vpack.c.bf16 %v6850_v10, %v6846_v52  ;;  %v6873_v17 = vmul.f32 %v6828_v38, %v6412_v49  ;;  %v6877_v54 = vmul.f32 %v6828_v38, %v6403_v22  ;;  %v763_v1 = vmul.f32 %v7542_v33, %v7551_v41 }
 0xb6d   :  { %4947 = vmatprep.subr.bf16.mxu1 %v4946_v51  ;;  %v4954_v20 = vpack.c.bf16 %v6864_v50, %v6860_v57  ;;  %v6882_v45 = vmul.f32 %v2346_v60, %v6824_v4  ;;  %v2228_v49 = vmul.f32 %v6828_v38, %v6584_v19  ;;  %v6890_v22 = vmul.f32 %v6828_v38, %v6429_v44  ;;  %v6986_v60 = vld [vmem:[%s7515_s4 + $0x28] sm:$0xff] }
 0xb6e   :  { %4949 = vmatpush3.bf16.msra.mxu1 %v4946_v51  ;;  %v4958_v25 = vpack.c.bf16 %v6877_v54, %v6873_v17  ;;  %v6894_v11 = vmul.f32 %v6828_v38, %v6420_v59  ;;  %v764_v41 = vmul.f32 %v7542_v33, %v7552_v14  ;;  %v2229_v19 = vmul.f32 %v6828_v38, %v6587_v46  ;;  %v7000_v51 = vld [vmem:[%s7515_s4 + $0x38] sm:$0xff] }
 0xb6f   :  { %4951 = vmatprep.subr.bf16.mxu1 %v4950_v36  ;;  %2244 = vadd.xlane.f32.xlu0 %v2226_v13  ;;  %v6904_v44 = vmul.f32 %v6828_v38, %v6446_v21  ;;  %v6908_v59 = vmul.f32 %v6828_v38, %v6437_v6  ;;  %v765_v14 = vmul.f32 %v7542_v33, %v7553_v62 }
 0xb70   :  { %747 = vadd.xlane.f32.xlu1 %v7556_v37  ;;  %v4962_v40 = vpack.c.bf16 %v6894_v11, %v6890_v22  ;;  %v2230_v46 = vmul.f32 %v6828_v38, %v6603_v42  ;;  %v6918_v21 = vmul.f32 %v6828_v38, %v6463_v58  ;;  %v6922_v6 = vmul.f32 %v6828_v38, %v6454_v24 }
 0xb71   :  { %v4966_v55 = vpack.c.bf16 %v6908_v59, %v6904_v44  ;;  %v766_v62 = vmul.f32 %v7542_v33, %v7554_v3  ;;  %v2231_v42 = vmul.f32 %v6828_v38, %v6606_v53  ;;  %v6932_v58 = vmul.f32 %v6828_v38, %v6479_v5 }
 0xb72   :  { %4953 = vmatpush3.bf16.msra.mxu1 %v4950_v36  ;;  %7557 = vst [vmem:[#allocation8_spill] sm:$0xff] %v6922_v6  ;;  %v4970_v31 = vpack.c.bf16 %v6922_v6, %v6918_v21  ;;  %v6936_v24 = vmul.f32 %v6828_v38, %v6471_v35  ;;  %v767_v3 = vmul.f32 %v7542_v33, %v7555_v7  ;;  %v7560_v7 = vld [vmem:[#allocation35_spill] sm:$0xff]  ;;  %v7564_v36 = vld [vmem:[#allocation9_spill] sm:$0xff] }
 0xb73   :  { %4955 = vmatprep.subr.bf16.mxu1 %v4954_v20  ;;  %2246 = vadd.xlane.f32.xlu0 %v2227_v48  ;;  %7558 = vst [vmem:[#allocation19_spill] sm:$0xff] %v6932_v58  ;;  %v2232_v53 = vmul.f32 %v6828_v38, %v6618_v61  ;;  %v768_v5 = vmul.f32 %v7542_v33, %v7556_v37  ;;  %v714_v39 = vsel %vm397_vm1, %v7560_v7, 0.0  ;;  %v6955_v61 = vld [vmem:[%s7515_s4 + $0x8] sm:$0xff]  ;;  %v7008_v37 = vld [vmem:[%s7515_s4 + $0x40] sm:$0xff] }
 0xb74   :  { %789 = vadd.xlane.f32.xlu1 %v763_v1  ;;  %7559 = vst [vmem:[#allocation13_spill] sm:$0xff] %v6936_v24  ;;  %v4974_v29 = vpack.c.bf16 %v6936_v24, %v6932_v58  ;;  %v2233_v35 = vmul.f32 %v6828_v38, %v6621_v27  ;;  %v2234_v33 = vmul.f32 %v6828_v38, %v6637_v2  ;;  %v6963_v27 = vld [vmem:[%s7515_s4 + $0x10] sm:$0xff]  ;;  %v3265_v7 = vld [vmem:[%s7391_s21 + $0x80] sm:$0xff] }
 0xb75   :  { %v2235_v2 = vmul.f32 %v6828_v38, %v6640_v23  ;;  %v7563_v23 = vld [vmem:[#allocation5_spill] sm:$0xff]  ;;  %v2237_v13 = vmul.f32 %v6828_v38, %v7564_v36  ;;  %v7565_v48 = vld [vmem:[#allocation6_spill] sm:$0xff] }
 0xb76   :  { %4957 = vmatpush3.bf16.msra.mxu1 %v4954_v20  ;;  %v2236_v18 = vmul.f32 %v6828_v38, %v7563_v23  ;;  %v7014_v20 = vld [vmem:[%s7515_s4 + $0x48] sm:$0xff]  ;;  %v2238_v1 = vmul.f32 %v6828_v38, %v7565_v48  ;;  %v3271_v23 = vld [vmem:[%s7391_s21 + $0xb0] sm:$0xff] }
 0xb77   :  { %4959 = vmatprep.subr.bf16.mxu1 %v4958_v25  ;;  %2248 = vadd.xlane.f32.xlu0 %v2228_v49  ;;  %v7025_v49 = vpop.xlane.xlu1 %773 }
 0xb78   :  { %791 = vadd.xlane.f32.xlu1 %v764_v41  ;;  %v7030_v41 = vld [vmem:[%s7515_s4 + $0x58] sm:$0xff] }
 0xb7a   :  { %4961 = vmatpush3.bf16.msra.mxu1 %v4958_v25  ;;  %v7022_v25 = vld [vmem:[%s7515_s4 + $0x50] sm:$0xff] }
 0xb7b   :  { %4963 = vmatprep.subr.bf16.mxu1 %v4962_v40  ;;  %2250 = vadd.xlane.f32.xlu0 %v2229_v19 }
 0xb7c   :  { %793 = vadd.xlane.f32.xlu1 %v765_v14  ;;  %v7038_v14 = vld [vmem:[%s7515_s4 + $0x60] sm:$0xff] }
 0xb7d   :  { %7567 = vst [vmem:[#allocation22_spill] sm:$0xff] %v7038_v14 }
 0xb7e   :  { %4965 = vmatpush3.bf16.msra.mxu1 %v4962_v40  ;;  %v7566_v40 = vld [vmem:[#allocation15_spill] sm:$0xff] }
 0xb7f   :  { %4967 = vmatprep.subr.bf16.mxu1 %v4966_v55  ;;  %2252 = vadd.xlane.f32.xlu0 %v2230_v46  ;;  %v2239_v19 = vmul.f32 %v6828_v38, %v7566_v40  ;;  %v7046_v46 = vld [vmem:[%s7515_s4 + $0x68] sm:$0xff]  ;;  %v7054_v38 = vld [vmem:[%s7515_s4 + $0x70] sm:$0xff] }
 0xb80   :  { %795 = vadd.xlane.f32.xlu1 %v766_v62  ;;  %7568 = vst [vmem:[#allocation18_spill] sm:$0xff] %v7046_v46  ;;  %v7049_v62 = vpop.xlane.xlu1 %733  ;;  %7569 = vst [vmem:[#allocation26_spill] sm:$0xff] %v7054_v38  ;;  %v3274_v40 = vld [vmem:[%s7391_s21 + $0xc8] sm:$0xff] }
 0xb82   :  { %4969 = vmatpush3.bf16.msra.mxu1 %v4966_v55  ;;  %v2185_v55 = vsel %vm397_vm1, %v6818_v26, 0.0  ;;  %v7062_v26 = vld [vmem:[%s7515_s4 + $0x78] sm:$0xff] }
 0xb83   :  { %4971 = vmatprep.subr.bf16.mxu1 %v4970_v31  ;;  %2254 = vadd.xlane.f32.xlu0 %v2231_v42  ;;  %7570 = vst [vmem:[#allocation24_spill] sm:$0xff] %v7062_v26 }
 0xb84   :  { %797 = vadd.xlane.f32.xlu1 %v767_v3  ;;  %v7067_v3 = vpop.xlane.xlu1 %775 }
 0xb86   :  { %4973 = vmatpush3.bf16.msra.mxu1 %v4970_v31  ;;  %v2351_v31 = vmul.f32 %v6824_v4, %v6824_v4 }
 0xb87   :  { %4975 = vmatprep.subr.bf16.mxu1 %v4974_v29  ;;  %2256 = vadd.xlane.f32.xlu0 %v2232_v53 }
 0xb88   :  { %799 = vadd.xlane.f32.xlu1 %v768_v5  ;;  %v2352_v42 = vsel %vm397_vm1, %v2351_v31, 0.0  ;;  %v736_v4 = vpop.xlane.xlu1 %735  ;;  %v3276_v31 = vld [vmem:[%s7391_s21 + $0xd8] sm:$0xff] }
 0xb8a   :  { %4977 = vmatpush3.bf16.msra.mxu1 %v4974_v29  ;;  %v2348_v29 = vsel %vm397_vm1, %v6882_v45, 0.0  ;;  %v3267_v45 = vld [vmem:[%s7391_s21 + $0x90] sm:$0xff] }
 0xb8b   :  { %2258 = vadd.xlane.f32.xlu0 %v2233_v35  ;;  %v4982_v47 = vpack.c.bf16 %v3268_v34, %v3267_v45  ;;  %v3278_v45 = vld [vmem:[%s7391_s21 + $0xe8] sm:$0xff] }
 0xb8c   :  { %715 = vadd.xlane.f32.xlu1 %v714_v39  ;;  %v7071_v53 = vpop.xlane.xlu1 %777 }
 0xb8d   :  { %4347 = vmatmul.mubr.f32.vlgmr.msra.gmra.mrb[24].mxu1 %v6955_v61 }
 0xb8e   :  { %4349 = vmatprep.mubr.f32.mxu1 %v6963_v27 }
 0xb8f   :  { %2260 = vadd.xlane.f32.xlu0 %v2234_v33  ;;  %v3269_v33 = vld [vmem:[%s7391_s21 + $0xa0] sm:$0xff] }
 0xb90   :  { %882 = vadd.xlane.f32.xlu1 %v881_v28  ;;  %v7073_v5 = vpop.xlane.xlu1 %737  ;;  %v3270_v28 = vld [vmem:[%s7391_s21 + $0xa8] sm:$0xff] }
 0xb91   :  { %4350 = vmatmul.mubr.f32.gmra.mrb[26].mxu1 %v6970_v32 }
 0xb92   :  { %4352 = vmatprep.mubr.f32.mxu1 %v6978_v63 }
 0xb93   :  { %2262 = vadd.xlane.f32.xlu0 %v2235_v2  ;;  %v7095_v2 = vpop.xlane.xlu0 %2204 }
 0xb94   :  { %878 = vadd.xlane.f32.xlu1 %v877_v43  ;;  %v7075_v35 = vpop.xlane.xlu1 %779  ;;  %v4986_v43 = vpack.c.bf16 %v3270_v28, %v3269_v33  ;;  %v3279_v33 = vld [vmem:[%s7391_s21 + $0xf0] sm:$0xff]  ;;  %v3280_v28 = vld [vmem:[%s7391_s21 + $0xf8] sm:$0xff] }
 0xb95   :  { %4353 = vmatmul.mubr.f32.gmra.mrb[28].mxu1 %v6986_v60 }
 0xb96   :  { %4355 = vmatprep.mubr.f32.mxu1 %v6994_v30 }
 0xb97   :  { %2264 = vadd.xlane.f32.xlu0 %v2236_v18  ;;  %v3272_v18 = vld [vmem:[%s7391_s21 + $0xb8] sm:$0xff]  ;;  %v7103_v36 = vpop.xlane.xlu0 %2206 }
 0xb98   :  { %v740_v16 = vpop.xlane.xlu1 %739  ;;  %v4990_v48 = vpack.c.bf16 %v3272_v18, %v3271_v23 }
 0xb99   :  { %4356 = vmatmul.mubr.f32.gmra.mrb[30].mxu1 %v7000_v51 }
 0xb9a   :  { %4358 = vmatprep.mubr.f32.mxu1 %v7008_v37 }
 0xb9b   :  { %2266 = vadd.xlane.f32.xlu0 %v2237_v13 }
 0xb9c   :  { %v7105_v13 = vpop.xlane.xlu1 %781 }
 0xb9d   :  { %4359 = vmatmul.mubr.f32.gmra.mrb[32].mxu1 %v7014_v20 }
 0xb9e   :  { %4361 = vmatprep.mubr.f32.mxu1 %v7022_v25 }
 0xb9f   :  { %2268 = vadd.xlane.f32.xlu0 %v2238_v1  ;;  %v3273_v1 = vld [vmem:[%s7391_s21 + $0xc0] sm:$0xff] }
 0xba1   :  { %4362 = vmatmul.mubr.f32.gmra.mrb[34].mxu1 %v7030_v41 }
 0xba2   :  { %4364 = vmatprep.mubr.f32.mxu1 %v7038_v14 }
 0xba3   :  { %2270 = vadd.xlane.f32.xlu0 %v2239_v19  ;;  %v4994_v19 = vpack.c.bf16 %v3274_v40, %v3273_v1  ;;  %v2384_v1 = vld [vmem:[%s7391_s21 + $0x8] sm:$0xff] }
 0xba5   :  { %4365 = vmatmul.mubr.f32.gmra.mrb[36].mxu1 %v7046_v46 }
 0xba6   :  { %4367 = vmatprep.mubr.f32.mxu1 %v7054_v38 }
 0xba7   :  { %2186 = vadd.xlane.f32.xlu0 %v2185_v55  ;;  %v3275_v55 = vld [vmem:[%s7391_s21 + $0xd0] sm:$0xff] }
 0xba9   :  { %4368 = vmatmul.mubr.f32.gmra.mrb[38].mxu1 %v7062_v26 }
 0xbaa   :  { %4514 = vmatprep.mubr.f32.mxu1 %v6811_v8  ;;  %v3266_v8 = vld [vmem:[%s7391_s21 + $0x88] sm:$0xff] }
 0xbab   :  { %2353 = vadd.xlane.f32.xlu0 %v2352_v42  ;;  %v4978_v39 = vpack.c.bf16 %v3266_v8, %v3265_v7  ;;  %v7119_v42 = vpop.xlane.xlu0 %2208  ;;  %v4998_v7 = vpack.c.bf16 %v3276_v31, %v3275_v55  ;;  %v3277_v8 = vld [vmem:[%s7391_s21 + $0xe0] sm:$0xff] }
 0xbad   :  { %4979 = vmatprep.subr.bf16.mxu0 %v4978_v39 }
 0xbae   :  { %4981 = vmatpush3.bf16.msra.mxu0 %v4978_v39 }
 0xbaf   :  { %2349 = vadd.xlane.f32.xlu0 %v2348_v29  ;;  %4983 = vmatprep.subr.bf16.mxu0 %v4982_v47  ;;  %v742_v29 = vpop.xlane.xlu1 %741  ;;  %v7127_v39 = vpop.xlane.xlu0 %2210 }
 0xbb0   :  { %v813_v24 = vmul.f32 %v742_v29, %v742_v29 }
 0xbb2   :  { %4985 = vmatpush3.bf16.msra.mxu0 %v4982_v47  ;;  %v5002_v47 = vpack.c.bf16 %v3278_v45, %v3277_v8  ;;  %v810_v45 = vmul.f32 %v736_v4, %v736_v4 }
 0xbb3   :  { %4987 = vmatprep.subr.bf16.mxu0 %v4986_v43  ;;  %v784_v34 = vpop.xlane.xlu1 %783  ;;  %v7135_v23 = vpop.xlane.xlu0 %2212 }
 0xbb6   :  { %4989 = vmatpush3.bf16.msra.mxu0 %v4986_v43  ;;  %v5006_v43 = vpack.c.bf16 %v3280_v28, %v3279_v33  ;;  %v811_v33 = vmul.f32 %v7073_v5, %v7073_v5 }
 0xbb7   :  { %4991 = vmatprep.subr.bf16.mxu0 %v4990_v48  ;;  %v744_v18 = vpop.xlane.xlu1 %743 }
 0xbb8   :  { %v814_v46 = vmul.f32 %v744_v18, %v744_v18 }
 0xbba   :  { %4993 = vmatpush3.bf16.msra.mxu0 %v4990_v48  ;;  %v2383_v48 = vld [vmem:[%s7391_s21] sm:$0xff] }
 0xbbb   :  { %4995 = vmatprep.subr.bf16.mxu0 %v4994_v19  ;;  %v7143_v40 = vpack.c.bf16 %v2384_v1, %v2383_v48  ;;  %v786_v55 = vpop.xlane.xlu1 %785  ;;  %v812_v48 = vmul.f32 %v740_v16, %v740_v16  ;;  %v2280_v16 = vmul.f32 %v7095_v2, %v7095_v2 }
 0xbbe   :  { %4997 = vmatpush3.bf16.msra.mxu0 %v4994_v19  ;;  %v7145_v19 = vpop.xlane.xlu0 %2214 }
 0xbbf   :  { %4999 = vmatprep.subr.bf16.mxu0 %v4998_v7  ;;  %v746_v8 = vpop.xlane.xlu1 %745 }
 0xbc0   :  { %v815_v14 = vmul.f32 %v746_v8, %v746_v8  ;;  %v2281_v8 = vmul.f32 %v7103_v36, %v7103_v36 }
 0xbc2   :  { %5001 = vmatpush3.bf16.msra.mxu0 %v4998_v7  ;;  %v7148_v31 = vpop.xlane.xlu0 %2216  ;;  %v809_v7 = vmul.f32 %v7049_v62, %v7049_v62  ;;  %v840_v62 = vmul.f32 %v7025_v49, %v7025_v49  ;;  %v2295_v49 = vadd.f32 %v6806_v15, %v2280_v16  ;;  %v2282_v15 = vmul.f32 %v7119_v42, %v7119_v42 }
 0xbc3   :  { %5003 = vmatprep.subr.bf16.mxu0 %v5002_v47  ;;  %v788_v1 = vpop.xlane.xlu1 %787  ;;  %v2284_v42 = vmul.f32 %v7135_v23, %v7135_v23 }
 0xbc4   :  { %v855_v29 = vadd.f32 %v6814_v9, %v840_v62  ;;  %v844_v9 = vmul.f32 %v7105_v13, %v7105_v13 }
 0xbc6   :  { %5005 = vmatpush3.bf16.msra.mxu0 %v5002_v47  ;;  %v824_v47 = vadd.f32 %v6816_v0, %v809_v7  ;;  %v7155_v28 = vpop.xlane.xlu0 %2218  ;;  %v841_v0 = vmul.f32 %v7067_v3, %v7067_v3 }
 0xbc7   :  { %5007 = vmatprep.subr.bf16.mxu0 %v5006_v43 }
 0xbca   :  { %5009 = vmatpush3.bf16.msra.mxu0 %v5006_v43  ;;  %v825_v43 = vadd.f32 %v824_v47, %v810_v45 }
 0xbcb   :  { %5011 = vmatprep.subr.bf16.mxu0 %v7143_v40 }
 0xbcc   :  { %v826_v26 = vadd.f32 %v825_v43, %v811_v33  ;;  %v2296_v43 = vadd.f32 %v2295_v49, %v2281_v8 }
 0xbce   :  { %v827_v38 = vadd.f32 %v826_v26, %v812_v48  ;;  %v842_v26 = vmul.f32 %v7071_v53, %v7071_v53 }
 0xbd0   :  { %v828_v4 = vadd.f32 %v827_v38, %v813_v24  ;;  %v856_v24 = vadd.f32 %v855_v29, %v841_v0  ;;  %v843_v38 = vmul.f32 %v7075_v35, %v7075_v35  ;;  %v846_v0 = vmul.f32 %v786_v55, %v786_v55 }
 0xbd2   :  { %v829_v5 = vadd.f32 %v828_v4, %v814_v46  ;;  %v857_v33 = vadd.f32 %v856_v24, %v842_v26  ;;  %v2283_v26 = vmul.f32 %v7127_v39, %v7127_v39  ;;  %v2285_v39 = vmul.f32 %v7145_v19, %v7145_v19 }
 0xbd4   :  { %v830_v18 = vadd.f32 %v829_v5, %v815_v14  ;;  %v858_v53 = vadd.f32 %v857_v33, %v843_v38  ;;  %v845_v14 = vmul.f32 %v784_v34, %v784_v34  ;;  %v2297_v5 = vadd.f32 %v2296_v43, %v2282_v15 }
 0xbd6   :  { %v859_v35 = vadd.f32 %v858_v53, %v844_v9  ;;  %v2298_v34 = vadd.f32 %v2297_v5, %v2283_v26 }
 0xbd8   :  { %v860_v16 = vadd.f32 %v859_v35, %v845_v14 }
 0xbf8   :  { %v2241_v58 = vpop.xlane.xlu1 %2240  ;;  %v2243_v6 = vpop.xlane.xlu0 %2242 }
 0xbf9   :  { %v2309_v35 = vmul.f32 %v2241_v58, %v2241_v58 }
 0xbfc   :  { %v2245_v7 = vpop.xlane.xlu0 %2244 }
 0xbfd   :  { %v748_v45 = vpop.xlane.xlu1 %747  ;;  %v2311_v26 = vmul.f32 %v2245_v7, %v2245_v7 }
 0xbfe   :  { %v816_v47 = vmul.f32 %v748_v45, %v748_v45  ;;  %v847_v45 = vmul.f32 %v788_v1, %v788_v1  ;;  %v2299_v1 = vadd.f32 %v2298_v34, %v2284_v42 }
 0xc00   :  { %v831_v3 = vadd.f32 %v830_v18, %v816_v47  ;;  %v2247_v46 = vpop.xlane.xlu0 %2246  ;;  %v861_v18 = vadd.f32 %v860_v16, %v846_v0  ;;  %v2300_v0 = vadd.f32 %v2299_v1, %v2285_v39 }
 0xc01   :  { %v790_v2 = vpop.xlane.xlu1 %789  ;;  %v2312_v34 = vmul.f32 %v2247_v46, %v2247_v46 }
 0xc02   :  { %v832_v48 = vrot.slane %v831_v3, 4  ;;  %v848_v47 = vmul.f32 %v790_v2, %v790_v2  ;;  %v862_v49 = vadd.f32 %v861_v18, %v847_v45  ;;  %v2286_v45 = vmul.f32 %v7148_v31, %v7148_v31 }
 0xc04   :  { %v2249_v62 = vpop.xlane.xlu0 %2248  ;;  %v833_v36 = vadd.f32 %v832_v48, %v831_v3  ;;  %v863_v33 = vadd.f32 %v862_v49, %v848_v47  ;;  %v2301_v49 = vadd.f32 %v2300_v0, %v2286_v45 }
 0xc05   :  { %v792_v4 = vpop.xlane.xlu1 %791  ;;  %v2313_v42 = vmul.f32 %v2249_v62, %v2249_v62 }
 0xc06   :  { %v834_v24 = vrot.slane %v833_v36, 2  ;;  %v849_v38 = vmul.f32 %v792_v4, %v792_v4  ;;  %v2310_v4 = vmul.f32 %v2243_v6, %v2243_v6  ;;  %v2287_v6 = vmul.f32 %v7155_v28, %v7155_v28 }
 0xc08   :  { %v2251_v29 = vpop.xlane.xlu0 %2250  ;;  %v864_v3 = vadd.f32 %v863_v33, %v849_v38  ;;  %v835_v14 = vadd.f32 %v834_v24, %v833_v36  ;;  %v2325_v36 = vadd.f32 %v2310_v4, %v2309_v35  ;;  %v2302_v7 = vadd.f32 %v2301_v49, %v2287_v6 }
 0xc09   :  { %v794_v13 = vpop.xlane.xlu1 %793  ;;  %v2314_v31 = vmul.f32 %v2251_v29, %v2251_v29 }
 0xc0a   :  { %v850_v9 = vmul.f32 %v794_v13, %v794_v13  ;;  %v836_v23 = vrot.slane %v835_v14, 1  ;;  %v2326_v58 = vadd.f32 %v2325_v36, %v2311_v26  ;;  %v2303_v0 = vrot.slane %v2302_v7, 4 }
 0xc0c   :  { %v2253_v8 = vpop.xlane.xlu0 %2252  ;;  %v865_v48 = vadd.f32 %v864_v3, %v850_v9  ;;  %v837_v24 = vadd.f32 %v836_v23, %v835_v14  ;;  %v2327_v1 = vadd.f32 %v2326_v58, %v2312_v34 }
 0xc0d   :  { %v796_v55 = vpop.xlane.xlu1 %795  ;;  %v2315_v46 = vmul.f32 %v2253_v8, %v2253_v8 }
 0xc0e   :  { %v851_v43 = vmul.f32 %v796_v55, %v796_v55 }
 0xc10   :  { %v2255_v53 = vpop.xlane.xlu0 %2254  ;;  %v866_v5 = vadd.f32 %v865_v48, %v851_v43 }
 0xc11   :  { %v798_v2 = vpop.xlane.xlu1 %797  ;;  %v2316_v35 = vmul.f32 %v2255_v53, %v2255_v53 }
 0xc12   :  { %v852_v15 = vmul.f32 %v798_v2, %v798_v2  ;;  %v2328_v2 = vadd.f32 %v2327_v1, %v2313_v42 }
 0xc14   :  { %v2257_v16 = vpop.xlane.xlu0 %2256  ;;  %v867_v18 = vadd.f32 %v866_v5, %v852_v15  ;;  %v2329_v14 = vadd.f32 %v2328_v2, %v2314_v31 }
 0xc15   :  { %v800_v13 = vpop.xlane.xlu1 %799  ;;  %v2317_v23 = vmul.f32 %v2257_v16, %v2257_v16 }
 0xc16   :  { %v853_v47 = vmul.f32 %v800_v13, %v800_v13  ;;  %v2330_v5 = vadd.f32 %v2329_v14, %v2315_v46  ;;  %v2304_v13 = vadd.f32 %v2303_v0, %v2302_v7 }
 0xc18   :  { %v868_v19 = vadd.f32 %v867_v18, %v853_v47  ;;  %v2259_v38 = vpop.xlane.xlu0 %2258  ;;  %v2331_v26 = vadd.f32 %v2330_v5, %v2316_v35  ;;  %v2305_v53 = vrot.slane %v2304_v13, 2 }
 0xc19   :  { %v716_v55 = vpop.xlane.xlu1 %715  ;;  %v2318_v29 = vmul.f32 %v2259_v38, %v2259_v38 }
 0xc1a   :  { %v869_v33 = vrot.slane %v868_v19, 4  ;;  %v887_v9 = vsub.f32 %v837_v24, %v716_v55  ;;  %v2332_v36 = vadd.f32 %v2331_v26, %v2317_v23  ;;  %v2306_v31 = vadd.f32 %v2305_v53, %v2304_v13 }
 0xc1c   :  { %v870_v3 = vadd.f32 %v869_v33, %v868_v19  ;;  %v888_v43 = vmul.f32 0.0625, %v887_v9  ;;  %v2261_v39 = vpop.xlane.xlu0 %2260  ;;  %v2333_v19 = vadd.f32 %v2332_v36, %v2318_v29 }
 0xc1d   :  { %v883_v4 = vpop.xlane.xlu1 %882  ;;  %v2319_v34 = vmul.f32 %v2261_v39, %v2261_v39  ;;  %v2307_v39 = vrot.slane %v2306_v31, 1 }
 0xc1e   :  { %v889_v48 = vsub.f32 %v716_v55, %v888_v43  ;;  %v871_v15 = vrot.slane %v870_v3, 2 }
 0xc1f   :  { %v2334_v42 = vadd.f32 %v2333_v19, %v2319_v34  ;;  %v2308_v35 = vadd.f32 %v2307_v39, %v2306_v31 }
 0xc20   :  { %5190 = vrcp.f32 %v889_v48  ;;  %v872_v28 = vadd.f32 %v871_v15, %v870_v3  ;;  %v2263_v62 = vpop.xlane.xlu0 %2262 }
 0xc21   :  { %v879_v8 = vpop.xlane.xlu1 %878  ;;  %v2320_v24 = vmul.f32 %v2263_v62, %v2263_v62  ;;  %5192 = vrcp.f32 %v883_v4 }
 0xc22   :  { %v873_v45 = vrot.slane %v872_v28, 1 }
 0xc23   :  { %v2335_v16 = vadd.f32 %v2334_v42, %v2320_v24 }
 0xc24   :  { %v874_v18 = vadd.f32 %v873_v45, %v872_v28  ;;  %v2265_v47 = vpop.xlane.xlu0 %2264 }
 0xc25   :  { %v2321_v55 = vmul.f32 %v2265_v47, %v2265_v47 }
 0xc26   :  { %v884_v49 = vsub.f32 %v874_v18, %v879_v8 }
 0xc27   :  { %v2336_v3 = vadd.f32 %v2335_v16, %v2321_v55  ;;  %v2386_v16 = vld [vmem:[%s7391_s21 + $0x18] sm:$0xff] }
 0xc28   :  { %v885_v6 = vmul.f32 0.0625, %v884_v49  ;;  %v2267_v58 = vpop.xlane.xlu0 %2266 }
 0xc29   :  { %v2322_v1 = vmul.f32 %v2267_v58, %v2267_v58 }
 0xc2a   :  { %v5191_v33 = vpop.eup %5190  ;;  %v886_v9 = vsub.f32 %v879_v8, %v885_v6 }
 0xc2b   :  { %v2337_v2 = vadd.f32 %v2336_v3, %v2322_v1  ;;  %v5193_v8 = vpop.eup %5192 }
 0xc2c   :  { %v891_v38 = vmul.f32 %v5191_v33, %v886_v9  ;;  %v2269_v7 = vpop.xlane.xlu0 %2268  ;;  %v893_v6 = vmul.f32 16.0, %v5193_v8  ;;  %v2385_v9 = vld [vmem:[%s7391_s21 + $0x10] sm:$0xff] }
 0xc2d   :  { %v2323_v43 = vmul.f32 %v2269_v7, %v2269_v7  ;;  %v5014_v7 = vpack.c.bf16 %v2386_v16, %v2385_v9 }
 0xc2e   :  { %v894_v55 = vmul.f32 %v893_v6, %v891_v38  ;;  %v2387_v38 = vld [vmem:[%s7391_s21 + $0x20] sm:$0xff] }
 0xc2f   :  { %v2338_v48 = vadd.f32 %v2337_v2, %v2323_v43  ;;  %v2388_v43 = vld [vmem:[%s7391_s21 + $0x28] sm:$0xff] }
 0xc30   :  { %v2271_v46 = vpop.xlane.xlu0 %2270 }
 0xc31   :  { %v2324_v15 = vmul.f32 %v2271_v46, %v2271_v46  ;;  %v5018_v46 = vpack.c.bf16 %v2388_v43, %v2387_v38 }
 0xc33   :  { %v2339_v14 = vadd.f32 %v2338_v48, %v2324_v15  ;;  %v2389_v15 = vld [vmem:[%s7391_s21 + $0x30] sm:$0xff] }
 0xc34   :  { %v2187_v0 = vpop.xlane.xlu0 %2186 }
 0xc35   :  { %v2340_v28 = vrot.slane %v2339_v14, 4  ;;  %v2358_v62 = vsub.f32 %v2308_v35, %v2187_v0 }
 0xc37   :  { %v2341_v5 = vadd.f32 %v2340_v28, %v2339_v14  ;;  %v2359_v23 = vmul.f32 0.03125, %v2358_v62  ;;  %v2390_v14 = vld [vmem:[%s7391_s21 + $0x38] sm:$0xff]  ;;  %v2391_v62 = vld [vmem:[%s7391_s21 + $0x40] sm:$0xff] }
 0xc38   :  { %v2354_v45 = vpop.xlane.xlu0 %2353 }
 0xc39   :  { %v2360_v26 = vsub.f32 %v2187_v0, %v2359_v23  ;;  %v2342_v29 = vrot.slane %v2341_v5, 2  ;;  %5194 = vrcp.f32 %v2354_v45  ;;  %v5022_v0 = vpack.c.bf16 %v2390_v14, %v2389_v15  ;;  %v3286_v15 = vld [vmem:[%s7391_s21 + $0x128] sm:$0xff]  ;;  %v3287_v14 = vld [vmem:[%s7391_s21 + $0x130] sm:$0xff] }
 0xc3b   :  { %5196 = vrcp.f32 %v2360_v26  ;;  %v2343_v13 = vadd.f32 %v2342_v29, %v2341_v5  ;;  %v2392_v5 = vld [vmem:[%s7391_s21 + $0x48] sm:$0xff] }
 0xc3c   :  { %v2350_v36 = vpop.xlane.xlu0 %2349  ;;  %v5026_v26 = vpack.c.bf16 %v2392_v5, %v2391_v62 }
 0xc3d   :  { %v2344_v18 = vrot.slane %v2343_v13, 1 }
 0xc3f   :  { %v2345_v47 = vadd.f32 %v2344_v18, %v2343_v13  ;;  %v2393_v13 = vld [vmem:[%s7391_s21 + $0x50] sm:$0xff]  ;;  %v2394_v18 = vld [vmem:[%s7391_s21 + $0x58] sm:$0xff] }
 0xc41   :  { %v2355_v34 = vsub.f32 %v2345_v47, %v2350_v36 }
 0xc43   :  { %v2356_v49 = vmul.f32 0.03125, %v2355_v34  ;;  %v5195_v19 = vpop.eup %5194  ;;  %v5030_v34 = vpack.c.bf16 %v2394_v18, %v2393_v13 }
 0xc44   :  { %v2364_v58 = vmul.f32 32.0, %v5195_v19  ;;  %v2396_v19 = vld [vmem:[%s7391_s21 + $0x68] sm:$0xff] }
 0xc45   :  { %v5197_v24 = vpop.eup %5196  ;;  %v2357_v53 = vsub.f32 %v2350_v36, %v2356_v49  ;;  %v2395_v49 = vld [vmem:[%s7391_s21 + $0x60] sm:$0xff] }
 0xc46   :  { %v5034_v6 = vpack.c.bf16 %v2396_v19, %v2395_v49 }
 0xc47   :  { %v2362_v42 = vmul.f32 %v5197_v24, %v2357_v53 }
 0xc49   :  { %v2365_v33 = vmul.f32 %v2364_v58, %v2362_v42  ;;  %v2397_v42 = vld [vmem:[%s7391_s21 + $0x70] sm:$0xff] }
 0xc4b   :  { %v2366_v4 = vadd.f32 %v2365_v33, %v894_v55  ;;  %v2398_v55 = vld [vmem:[%s7391_s21 + $0x78] sm:$0xff] }
 0xc4c   :  { %v5038_v9 = vpack.c.bf16 %v2398_v55, %v2397_v42 }
 0xc4d   :  { %3213 = vst [vmem:[#allocation2] sm:$0x1] %v2366_v4 }
 0xc60   :  { %v4348_v1 = vpop.f32.mrb[24].mxu1 }
 0xc61   :  { %v2465_v31 = vpop.f32.mrb[25].mxu1 }
 0xc62   :  { %v5042_v3 = vpack.c.bf16 %v4348_v1, %v2465_v31  ;;  %4402 = vmatprep.mubr.f32.mxu0 %v2465_v31  ;;  %v3282_v31 = vld [vmem:[%s7391_s21 + $0x108] sm:$0xff] }
 0xc63   :  { %4403 = vmatmul.mubr.f32.vlgmr.msra.gmra.mrb[40].mxu0 %v4348_v1  ;;  %v3281_v1 = vld [vmem:[%s7391_s21 + $0x100] sm:$0xff] }
 0xc64   :  { %v4351_v2 = vpop.f32.mrb[26].mxu1  ;;  %5013 = vmatpush3.bf16.msra.mxu0 %v7143_v40  ;;  %5043 = vmatprep.subr.bf16.mxu1 %v5042_v3  ;;  %v5074_v38 = vpack.c.bf16 %v3282_v31, %v3281_v1 }
 0xc65   :  { %v2475_v39 = vpop.f32.mrb[27].mxu1  ;;  %5045 = vmatpush3.bf16.msra.mxu1 %v5042_v3  ;;  %5015 = vmatprep.subr.bf16.mxu0 %v5014_v7 }
 0xc66   :  { %v5046_v48 = vpack.c.bf16 %v4351_v2, %v2475_v39  ;;  %4405 = vmatprep.mubr.f32.mxu0 %v2475_v39  ;;  %v3284_v39 = vld [vmem:[%s7391_s21 + $0x118] sm:$0xff] }
 0xc67   :  { %4406 = vmatmul.mubr.f32.gmra.mrb[42].mxu0 %v4351_v2  ;;  %v3283_v2 = vld [vmem:[%s7391_s21 + $0x110] sm:$0xff] }
 0xc68   :  { %v4354_v35 = vpop.f32.mrb[28].mxu1  ;;  %5017 = vmatpush3.bf16.msra.mxu0 %v5014_v7  ;;  %5047 = vmatprep.subr.bf16.mxu1 %v5046_v48 }
 0xc69   :  { %v2485_v40 = vpop.f32.mrb[29].mxu1  ;;  %5049 = vmatpush3.bf16.msra.mxu1 %v5046_v48  ;;  %5019 = vmatprep.subr.bf16.mxu0 %v5018_v46  ;;  %v3285_v48 = vld [vmem:[%s7391_s21 + $0x120] sm:$0xff] }
 0xc6a   :  { %v5050_v28 = vpack.c.bf16 %v4354_v35, %v2485_v40  ;;  %4408 = vmatprep.mubr.f32.mxu0 %v2485_v40 }
 0xc6b   :  { %4409 = vmatmul.mubr.f32.gmra.mrb[44].mxu0 %v4354_v35  ;;  %v3288_v35 = vld [vmem:[%s7391_s21 + $0x138] sm:$0xff] }
 0xc6c   :  { %v4357_v23 = vpop.f32.mrb[30].mxu1  ;;  %5021 = vmatpush3.bf16.msra.mxu0 %v5018_v46  ;;  %5051 = vmatprep.subr.bf16.mxu1 %v5050_v28  ;;  %v5078_v46 = vpack.c.bf16 %v3284_v39, %v3283_v2 }
 0xc6d   :  { %v2495_v45 = vpop.f32.mrb[31].mxu1  ;;  %5053 = vmatpush3.bf16.msra.mxu1 %v5050_v28  ;;  %5023 = vmatprep.subr.bf16.mxu0 %v5022_v0 }
 0xc6e   :  { %v5054_v29 = vpack.c.bf16 %v4357_v23, %v2495_v45  ;;  %4411 = vmatprep.mubr.f32.mxu0 %v2495_v45 }
 0xc6f   :  { %4412 = vmatmul.mubr.f32.gmra.mrb[46].mxu0 %v4357_v23 }
 0xc70   :  { %v4360_v47 = vpop.f32.mrb[32].mxu1  ;;  %5025 = vmatpush3.bf16.msra.mxu0 %v5022_v0  ;;  %5055 = vmatprep.subr.bf16.mxu1 %v5054_v29 }
 0xc71   :  { %v2505_v36 = vpop.f32.mrb[33].mxu1  ;;  %5057 = vmatpush3.bf16.msra.mxu1 %v5054_v29  ;;  %5027 = vmatprep.subr.bf16.mxu0 %v5026_v26 }
 0xc72   :  { %v5058_v8 = vpack.c.bf16 %v4360_v47, %v2505_v36  ;;  %4414 = vmatprep.mubr.f32.mxu0 %v2505_v36 }
 0xc73   :  { %4415 = vmatmul.mubr.f32.gmra.mrb[48].mxu0 %v4360_v47 }
 0xc74   :  { %v4363_v24 = vpop.f32.mrb[34].mxu1  ;;  %5029 = vmatpush3.bf16.msra.mxu0 %v5026_v26  ;;  %5059 = vmatprep.subr.bf16.mxu1 %v5058_v8 }
 0xc75   :  { %v2515_v53 = vpop.f32.mrb[35].mxu1  ;;  %5061 = vmatpush3.bf16.msra.mxu1 %v5058_v8  ;;  %5031 = vmatprep.subr.bf16.mxu0 %v5030_v34 }
 0xc76   :  { %v5062_v58 = vpack.c.bf16 %v4363_v24, %v2515_v53  ;;  %4417 = vmatprep.mubr.f32.mxu0 %v2515_v53 }
 0xc77   :  { %4418 = vmatmul.mubr.f32.gmra.mrb[50].mxu0 %v4363_v24 }
 0xc78   :  { %v4366_v33 = vpop.f32.mrb[36].mxu1  ;;  %5033 = vmatpush3.bf16.msra.mxu0 %v5030_v34  ;;  %5063 = vmatprep.subr.bf16.mxu1 %v5062_v58 }
 0xc79   :  { %v2525_v4 = vpop.f32.mrb[37].mxu1  ;;  %5065 = vmatpush3.bf16.msra.mxu1 %v5062_v58  ;;  %5035 = vmatprep.subr.bf16.mxu0 %v5034_v6 }
 0xc7a   :  { %v5066_v16 = vpack.c.bf16 %v4366_v33, %v2525_v4  ;;  %4420 = vmatprep.mubr.f32.mxu0 %v2525_v4 }
 0xc7b   :  { %4421 = vmatmul.mubr.f32.gmra.mrb[52].mxu0 %v4366_v33 }
 0xc7c   :  { %v4369_v7 = vpop.f32.mrb[38].mxu1  ;;  %5037 = vmatpush3.bf16.msra.mxu0 %v5034_v6  ;;  %5067 = vmatprep.subr.bf16.mxu1 %v5066_v16 }
 0xc7d   :  { %v2535_v3 = vpop.f32.mrb[39].mxu1  ;;  %5069 = vmatpush3.bf16.msra.mxu1 %v5066_v16  ;;  %5039 = vmatprep.subr.bf16.mxu0 %v5038_v9 }
 0xc7e   :  { %v5070_v43 = vpack.c.bf16 %v4369_v7, %v2535_v3  ;;  %4423 = vmatprep.mubr.f32.mxu0 %v2535_v3 }
 0xc7f   :  { %4424 = vmatmul.mubr.f32.gmra.mrb[54].mxu0 %v4369_v7 }
 0xc80   :  { %5041 = vmatpush3.bf16.msra.mxu0 %v5038_v9  ;;  %4458 = vmatprep.mubr.f32.mxu0 %v6838_v12  ;;  %v5082_v12 = vpack.c.bf16 %v3286_v15, %v3285_v48 }
 0xc81   :  { %5071 = vmatprep.subr.bf16.mxu1 %v5070_v43  ;;  %5075 = vmatprep.subr.bf16.mxu0 %v5074_v38 }
 0xc82   :  { %5073 = vmatpush3.bf16.msra.mxu1 %v5070_v43 }
 0xc83   :  { %4459 = vmatmul.mubr.f32.vlgmr.msra.gmra.mrb[40].mxu0 %v6842_v56  ;;  %v5086_v56 = vpack.c.bf16 %v3288_v35, %v3287_v14 }
 0xc84   :  { %4461 = vmatprep.mubr.f32.mxu0 %v6846_v52  ;;  %5077 = vmatpush3.bf16.msra.mxu0 %v5074_v38  ;;  %v3289_v52 = vld [vmem:[%s7391_s21 + $0x140] sm:$0xff] }
 0xc85   :  { %4515 = vmatmul.mubr.f32.vlgmr.msra.gmra.mrb[40].mxu1 %v6955_v61  ;;  %5079 = vmatprep.subr.bf16.mxu0 %v5078_v46  ;;  %v3290_v61 = vld [vmem:[%s7391_s21 + $0x148] sm:$0xff] }
 0xc86   :  { %4517 = vmatprep.mubr.f32.mxu1 %v6963_v27  ;;  %v3292_v27 = vld [vmem:[%s7391_s21 + $0x158] sm:$0xff] }
 0xc87   :  { %4462 = vmatmul.mubr.f32.gmra.mrb[42].mxu0 %v6850_v10  ;;  %v5090_v10 = vpack.c.bf16 %v3290_v61, %v3289_v52 }
 0xc88   :  { %4464 = vmatprep.mubr.f32.mxu0 %v6860_v57  ;;  %5081 = vmatpush3.bf16.msra.mxu0 %v5078_v46  ;;  %v3291_v57 = vld [vmem:[%s7391_s21 + $0x150] sm:$0xff] }
 0xc89   :  { %4518 = vmatmul.mubr.f32.gmra.mrb[42].mxu1 %v6970_v32  ;;  %5083 = vmatprep.subr.bf16.mxu0 %v5082_v12  ;;  %v3294_v32 = vld [vmem:[%s7391_s21 + $0x168] sm:$0xff] }
 0xc8a   :  { %4520 = vmatprep.mubr.f32.mxu1 %v6978_v63  ;;  %v3296_v63 = vld [vmem:[%s7391_s21 + $0x178] sm:$0xff] }
 0xc8b   :  { %4465 = vmatmul.mubr.f32.gmra.mrb[44].mxu0 %v6864_v50  ;;  %v5094_v50 = vpack.c.bf16 %v3292_v27, %v3291_v57 }
 0xc8c   :  { %4467 = vmatprep.mubr.f32.mxu0 %v6873_v17  ;;  %5085 = vmatpush3.bf16.msra.mxu0 %v5082_v12  ;;  %v3293_v17 = vld [vmem:[%s7391_s21 + $0x160] sm:$0xff] }
 0xc8d   :  { %4521 = vmatmul.mubr.f32.gmra.mrb[44].mxu1 %v6986_v60  ;;  %5087 = vmatprep.subr.bf16.mxu0 %v5086_v56  ;;  %v7572_v60 = vld [vmem:[#allocation8_spill] sm:$0xff] }
 0xc8e   :  { %4523 = vmatprep.mubr.f32.mxu1 %v6994_v30  ;;  %v7573_v30 = vld [vmem:[#allocation19_spill] sm:$0xff] }
 0xc8f   :  { %4468 = vmatmul.mubr.f32.gmra.mrb[46].mxu0 %v6877_v54  ;;  %v5098_v54 = vpack.c.bf16 %v3294_v32, %v3293_v17 }
 0xc90   :  { %4470 = vmatprep.mubr.f32.mxu0 %v6890_v22  ;;  %5089 = vmatpush3.bf16.msra.mxu0 %v5086_v56  ;;  %v3295_v22 = vld [vmem:[%s7391_s21 + $0x170] sm:$0xff]  ;;  %s5244_s21 = smov [#allocation2]  }
 0xc91   :  { %4524 = vmatmul.mubr.f32.gmra.mrb[46].mxu1 %v7000_v51  ;;  %5091 = vmatprep.subr.bf16.mxu0 %v5090_v10  ;;  %v7574_v51 = vld [vmem:[#allocation18_spill] sm:$0xff]  ;;  %s3222_s19 = sshll.u32 %s5244_s21, 4  ;;  %s3223_s19 = int_to_ptr.vmem [resolvable:$true] %s3222_s19 }
 0xc92   :  { %4526 = vmatprep.mubr.f32.mxu1 %v7008_v37  ;;  %v7575_v37 = vld [vmem:[#allocation26_spill] sm:$0xff]  ;;  %s5215_s7 = scalar_lea.vmem %s3223_s19, 16  ;;  %s5219_s30 = scalar_lea.vmem %s3223_s19, 32 }
 0xc93   :  { %4471 = vmatmul.mubr.f32.gmra.mrb[48].mxu0 %v6894_v11  ;;  %v5102_v11 = vpack.c.bf16 %v3296_v63, %v3295_v22  ;;  %p5216_p0 = scmp.ne.s32.totalorder %s3223_s19, %s5215_s7  ;;  %p5220_p1 = scmp.lt.s32.totalorder %s3223_s19, %s3223_s19 }
 0xc94   :  { %4473 = vmatprep.mubr.f32.mxu0 %v6904_v44  ;;  %5093 = vmatpush3.bf16.msra.mxu0 %v5090_v10  ;;  %v7571_v44 = vld [vmem:[#allocation22_spill] sm:$0xff]  ;;  %p5221_p2 = scmp.lt.s32.totalorder %s5219_s30, %s5215_s7 }
 0xc95   :  { %4527 = vmatmul.mubr.f32.gmra.mrb[48].mxu1 %v7014_v20  ;;  %5095 = vmatprep.subr.bf16.mxu0 %v5094_v50 }
 0xc96   :  { %4529 = vmatprep.mubr.f32.mxu1 %v7022_v25  ;;  %p5222_p3 = por %p5221_p2, %p5220_p1 }
 0xc97   :  { %4474 = vmatmul.mubr.f32.gmra.mrb[50].mxu0 %v6908_v59  ;;  %v7576_v59 = vld [vmem:[#allocation13_spill] sm:$0xff] }
 0xc98   :  { %4476 = vmatprep.mubr.f32.mxu0 %v6918_v21  ;;  %5097 = vmatpush3.bf16.msra.mxu0 %v5094_v50  ;;  %v7577_v21 = vld [vmem:[#allocation24_spill] sm:$0xff]  ;;  %p5223_p4 = pnand %p5222_p3, %p5216_p0 }
 0xc99   :  { %4530 = vmatmul.mubr.f32.gmra.mrb[50].mxu1 %v7030_v41  ;;  %5099 = vmatprep.subr.bf16.mxu0 %v5098_v54 }
 0xc9a   :  { %4532 = vmatprep.mubr.f32.mxu1 %v7571_v44 }
 0xc9b   :  { %4477 = vmatmul.mubr.f32.gmra.mrb[52].mxu0 %v7572_v60 }
 0xc9c   :  { %4479 = vmatprep.mubr.f32.mxu0 %v7573_v30  ;;  %5101 = vmatpush3.bf16.msra.mxu0 %v5098_v54 }
 0xc9d   :  { %4533 = vmatmul.mubr.f32.gmra.mrb[52].mxu1 %v7574_v51  ;;  %5103 = vmatprep.subr.bf16.mxu0 %v5102_v11 }
 0xc9e   :  { %4535 = vmatprep.mubr.f32.mxu1 %v7575_v37 }
 0xc9f   :  { %4480 = vmatmul.mubr.f32.gmra.mrb[54].mxu0 %v7576_v59 }
 0xca0   :  { %5105 = vmatpush3.bf16.msra.mxu0 %v5102_v11 }
 0xca1   :  { %4536 = vmatmul.mubr.f32.gmra.mrb[54].mxu1 %v7577_v21 }
 0xd58   :  { %v4516_v20 = vpop.f32.mrb[40].mxu1 }
 0xd59   :  { %v2917_v25 = vpop.f32.mrb[41].mxu1 }
 0xd5a   :  { %4570 = vmatprep.mubr.f32.mxu0 %v2917_v25 }
 0xd5b   :  { %4571 = vmatmul.mubr.f32.vlgmr.msra.gmra.mrb[40].mxu0 %v4516_v20 }
 0xd5c   :  { %v4519_v41 = vpop.f32.mrb[42].mxu1 }
 0xd5d   :  { %v2927_v40 = vpop.f32.mrb[43].mxu1 }
 0xd5e   :  { %4573 = vmatprep.mubr.f32.mxu0 %v2927_v40 }
 0xd5f   :  { %4574 = vmatmul.mubr.f32.gmra.mrb[42].mxu0 %v4519_v41 }
 0xd60   :  { %v4522_v0 = vpop.f32.mrb[44].mxu1 }
 0xd61   :  { %v2937_v28 = vpop.f32.mrb[45].mxu1 }
 0xd62   :  { %4576 = vmatprep.mubr.f32.mxu0 %v2937_v28 }
 0xd63   :  { %4577 = vmatmul.mubr.f32.gmra.mrb[44].mxu0 %v4522_v0 }
 0xd64   :  { %v4525_v62 = vpop.f32.mrb[46].mxu1 }
 0xd65   :  { %v2947_v5 = vpop.f32.mrb[47].mxu1 }
 0xd66   :  { %4579 = vmatprep.mubr.f32.mxu0 %v2947_v5 }
 0xd67   :  { %4580 = vmatmul.mubr.f32.gmra.mrb[46].mxu0 %v4525_v62 }
 0xd68   :  { %v4528_v23 = vpop.f32.mrb[48].mxu1 }
 0xd69   :  { %v2957_v45 = vpop.f32.mrb[49].mxu1 }
 0xd6a   :  { %4582 = vmatprep.mubr.f32.mxu0 %v2957_v45 }
 0xd6b   :  { %4583 = vmatmul.mubr.f32.gmra.mrb[48].mxu0 %v4528_v23 }
 0xd6c   :  { %v4531_v26 = vpop.f32.mrb[50].mxu1 }
 0xd6d   :  { %v2967_v29 = vpop.f32.mrb[51].mxu1 }
 0xd6e   :  { %4585 = vmatprep.mubr.f32.mxu0 %v2967_v29 }
 0xd6f   :  { %4586 = vmatmul.mubr.f32.gmra.mrb[50].mxu0 %v4531_v26 }
 0xd70   :  { %v4534_v13 = vpop.f32.mrb[52].mxu1 }
 0xd71   :  { %v2977_v18 = vpop.f32.mrb[53].mxu1 }
 0xd72   :  { %4588 = vmatprep.mubr.f32.mxu0 %v2977_v18 }
 0xd73   :  { %4589 = vmatmul.mubr.f32.gmra.mrb[52].mxu0 %v4534_v13 }
 0xd74   :  { %v4537_v47 = vpop.f32.mrb[54].mxu1 }
 0xd75   :  { %v2987_v36 = vpop.f32.mrb[55].mxu1 }
 0xd76   :  { %4591 = vmatprep.mubr.f32.mxu0 %v2987_v36 }
 0xd77   :  { %4592 = vmatmul.mubr.f32.gmra.mrb[54].mxu0 %v4537_v47 }
 0xd78   :  { %5226 = shalt.err (!%p5223_p4)
}
 0xd79   :  { %s5227_s0 = scalar_lea.hbm %s7394_s24, 16 }
 0xd7a   :  { %p5228_p5 = scmp.ne.s32.totalorder %s7394_s24, %s5227_s0  ;;  %p5231_p6 = scmp.lt.u32.totalorder %s5227_s0, %s7394_s24 }
 0xd7c   :  { %p5233_p7 = pnand %p5231_p6, %p5228_p5 }
 0xd7e   :  { %5236 = shalt.err (!%p5233_p7)
}
 0xd7f   :  { %3225 = dma.vmem_to_hbm [thread:$0]  %s3223_s19, 16, %s7394_s24, [#allocation3]   ;;  %v3297_v34 = vld [vmem:[%s7392_s22] ss:$0 sm:$0xff] }
 0xe2e   :  { %v4572_v8 = vpop.f32.mrb[40].mxu0 }
 0xe2f   :  { %v3182_v49 = vadd.f32 %v4572_v8, %v3297_v34  ;;  %v3079_v19 = vpop.f32.mrb[41].mxu0 }
 0xe30   :  { %v3181_v24 = vadd.f32 %v3297_v34, %v3079_v19 }
 0xe31   :  { %3198 = vst [vmem:[%s7393_s23 + $0x8] sm:$0xff] %v3182_v49 }
 0xe32   :  { %3197 = vst [vmem:[%s7393_s23] sm:$0xff] %v3181_v24  ;;  %v4575_v53 = vpop.f32.mrb[42].mxu0 }
 0xe33   :  { %v3184_v6 = vadd.f32 %v4575_v53, %v3297_v34  ;;  %v3089_v58 = vpop.f32.mrb[43].mxu0 }
 0xe34   :  { %v3183_v42 = vadd.f32 %v3297_v34, %v3089_v58 }
 0xe35   :  { %3200 = vst [vmem:[%s7393_s23 + $0x18] sm:$0xff] %v3184_v6 }
 0xe36   :  { %3199 = vst [vmem:[%s7393_s23 + $0x10] sm:$0xff] %v3183_v42  ;;  %v4578_v55 = vpop.f32.mrb[44].mxu0 }
 0xe37   :  { %v3186_v33 = vadd.f32 %v4578_v55, %v3297_v34  ;;  %v3099_v4 = vpop.f32.mrb[45].mxu0 }
 0xe38   :  { %v3185_v9 = vadd.f32 %v3297_v34, %v3099_v4 }
 0xe39   :  { %3202 = vst [vmem:[%s7393_s23 + $0x28] sm:$0xff] %v3186_v33 }
 0xe3a   :  { %3201 = vst [vmem:[%s7393_s23 + $0x20] sm:$0xff] %v3185_v9  ;;  %v4581_v16 = vpop.f32.mrb[46].mxu0 }
 0xe3b   :  { %v3188_v1 = vadd.f32 %v4581_v16, %v3297_v34  ;;  %v3109_v31 = vpop.f32.mrb[47].mxu0 }
 0xe3c   :  { %v3187_v7 = vadd.f32 %v3297_v34, %v3109_v31 }
 0xe3d   :  { %3204 = vst [vmem:[%s7393_s23 + $0x38] sm:$0xff] %v3188_v1 }
 0xe3e   :  { %3203 = vst [vmem:[%s7393_s23 + $0x30] sm:$0xff] %v3187_v7  ;;  %v4584_v3 = vpop.f32.mrb[48].mxu0 }
 0xe3f   :  { %v3190_v38 = vadd.f32 %v4584_v3, %v3297_v34  ;;  %v3119_v43 = vpop.f32.mrb[49].mxu0 }
 0xe40   :  { %v3189_v2 = vadd.f32 %v3297_v34, %v3119_v43 }
 0xe41   :  { %3206 = vst [vmem:[%s7393_s23 + $0x48] sm:$0xff] %v3190_v38 }
 0xe42   :  { %3205 = vst [vmem:[%s7393_s23 + $0x40] sm:$0xff] %v3189_v2  ;;  %v4587_v39 = vpop.f32.mrb[50].mxu0 }
 0xe43   :  { %v3192_v46 = vadd.f32 %v4587_v39, %v3297_v34  ;;  %v3129_v48 = vpop.f32.mrb[51].mxu0 }
 0xe44   :  { %v3191_v15 = vadd.f32 %v3297_v34, %v3129_v48 }
 0xe45   :  { %3208 = vst [vmem:[%s7393_s23 + $0x58] sm:$0xff] %v3192_v46 }
 0xe46   :  { %3207 = vst [vmem:[%s7393_s23 + $0x50] sm:$0xff] %v3191_v15  ;;  %v4590_v12 = vpop.f32.mrb[52].mxu0 }
 0xe47   :  { %v3194_v14 = vadd.f32 %v4590_v12, %v3297_v34  ;;  %v3139_v35 = vpop.f32.mrb[53].mxu0 }
 0xe48   :  { %v3193_v56 = vadd.f32 %v3297_v34, %v3139_v35 }
 0xe49   :  { %3210 = vst [vmem:[%s7393_s23 + $0x68] sm:$0xff] %v3194_v14 }
 0xe4a   :  { %3209 = vst [vmem:[%s7393_s23 + $0x60] sm:$0xff] %v3193_v56  ;;  %v4593_v52 = vpop.f32.mrb[54].mxu0 }
 0xe4b   :  { %v3196_v61 = vadd.f32 %v4593_v52, %v3297_v34  ;;  %v3149_v10 = vpop.f32.mrb[55].mxu0 }
 0xe4c   :  { %v3195_v57 = vadd.f32 %v3297_v34, %v3149_v10 }
 0xe4d   :  { %3212 = vst [vmem:[%s7393_s23 + $0x78] sm:$0xff] %v3196_v61 }
 0xe4e   :  { %3211 = vst [vmem:[%s7393_s23 + $0x70] sm:$0xff] %v3195_v57 }
 0xe4f   :  { %5237 = dma.done.wait [#allocation3], 16  }
 0xe50   :  { %5238 = vsyncadd [#allocation3], 4294967280 }
 0xe51   :  { %3231 = vsyncpa [#allocation3], 1 }

</bundles_post_ra>
